<compile_context>
chip_gen: v7x
topology: tpu7x:2x2x1
jax: 0.10.0
libtpu: 0.0.40
codegen_flags: <defaults>
</compile_context>

<pallas_src>
import functools
import math

import numpy as np
import jax
import jax.numpy as jnp
from jax import lax
from jax.experimental import pallas as pl
from jax.experimental.pallas import tpu as pltpu

# ----------------------- small config consistent with BasicBlock ----------------
B = 2
H = W = 8
EMBED_DIM = 16
INDEX = 0
WINDOW_SIZE = 4
DEPTHS = (2, 2, 6, 2)
NUM_HEADS = (2, 4, 8, 16)
MLP_RATIO = 4.0

DIM = EMBED_DIM * 2 ** INDEX            # 16
DEPTH = DEPTHS[INDEX]                   # 2 blocks: [no-shift, shift]
NH = NUM_HEADS[INDEX]                   # 2 heads
HEAD_DIM = DIM // NH                    # 8
L = WINDOW_SIZE * WINDOW_SIZE           # 16 tokens per window
HIDDEN = int(DIM * MLP_RATIO)           # 64
SCALE = HEAD_DIM ** -0.5
EPS = 1e-5
_SQRT2 = math.sqrt(2.0)
NW = (H // WINDOW_SIZE) * (W // WINDOW_SIZE)   # windows per batch element = 4


# --------------------------------- kernel helpers --------------------------------
def _layernorm(x, gamma, beta):
    mu = jnp.mean(x, axis=-1, keepdims=True)
    var = jnp.mean(jnp.square(x - mu), axis=-1, keepdims=True)
    return (x - mu) * lax.rsqrt(var + EPS) * gamma + beta


def _gelu_exact(x):
    # nn.GELU default (exact erf form)
    return 0.5 * x * (1.0 + lax.erf(x / _SQRT2))


# ----------------------------- Pallas kernel bodies ------------------------------
def _swin_block_kernel(xw_ref, yw_ref, bias_ref, g1_ref, b1_ref,
                       wq_ref, bq_ref, wk_ref, bk_ref, wv_ref, bv_ref,
                       wp_ref, bp_ref, g2_ref, b2_ref,
                       w1_ref, bb1_ref, w2_ref, bb2_ref, out_ref,
                       *, n_windows):
    """One full Swin block for one batch element (all windows at once).

    xw/yw/out blocks are (n_windows*L, DIM) token-major slabs in the
    (rolled+)window-partitioned token order, so both residual adds and the
    norm2+MLP are valid per-token here.  bias_ref is either (NH, L, L)
    (no shift) or (NH, nW, L, L) (rel-pos bias + shift mask pre-folded)."""
    rows = n_windows * L
    xw = xw_ref[...]                                        # (rows, C) kv src / shortcut
    yw = yw_ref[...]                                        # (rows, C) raw query src
    xn = _layernorm(xw, g1_ref[0], b1_ref[0])               # norm1 fused

    attn = jnp.zeros((rows, DIM), jnp.float32)
    for h in range(NH):                                     # tiny static head loop
        # per-head weights pre-split host-side -> no lane slicing in-kernel;
        # wq/bq already carry the 1/sqrt(d) scale.
        q = jnp.dot(yw, wq_ref[h], preferred_element_type=jnp.float32) + bq_ref[h]
        k = jnp.dot(xn, wk_ref[h], preferred_element_type=jnp.float32) + bk_ref[h]
        v = jnp.dot(xn, wv_ref[h], preferred_element_type=jnp.float32) + bv_ref[h]
        qh = q.reshape(n_windows, L, HEAD_DIM)
        kh = k.reshape(n_windows, L, HEAD_DIM)
        vh = v.reshape(n_windows, L, HEAD_DIM)
        s = jnp.einsum("wld,wmd->wlm", qh, kh,
                       preferred_element_type=jnp.float32)  # (nW, L, L)
        s = s + bias_ref[h]                                 # (L,L) or (nW,L,L) broadcast
        # SoftmaxPlusOne (matches PyTorch spec: exp(x-max)/(sum(exp(x-max)) + 1))
        m = jnp.max(s, axis=-1, keepdims=True)
        e = jnp.exp(s - m)
        denom = jnp.sum(e, axis=-1, keepdims=True) + 1.0
        p = e * pl.reciprocal(denom, approx=True)
        oh = jnp.einsum("wlm,wmd->wld", p, vh,
                        preferred_element_type=jnp.float32)  # (nW, L, HD)
        attn = attn + jnp.dot(oh.reshape(rows, HEAD_DIM), wp_ref[h],
                              preferred_element_type=jnp.float32)
    attn = attn + bp_ref[0]

    # residual + norm2 + MLP + residual (Dropout / DropPath identity in eval)
    x1 = xw + attn
    xn2 = _layernorm(x1, g2_ref[0], b2_ref[0])
    hid = jnp.dot(xn2, w1_ref[...], preferred_element_type=jnp.float32) + bb1_ref[0]
    hid = _gelu_exact(hid)
    out_ref[...] = x1 + jnp.dot(hid, w2_ref[...],
                                preferred_element_type=jnp.float32) + bb2_ref[0]


def _patch_merge_kernel(x_ref, g_ref, b_ref, w_ref, out_ref):
    """PatchMerging: LayerNorm(4C) + Linear(4C -> 2C, no bias)."""
    xn = _layernorm(x_ref[...], g_ref[0], b_ref[0])
    out_ref[...] = jnp.dot(xn, w_ref[...], preferred_element_type=jnp.float32)


# ------------------------------- pallas_call wrappers -----------------------------
def fused_swin_block_call(xw, yw, bias, p, hp, shift):
    Bb = xw.shape[0] // (NW * L)
    rows = NW * L
    if shift:
        bias_spec = pl.BlockSpec((NH, NW, L, L), lambda i: (0, 0, 0, 0))
    else:
        bias_spec = pl.BlockSpec((NH, L, L), lambda i: (0, 0, 0))
    kernel = functools.partial(_swin_block_kernel, n_windows=NW)
    return pl.pallas_call(
        kernel,
        out_shape=jax.ShapeDtypeStruct((Bb * rows, DIM), jnp.float32),
        grid=(Bb,),
        in_specs=[
            pl.BlockSpec((rows, DIM), lambda i: (i, 0)),               # xw tokens
            pl.BlockSpec((rows, DIM), lambda i: (i, 0)),               # yw tokens
            bias_spec,                                                 # rel-bias (+mask)
            pl.BlockSpec((1, DIM), lambda i: (0, 0)),                  # norm1 gamma
            pl.BlockSpec((1, DIM), lambda i: (0, 0)),                  # norm1 beta
            pl.BlockSpec((NH, DIM, HEAD_DIM), lambda i: (0, 0, 0)),    # Wq (pre-scaled)
            pl.BlockSpec((NH, 1, HEAD_DIM), lambda i: (0, 0, 0)),      # bq (pre-scaled)
            pl.BlockSpec((NH, DIM, HEAD_DIM), lambda i: (0, 0, 0)),    # Wk
            pl.BlockSpec((NH, 1, HEAD_DIM), lambda i: (0, 0, 0)),      # bk
            pl.BlockSpec((NH, DIM, HEAD_DIM), lambda i: (0, 0, 0)),    # Wv
            pl.BlockSpec((NH, 1, HEAD_DIM), lambda i: (0, 0, 0)),      # bv
            pl.BlockSpec((NH, HEAD_DIM, DIM), lambda i: (0, 0, 0)),    # Wproj (row blocks)
            pl.BlockSpec((1, DIM), lambda i: (0, 0)),                  # bproj
            pl.BlockSpec((1, DIM), lambda i: (0, 0)),                  # norm2 gamma
            pl.BlockSpec((1, DIM), lambda i: (0, 0)),                  # norm2 beta
            pl.BlockSpec((DIM, HIDDEN), lambda i: (0, 0)),             # mlp fc1 W
            pl.BlockSpec((1, HIDDEN), lambda i: (0, 0)),               # mlp fc1 b
            pl.BlockSpec((HIDDEN, DIM), lambda i: (0, 0)),             # mlp fc2 W
            pl.BlockSpec((1, DIM), lambda i: (0, 0)),                  # mlp fc2 b
        ],
        out_specs=pl.BlockSpec((rows, DIM), lambda i: (i, 0)),
        compiler_params=pltpu.CompilerParams(dimension_semantics=("parallel",)),
    )(xw, yw, bias, p["g1"], p["b1"],
      hp["wq"], hp["bq"], hp["wk"], hp["bk"], hp["wv"], hp["bv"],
      hp["wp"], p["bproj"], p["g2"], p["b2"],
      p["w1"], p["bb1"], p["w2"], p["bb2"])


def patch_merge_call(x2d, p):
    N = x2d.shape[0]
    return pl.pallas_call(
        _patch_merge_kernel,
        out_shape=jax.ShapeDtypeStruct((N, 2 * DIM), jnp.float32),
        grid=(1,),
        in_specs=[
            pl.BlockSpec((N, 4 * DIM), lambda i: (0, 0)),
            pl.BlockSpec((1, 4 * DIM), lambda i: (0, 0)),
            pl.BlockSpec((1, 4 * DIM), lambda i: (0, 0)),
            pl.BlockSpec((4 * DIM, 2 * DIM), lambda i: (0, 0)),
        ],
        out_specs=pl.BlockSpec((N, 2 * DIM), lambda i: (0, 0)),
    )(x2d, p["g"], p["b"], p["w"])


# ------------------------------------ glue ---------------------------------------
def window_partition(x):
    Bb, Hh, Ww, C = x.shape
    x = x.reshape(Bb, Hh // WINDOW_SIZE, WINDOW_SIZE, Ww // WINDOW_SIZE, WINDOW_SIZE, C)
    x = x.transpose(0, 1, 3, 2, 4, 5)
    return x.reshape(-1, WINDOW_SIZE, WINDOW_SIZE, C)


def window_reverse(xw, Hh, Ww):
    C = xw.shape[-1]
    Bb = xw.shape[0] // ((Hh // WINDOW_SIZE) * (Ww // WINDOW_SIZE))
    x = xw.reshape(Bb, Hh // WINDOW_SIZE, Ww // WINDOW_SIZE, WINDOW_SIZE, WINDOW_SIZE, C)
    x = x.transpose(0, 1, 3, 2, 4, 5)
    return x.reshape(Bb, Hh, Ww, C)


def _relative_position_index():
    coords = np.stack(np.meshgrid(np.arange(WINDOW_SIZE), np.arange(WINDOW_SIZE), indexing="ij"))
    cf = coords.reshape(2, -1)
    rel = cf[:, :, None] - cf[:, None, :]
    rel = rel.transpose(1, 2, 0).astype(np.int64)
    rel[:, :, 0] += WINDOW_SIZE - 1
    rel[:, :, 1] += WINDOW_SIZE - 1
    rel[:, :, 0] *= 2 * WINDOW_SIZE - 1
    return rel.sum(-1)                                     # (L, L)


RPI = _relative_position_index()


def get_rel_bias(table):
    rb = table[RPI.reshape(-1)].reshape(L, L, NH)
    return jnp.transpose(rb, (2, 0, 1))                    # (NH, L, L)


def create_shift_mask(Hh, Ww):
    ss = WINDOW_SIZE // 2
    img_mask = np.zeros((1, Hh, Ww, 1), np.float32)
    slices = (slice(0, -WINDOW_SIZE), slice(-WINDOW_SIZE, -ss), slice(-ss, None))
    cnt = 0
    for hs in slices:
        for ws_ in slices:
            img_mask[:, hs, ws_, :] = cnt
            cnt += 1
    mw = img_mask.reshape(1, Hh // WINDOW_SIZE, WINDOW_SIZE, Ww // WINDOW_SIZE, WINDOW_SIZE, 1)
    mw = mw.transpose(0, 1, 3, 2, 4, 5).reshape(-1, L)
    am = mw[:, None, :] - mw[:, :, None]
    am = np.where(am != 0, -100.0, 0.0).astype(np.float32)
    return jnp.asarray(am)                                 # (nW, L, L)


def _split_heads(p):
    """Stack per-head projection weights (trace-time; removes in-kernel slicing)."""
    def stack_cols(w):      # (DIM, NH*HD) -> (NH, DIM, HD)
        return jnp.transpose(w.reshape(DIM, NH, HEAD_DIM), (1, 0, 2))

    def stack_bias(b):      # (1, NH*HD) -> (NH, 1, HD)
        return jnp.transpose(b.reshape(1, NH, HEAD_DIM), (1, 0, 2))

    return dict(
        wq=stack_cols(p["wq"]) * SCALE, bq=stack_bias(p["bq"]) * SCALE,
        wk=stack_cols(p["wkv"][:, :DIM]), bk=stack_bias(p["bkv"][:, :DIM]),
        wv=stack_cols(p["wkv"][:, DIM:]), bv=stack_bias(p["bkv"][:, DIM:]),
        wp=p["wproj"].reshape(NH, HEAD_DIM, DIM),
    )


def swin_block_forward(x, y, p, shift):
    Bb, Hh, Ww, C = x.shape
    ss = WINDOW_SIZE // 2 if shift else 0
    if shift:
        xs = jnp.roll(x, (-ss, -ss), axis=(1, 2))
        ys = jnp.roll(y, (-ss, -ss), axis=(1, 2))
    else:
        xs, ys = x, y
    # Window partition is a pure per-token permutation; residuals and norm2+MLP
    # are per-token, so the entire block is computed in permuted token space and
    # un-permuted once at the end.
    xw = window_partition(xs).reshape(-1, C)               # (B*nW*L, C)
    yw = window_partition(ys).reshape(-1, C)
    rel_bias = get_rel_bias(p["rel_table"])                 # (NH, L, L)
    if shift:
        bias = rel_bias[:, None, :, :] + create_shift_mask(Hh, Ww)[None]   # (NH,nW,L,L)
    else:
        bias = rel_bias                                                    # (NH,L,L)
    hp = _split_heads(p)

    ow = fused_swin_block_call(xw, yw, bias, p, hp, shift)  # (B*nW*L, C)

    o = window_reverse(ow.reshape(-1, WINDOW_SIZE, WINDOW_SIZE, C), Hh, Ww)
    if shift:
        o = jnp.roll(o, (ss, ss), axis=(1, 2))
    return o


def patch_merging_forward(x, p):
    Bb, Hh, Ww, C = x.shape
    if Hh % 2 == 1 or Ww % 2 == 1:
        x = jnp.pad(x, ((0, 0), (0, Hh % 2), (0, Ww % 2), (0, 0)))
        Bb, Hh, Ww, C = x.shape
    x0 = x[:, 0::2, 0::2, :]
    x1 = x[:, 1::2, 0::2, :]
    x2 = x[:, 0::2, 1::2, :]
    x3 = x[:, 1::2, 1::2, :]
    xm = jnp.concatenate([x0, x1, x2, x3], axis=-1)         # (B, H/2, W/2, 4C)
    out = patch_merge_call(xm.reshape(-1, 4 * C), p)
    return out.reshape(Bb, Hh // 2, Ww // 2, 2 * C)


def basic_block_forward(x, y, params):
    for i in range(DEPTH):
        x = swin_block_forward(x, y, params["blocks"][i], shift=(i % 2 == 1))
    x = patch_merging_forward(x, params["downsample"])
    return x


# --------------------------- deterministic parameter init -------------------------
def init_params(key):
    keys = iter(jax.random.split(key, 64))

    def nrm(shape, scale=0.02):
        return (scale * jax.random.normal(next(keys), shape)).astype(jnp.float32)

    blocks = []
    for _ in range(DEPTH):
        blocks.append(dict(
            g1=1.0 + nrm((1, DIM), 0.01), b1=nrm((1, DIM), 0.01),
            rel_table=nrm(((2 * WINDOW_SIZE - 1) ** 2, NH), 0.02),
            wkv=nrm((DIM, 2 * DIM)), bkv=nrm((1, 2 * DIM)),
            wq=nrm((DIM, DIM)), bq=nrm((1, DIM)),
            wproj=nrm((DIM, DIM)), bproj=nrm((1, DIM)),
            g2=1.0 + nrm((1, DIM), 0.01), b2=nrm((1, DIM), 0.01),
            w1=nrm((DIM, HIDDEN)), bb1=nrm((1, HIDDEN)),
            w2=nrm((HIDDEN, DIM)), bb2=nrm((1, DIM)),
        ))
    down = dict(g=1.0 + nrm((1, 4 * DIM), 0.01), b=nrm((1, 4 * DIM), 0.01),
                w=nrm((4 * DIM, 2 * DIM)))
    return dict(blocks=blocks, downsample=down)


# ------------------------------ pure-JAX reference --------------------------------
def _ln_ref(x, g, b):
    mu = x.mean(-1, keepdims=True)
    var = ((x - mu) ** 2).mean(-1, keepdims=True)
    return (x - mu) / jnp.sqrt(var + EPS) * g + b


def _ref_attention(xw, yw, p, rel_bias, mask):
    Bn = xw.shape[0]
    xn = _ln_ref(xw, p["g1"][0], p["b1"][0])
    kv = xn @ p["wkv"] + p["bkv"][0]
    q = (yw @ p["wq"] + p["bq"][0]) * SCALE
    k = kv[..., :DIM].reshape(Bn, L, NH, HEAD_DIM).transpose(0, 2, 1, 3)
    v = kv[..., DIM:].reshape(Bn, L, NH, HEAD_DIM).transpose(0, 2, 1, 3)
    qh = q.reshape(Bn, L, NH, HEAD_DIM).transpose(0, 2, 1, 3)
    a = qh @ jnp.swapaxes(k, -1, -2) + rel_bias[None] + mask[:, None]
    m = a.max(-1, keepdims=True)
    e = jnp.exp(a - m)
    pr = e / (e.sum(-1, keepdims=True) + 1.0)
    o = (pr @ v).transpose(0, 2, 1, 3).reshape(Bn, L, DIM)
    return o @ p["wproj"] + p["bproj"][0]


def _ref_swin_block(x, y, p, shift):
    Bb, Hh, Ww, C = x.shape
    shortcut = x
    ss = WINDOW_SIZE // 2 if shift else 0
    nW = (Hh // WINDOW_SIZE) * (Ww // WINDOW_SIZE)
    if shift:
        xs = jnp.roll(x, (-ss, -ss), axis=(1, 2))
        ys = jnp.roll(y, (-ss, -ss), axis=(1, 2))
        mask = jnp.tile(create_shift_mask(Hh, Ww), (Bb, 1, 1))
    else:
        xs, ys = x, y
        mask = jnp.zeros((Bb * nW, L, L), jnp.float32)
    xw = window_partition(xs).reshape(-1, L, C)
    yw = window_partition(ys).reshape(-1, L, C)
    ow = _ref_attention(xw, yw, p, get_rel_bias(p["rel_table"]), mask)
    o = window_reverse(ow.reshape(-1, WINDOW_SIZE, WINDOW_SIZE, C), Hh, Ww)
    if shift:
        o = jnp.roll(o, (ss, ss), axis=(1, 2))
    x = shortcut + o
    xn = _ln_ref(x, p["g2"][0], p["b2"][0])
    h = xn @ p["w1"] + p["bb1"][0]
    h = 0.5 * h * (1.0 + jax.scipy.special.erf(h / _SQRT2))
    return x + (h @ p["w2"] + p["bb2"][0])


def _ref_basic_block(x, y, params):
    for i in range(DEPTH):
        x = _ref_swin_block(x, y, params["blocks"][i], shift=(i % 2 == 1))
    Bb, Hh, Ww, C = x.shape
    x0 = x[:, 0::2, 0::2, :]; x1 = x[:, 1::2, 0::2, :]
    x2 = x[:, 0::2, 1::2, :]; x3 = x[:, 1::2, 1::2, :]
    xm = jnp.concatenate([x0, x1, x2, x3], axis=-1)
    dp = params["downsample"]
    xm = _ln_ref(xm, dp["g"][0], dp["b"][0]) @ dp["w"]
    return xm


# ------------------------------------- main ----------------------------------------
if __name__ == "__main__":
    key = jax.random.PRNGKey(0)
    kx, ky, kp = jax.random.split(key, 3)
    x = jax.random.normal(kx, (B, H, W, DIM), jnp.float32)
    y = jax.random.normal(ky, (B, H, W, DIM), jnp.float32)
    params = init_params(kp)

    out = jax.jit(basic_block_forward)(x, y, params)
    out = jax.block_until_ready(out)
    assert out.shape == (B, H // 2, W // 2, 2 * DIM), out.shape

    ref = jax.block_until_ready(_ref_basic_block(x, y, params))
    max_err = float(np.max(np.abs(np.asarray(out) - np.asarray(ref))))
    assert np.allclose(np.asarray(out), np.asarray(ref), rtol=1e-2, atol=2e-3), max_err

    print("KERNEL_OK")
</pallas_src>

<mosaic_0001>
module attributes {stable_mosaic.version = 11 : i64} {
  func.func @_swin_block_kernel(%arg0: i32, %arg1: memref<64x16xf32, #tpu.memory_space<vmem>>, %arg2: memref<64x16xf32, #tpu.memory_space<vmem>>, %arg3: memref<2x16x16xf32, #tpu.memory_space<vmem>>, %arg4: memref<1x16xf32, #tpu.memory_space<vmem>>, %arg5: memref<1x16xf32, #tpu.memory_space<vmem>>, %arg6: memref<2x16x8xf32, #tpu.memory_space<vmem>>, %arg7: memref<2x1x8xf32, #tpu.memory_space<vmem>>, %arg8: memref<2x16x8xf32, #tpu.memory_space<vmem>>, %arg9: memref<2x1x8xf32, #tpu.memory_space<vmem>>, %arg10: memref<2x16x8xf32, #tpu.memory_space<vmem>>, %arg11: memref<2x1x8xf32, #tpu.memory_space<vmem>>, %arg12: memref<2x8x16xf32, #tpu.memory_space<vmem>>, %arg13: memref<1x16xf32, #tpu.memory_space<vmem>>, %arg14: memref<1x16xf32, #tpu.memory_space<vmem>>, %arg15: memref<1x16xf32, #tpu.memory_space<vmem>>, %arg16: memref<16x64xf32, #tpu.memory_space<vmem>>, %arg17: memref<1x64xf32, #tpu.memory_space<vmem>>, %arg18: memref<64x16xf32, #tpu.memory_space<vmem>>, %arg19: memref<1x16xf32, #tpu.memory_space<vmem>>, %arg20: memref<64x16xf32, #tpu.memory_space<vmem>>) attributes {dimension_semantics = [#tpu.dimension_semantics<parallel>], iteration_bounds = array<i64: 2>, scalar_prefetch = 0 : i64, scratch_operands = 0 : i64, tpu.core_type = #tpu.core_type<tc>, window_params = [{transform_indices = @transform_0, window_bounds = array<i64: 64, 16>}, {transform_indices = @transform_1, window_bounds = array<i64: 64, 16>}, {pipeline_mode = #tpu.pipeline_mode<synchronous>, transform_indices = @transform_2, window_bounds = array<i64: 2, 16, 16>}, {pipeline_mode = #tpu.pipeline_mode<synchronous>, transform_indices = @transform_3, window_bounds = array<i64: 1, 16>}, {pipeline_mode = #tpu.pipeline_mode<synchronous>, transform_indices = @transform_4, window_bounds = array<i64: 1, 16>}, {pipeline_mode = #tpu.pipeline_mode<synchronous>, transform_indices = @transform_5, window_bounds = array<i64: 2, 16, 8>}, {pipeline_mode = #tpu.pipeline_mode<synchronous>, transform_indices = @transform_6, window_bounds = array<i64: 2, 1, 8>}, {pipeline_mode = #tpu.pipeline_mode<synchronous>, transform_indices = @transform_7, window_bounds = array<i64: 2, 16, 8>}, {pipeline_mode = #tpu.pipeline_mode<synchronous>, transform_indices = @transform_8, window_bounds = array<i64: 2, 1, 8>}, {pipeline_mode = #tpu.pipeline_mode<synchronous>, transform_indices = @transform_9, window_bounds = array<i64: 2, 16, 8>}, {pipeline_mode = #tpu.pipeline_mode<synchronous>, transform_indices = @transform_10, window_bounds = array<i64: 2, 1, 8>}, {pipeline_mode = #tpu.pipeline_mode<synchronous>, transform_indices = @transform_11, window_bounds = array<i64: 2, 8, 16>}, {pipeline_mode = #tpu.pipeline_mode<synchronous>, transform_indices = @transform_12, window_bounds = array<i64: 1, 16>}, {pipeline_mode = #tpu.pipeline_mode<synchronous>, transform_indices = @transform_13, window_bounds = array<i64: 1, 16>}, {pipeline_mode = #tpu.pipeline_mode<synchronous>, transform_indices = @transform_14, window_bounds = array<i64: 1, 16>}, {pipeline_mode = #tpu.pipeline_mode<synchronous>, transform_indices = @transform_15, window_bounds = array<i64: 16, 64>}, {pipeline_mode = #tpu.pipeline_mode<synchronous>, transform_indices = @transform_16, window_bounds = array<i64: 1, 64>}, {pipeline_mode = #tpu.pipeline_mode<synchronous>, transform_indices = @transform_17, window_bounds = array<i64: 64, 16>}, {pipeline_mode = #tpu.pipeline_mode<synchronous>, transform_indices = @transform_18, window_bounds = array<i64: 1, 16>}, {transform_indices = @transform_19, window_bounds = array<i64: 64, 16>}]} {
    %c0 = arith.constant 0 : index
    %c0_0 = arith.constant 0 : index
    %0 = vector.load %arg1[%c0, %c0_0] : memref<64x16xf32, #tpu.memory_space<vmem>>, vector<64x16xf32>
    %c0_1 = arith.constant 0 : index
    %c0_2 = arith.constant 0 : index
    %1 = vector.load %arg2[%c0_1, %c0_2] : memref<64x16xf32, #tpu.memory_space<vmem>>, vector<64x16xf32>
    %c0_3 = arith.constant 0 : index
    %c0_4 = arith.constant 0 : index
    %2 = vector.load %arg4[%c0_3, %c0_4] : memref<1x16xf32, #tpu.memory_space<vmem>>, vector<1x16xf32>
    %3 = vector.shape_cast %2 : vector<1x16xf32> to vector<16xf32>
    %c0_5 = arith.constant 0 : index
    %c0_6 = arith.constant 0 : index
    %4 = vector.load %arg5[%c0_5, %c0_6] : memref<1x16xf32, #tpu.memory_space<vmem>>, vector<1x16xf32>
    %5 = vector.shape_cast %4 : vector<1x16xf32> to vector<16xf32>
    %cst = arith.constant dense<0.000000e+00> : vector<64xf32>
    %6 = vector.multi_reduction <add>, %0, %cst [1] : vector<64x16xf32> to vector<64xf32>
    %7 = vector.shape_cast %6 : vector<64xf32> to vector<64x1xf32>
    %cst_7 = arith.constant 1.600000e+01 : f32
    %8 = vector.broadcast %cst_7 : f32 to vector<64x1xf32>
    %9 = arith.divf %7, %8 : vector<64x1xf32>
    %10 = vector.broadcast %9 : vector<64x1xf32> to vector<64x16xf32>
    %11 = arith.subf %0, %10 : vector<64x16xf32>
    %12 = arith.mulf %11, %11 : vector<64x16xf32>
    %cst_8 = arith.constant dense<0.000000e+00> : vector<64xf32>
    %13 = vector.multi_reduction <add>, %12, %cst_8 [1] : vector<64x16xf32> to vector<64xf32>
    %14 = vector.shape_cast %13 : vector<64xf32> to vector<64x1xf32>
    %cst_9 = arith.constant 1.600000e+01 : f32
    %15 = vector.broadcast %cst_9 : f32 to vector<64x1xf32>
    %16 = arith.divf %14, %15 : vector<64x1xf32>
    %17 = vector.broadcast %9 : vector<64x1xf32> to vector<64x16xf32>
    %18 = arith.subf %0, %17 : vector<64x16xf32>
    %cst_10 = arith.constant 9.99999974E-6 : f32
    %19 = vector.broadcast %cst_10 : f32 to vector<64x1xf32>
    %20 = arith.addf %16, %19 : vector<64x1xf32>
    %21 = math.rsqrt %20 : vector<64x1xf32>
    %22 = vector.broadcast %21 : vector<64x1xf32> to vector<64x16xf32>
    %23 = arith.mulf %18, %22 : vector<64x16xf32>
    %24 = vector.shape_cast %3 : vector<16xf32> to vector<1x16xf32>
    %25 = vector.broadcast %24 : vector<1x16xf32> to vector<64x16xf32>
    %26 = arith.mulf %23, %25 : vector<64x16xf32>
    %27 = vector.shape_cast %5 : vector<16xf32> to vector<1x16xf32>
    %28 = vector.broadcast %27 : vector<1x16xf32> to vector<64x16xf32>
    %29 = arith.addf %26, %28 : vector<64x16xf32>
    %cst_11 = arith.constant 0.000000e+00 : f32
    %30 = vector.broadcast %cst_11 : f32 to vector<64x16xf32>
    %c0_12 = arith.constant 0 : index
    %c0_13 = arith.constant 0 : index
    %c0_14 = arith.constant 0 : index
    %31 = vector.load %arg6[%c0_12, %c0_13, %c0_14] : memref<2x16x8xf32, #tpu.memory_space<vmem>>, vector<1x16x8xf32>
    %32 = vector.shape_cast %31 : vector<1x16x8xf32> to vector<16x8xf32>
    %cst_15 = arith.constant dense<0.000000e+00> : vector<64x8xf32>
    %33 = tpu.matmul %1, %32, %cst_15 {dimension_numbers = #tpu.dot_dimension_numbers<[1], [0], [0], [1], [0, 0, 1, 1], [], []>} : vector<64x16xf32>, vector<16x8xf32>, vector<64x8xf32> -> vector<64x8xf32>
    %c0_16 = arith.constant 0 : index
    %c0_17 = arith.constant 0 : index
    %c0_18 = arith.constant 0 : index
    %34 = vector.load %arg7[%c0_16, %c0_17, %c0_18] : memref<2x1x8xf32, #tpu.memory_space<vmem>>, vector<1x1x8xf32>
    %35 = vector.shape_cast %34 : vector<1x1x8xf32> to vector<1x8xf32>
    %36 = vector.broadcast %35 : vector<1x8xf32> to vector<64x8xf32>
    %37 = arith.addf %33, %36 : vector<64x8xf32>
    %c0_19 = arith.constant 0 : index
    %c0_20 = arith.constant 0 : index
    %c0_21 = arith.constant 0 : index
    %38 = vector.load %arg8[%c0_19, %c0_20, %c0_21] : memref<2x16x8xf32, #tpu.memory_space<vmem>>, vector<1x16x8xf32>
    %39 = vector.shape_cast %38 : vector<1x16x8xf32> to vector<16x8xf32>
    %cst_22 = arith.constant dense<0.000000e+00> : vector<64x8xf32>
    %40 = tpu.matmul %29, %39, %cst_22 {dimension_numbers = #tpu.dot_dimension_numbers<[1], [0], [0], [1], [0, 0, 1, 1], [], []>} : vector<64x16xf32>, vector<16x8xf32>, vector<64x8xf32> -> vector<64x8xf32>
    %c0_23 = arith.constant 0 : index
    %c0_24 = arith.constant 0 : index
    %c0_25 = arith.constant 0 : index
    %41 = vector.load %arg9[%c0_23, %c0_24, %c0_25] : memref<2x1x8xf32, #tpu.memory_space<vmem>>, vector<1x1x8xf32>
    %42 = vector.shape_cast %41 : vector<1x1x8xf32> to vector<1x8xf32>
    %43 = vector.broadcast %42 : vector<1x8xf32> to vector<64x8xf32>
    %44 = arith.addf %40, %43 : vector<64x8xf32>
    %c0_26 = arith.constant 0 : index
    %c0_27 = arith.constant 0 : index
    %c0_28 = arith.constant 0 : index
    %45 = vector.load %arg10[%c0_26, %c0_27, %c0_28] : memref<2x16x8xf32, #tpu.memory_space<vmem>>, vector<1x16x8xf32>
    %46 = vector.shape_cast %45 : vector<1x16x8xf32> to vector<16x8xf32>
    %cst_29 = arith.constant dense<0.000000e+00> : vector<64x8xf32>
    %47 = tpu.matmul %29, %46, %cst_29 {dimension_numbers = #tpu.dot_dimension_numbers<[1], [0], [0], [1], [0, 0, 1, 1], [], []>} : vector<64x16xf32>, vector<16x8xf32>, vector<64x8xf32> -> vector<64x8xf32>
    %c0_30 = arith.constant 0 : index
    %c0_31 = arith.constant 0 : index
    %c0_32 = arith.constant 0 : index
    %48 = vector.load %arg11[%c0_30, %c0_31, %c0_32] : memref<2x1x8xf32, #tpu.memory_space<vmem>>, vector<1x1x8xf32>
    %49 = vector.shape_cast %48 : vector<1x1x8xf32> to vector<1x8xf32>
    %50 = vector.broadcast %49 : vector<1x8xf32> to vector<64x8xf32>
    %51 = arith.addf %47, %50 : vector<64x8xf32>
    %52 = vector.shape_cast %37 : vector<64x8xf32> to vector<4x16x8xf32>
    %53 = vector.shape_cast %44 : vector<64x8xf32> to vector<4x16x8xf32>
    %54 = vector.shape_cast %51 : vector<64x8xf32> to vector<4x16x8xf32>
    "tpu.trace_start"() <{level = 10 : i32, message = "wld,wmd->wlm"}> : () -> ()
    %cst_33 = arith.constant dense<0.000000e+00> : vector<4x16x16xf32>
    %55 = tpu.matmul %52, %53, %cst_33 {dimension_numbers = #tpu.dot_dimension_numbers<[2], [2], [1], [1], [0, 0, 0, 1, 1, 1], [0], [0]>} : vector<4x16x8xf32>, vector<4x16x8xf32>, vector<4x16x16xf32> -> vector<4x16x16xf32>
    "tpu.trace_stop"() : () -> ()
    %c0_34 = arith.constant 0 : index
    %c0_35 = arith.constant 0 : index
    %c0_36 = arith.constant 0 : index
    %56 = vector.load %arg3[%c0_34, %c0_35, %c0_36] : memref<2x16x16xf32, #tpu.memory_space<vmem>>, vector<1x16x16xf32>
    %57 = vector.shape_cast %56 : vector<1x16x16xf32> to vector<16x16xf32>
    %58 = vector.shape_cast %57 : vector<16x16xf32> to vector<1x16x16xf32>
    %59 = vector.broadcast %58 : vector<1x16x16xf32> to vector<4x16x16xf32>
    %60 = arith.addf %55, %59 : vector<4x16x16xf32>
    %cst_37 = arith.constant dense<0xFF800000> : vector<4x16xf32>
    %61 = vector.multi_reduction <maximumf>, %60, %cst_37 [2] : vector<4x16x16xf32> to vector<4x16xf32>
    %62 = vector.shape_cast %61 : vector<4x16xf32> to vector<4x16x1xf32>
    %63 = vector.broadcast %62 : vector<4x16x1xf32> to vector<4x16x16xf32>
    %64 = arith.subf %60, %63 : vector<4x16x16xf32>
    %65 = math.exp %64 : vector<4x16x16xf32>
    %cst_38 = arith.constant dense<0.000000e+00> : vector<4x16xf32>
    %66 = vector.multi_reduction <add>, %65, %cst_38 [2] : vector<4x16x16xf32> to vector<4x16xf32>
    %67 = vector.shape_cast %66 : vector<4x16xf32> to vector<4x16x1xf32>
    %cst_39 = arith.constant 1.000000e+00 : f32
    %68 = vector.broadcast %cst_39 : f32 to vector<4x16x1xf32>
    %69 = arith.addf %67, %68 : vector<4x16x1xf32>
    %70 = tpu.reciprocal %69 {approx = true} : vector<4x16x1xf32> -> vector<4x16x1xf32>
    %71 = vector.broadcast %70 : vector<4x16x1xf32> to vector<4x16x16xf32>
    %72 = arith.mulf %65, %71 : vector<4x16x16xf32>
    "tpu.trace_start"() <{level = 10 : i32, message = "wlm,wmd->wld"}> : () -> ()
    %cst_40 = arith.constant dense<0.000000e+00> : vector<4x16x8xf32>
    %73 = tpu.matmul %72, %54, %cst_40 {dimension_numbers = #tpu.dot_dimension_numbers<[2], [1], [1], [2], [0, 0, 0, 1, 1, 2], [0], [0]>} : vector<4x16x16xf32>, vector<4x16x8xf32>, vector<4x16x8xf32> -> vector<4x16x8xf32>
    "tpu.trace_stop"() : () -> ()
    %74 = vector.shape_cast %73 : vector<4x16x8xf32> to vector<64x8xf32>
    %c0_41 = arith.constant 0 : index
    %c0_42 = arith.constant 0 : index
    %c0_43 = arith.constant 0 : index
    %75 = vector.load %arg12[%c0_41, %c0_42, %c0_43] : memref<2x8x16xf32, #tpu.memory_space<vmem>>, vector<1x8x16xf32>
    %76 = vector.shape_cast %75 : vector<1x8x16xf32> to vector<8x16xf32>
    %cst_44 = arith.constant dense<0.000000e+00> : vector<64x16xf32>
    %77 = tpu.matmul %74, %76, %cst_44 {dimension_numbers = #tpu.dot_dimension_numbers<[1], [0], [0], [1], [0, 0, 1, 1], [], []>} : vector<64x8xf32>, vector<8x16xf32>, vector<64x16xf32> -> vector<64x16xf32>
    %78 = arith.addf %30, %77 : vector<64x16xf32>
    %c1 = arith.constant 1 : index
    %c0_45 = arith.constant 0 : index
    %c0_46 = arith.constant 0 : index
    %79 = vector.load %arg6[%c1, %c0_45, %c0_46] : memref<2x16x8xf32, #tpu.memory_space<vmem>>, vector<1x16x8xf32>
    %80 = vector.shape_cast %79 : vector<1x16x8xf32> to vector<16x8xf32>
    %cst_47 = arith.constant dense<0.000000e+00> : vector<64x8xf32>
    %81 = tpu.matmul %1, %80, %cst_47 {dimension_numbers = #tpu.dot_dimension_numbers<[1], [0], [0], [1], [0, 0, 1, 1], [], []>} : vector<64x16xf32>, vector<16x8xf32>, vector<64x8xf32> -> vector<64x8xf32>
    %c1_48 = arith.constant 1 : index
    %c0_49 = arith.constant 0 : index
    %c0_50 = arith.constant 0 : index
    %82 = vector.load %arg7[%c1_48, %c0_49, %c0_50] : memref<2x1x8xf32, #tpu.memory_space<vmem>>, vector<1x1x8xf32>
    %83 = vector.shape_cast %82 : vector<1x1x8xf32> to vector<1x8xf32>
    %84 = vector.broadcast %83 : vector<1x8xf32> to vector<64x8xf32>
    %85 = arith.addf %81, %84 : vector<64x8xf32>
    %c1_51 = arith.constant 1 : index
    %c0_52 = arith.constant 0 : index
    %c0_53 = arith.constant 0 : index
    %86 = vector.load %arg8[%c1_51, %c0_52, %c0_53] : memref<2x16x8xf32, #tpu.memory_space<vmem>>, vector<1x16x8xf32>
    %87 = vector.shape_cast %86 : vector<1x16x8xf32> to vector<16x8xf32>
    %cst_54 = arith.constant dense<0.000000e+00> : vector<64x8xf32>
    %88 = tpu.matmul %29, %87, %cst_54 {dimension_numbers = #tpu.dot_dimension_numbers<[1], [0], [0], [1], [0, 0, 1, 1], [], []>} : vector<64x16xf32>, vector<16x8xf32>, vector<64x8xf32> -> vector<64x8xf32>
    %c1_55 = arith.constant 1 : index
    %c0_56 = arith.constant 0 : index
    %c0_57 = arith.constant 0 : index
    %89 = vector.load %arg9[%c1_55, %c0_56, %c0_57] : memref<2x1x8xf32, #tpu.memory_space<vmem>>, vector<1x1x8xf32>
    %90 = vector.shape_cast %89 : vector<1x1x8xf32> to vector<1x8xf32>
    %91 = vector.broadcast %90 : vector<1x8xf32> to vector<64x8xf32>
    %92 = arith.addf %88, %91 : vector<64x8xf32>
    %c1_58 = arith.constant 1 : index
    %c0_59 = arith.constant 0 : index
    %c0_60 = arith.constant 0 : index
    %93 = vector.load %arg10[%c1_58, %c0_59, %c0_60] : memref<2x16x8xf32, #tpu.memory_space<vmem>>, vector<1x16x8xf32>
    %94 = vector.shape_cast %93 : vector<1x16x8xf32> to vector<16x8xf32>
    %cst_61 = arith.constant dense<0.000000e+00> : vector<64x8xf32>
    %95 = tpu.matmul %29, %94, %cst_61 {dimension_numbers = #tpu.dot_dimension_numbers<[1], [0], [0], [1], [0, 0, 1, 1], [], []>} : vector<64x16xf32>, vector<16x8xf32>, vector<64x8xf32> -> vector<64x8xf32>
    %c1_62 = arith.constant 1 : index
    %c0_63 = arith.constant 0 : index
    %c0_64 = arith.constant 0 : index
    %96 = vector.load %arg11[%c1_62, %c0_63, %c0_64] : memref<2x1x8xf32, #tpu.memory_space<vmem>>, vector<1x1x8xf32>
    %97 = vector.shape_cast %96 : vector<1x1x8xf32> to vector<1x8xf32>
    %98 = vector.broadcast %97 : vector<1x8xf32> to vector<64x8xf32>
    %99 = arith.addf %95, %98 : vector<64x8xf32>
    %100 = vector.shape_cast %85 : vector<64x8xf32> to vector<4x16x8xf32>
    %101 = vector.shape_cast %92 : vector<64x8xf32> to vector<4x16x8xf32>
    %102 = vector.shape_cast %99 : vector<64x8xf32> to vector<4x16x8xf32>
    "tpu.trace_start"() <{level = 10 : i32, message = "wld,wmd->wlm"}> : () -> ()
    %cst_65 = arith.constant dense<0.000000e+00> : vector<4x16x16xf32>
    %103 = tpu.matmul %100, %101, %cst_65 {dimension_numbers = #tpu.dot_dimension_numbers<[2], [2], [1], [1], [0, 0, 0, 1, 1, 1], [0], [0]>} : vector<4x16x8xf32>, vector<4x16x8xf32>, vector<4x16x16xf32> -> vector<4x16x16xf32>
    "tpu.trace_stop"() : () -> ()
    %c1_66 = arith.constant 1 : index
    %c0_67 = arith.constant 0 : index
    %c0_68 = arith.constant 0 : index
    %104 = vector.load %arg3[%c1_66, %c0_67, %c0_68] : memref<2x16x16xf32, #tpu.memory_space<vmem>>, vector<1x16x16xf32>
    %105 = vector.shape_cast %104 : vector<1x16x16xf32> to vector<16x16xf32>
    %106 = vector.shape_cast %105 : vector<16x16xf32> to vector<1x16x16xf32>
    %107 = vector.broadcast %106 : vector<1x16x16xf32> to vector<4x16x16xf32>
    %108 = arith.addf %103, %107 : vector<4x16x16xf32>
    %cst_69 = arith.constant dense<0xFF800000> : vector<4x16xf32>
    %109 = vector.multi_reduction <maximumf>, %108, %cst_69 [2] : vector<4x16x16xf32> to vector<4x16xf32>
    %110 = vector.shape_cast %109 : vector<4x16xf32> to vector<4x16x1xf32>
    %111 = vector.broadcast %110 : vector<4x16x1xf32> to vector<4x16x16xf32>
    %112 = arith.subf %108, %111 : vector<4x16x16xf32>
    %113 = math.exp %112 : vector<4x16x16xf32>
    %cst_70 = arith.constant dense<0.000000e+00> : vector<4x16xf32>
    %114 = vector.multi_reduction <add>, %113, %cst_70 [2] : vector<4x16x16xf32> to vector<4x16xf32>
    %115 = vector.shape_cast %114 : vector<4x16xf32> to vector<4x16x1xf32>
    %cst_71 = arith.constant 1.000000e+00 : f32
    %116 = vector.broadcast %cst_71 : f32 to vector<4x16x1xf32>
    %117 = arith.addf %115, %116 : vector<4x16x1xf32>
    %118 = tpu.reciprocal %117 {approx = true} : vector<4x16x1xf32> -> vector<4x16x1xf32>
    %119 = vector.broadcast %118 : vector<4x16x1xf32> to vector<4x16x16xf32>
    %120 = arith.mulf %113, %119 : vector<4x16x16xf32>
    "tpu.trace_start"() <{level = 10 : i32, message = "wlm,wmd->wld"}> : () -> ()
    %cst_72 = arith.constant dense<0.000000e+00> : vector<4x16x8xf32>
    %121 = tpu.matmul %120, %102, %cst_72 {dimension_numbers = #tpu.dot_dimension_numbers<[2], [1], [1], [2], [0, 0, 0, 1, 1, 2], [0], [0]>} : vector<4x16x16xf32>, vector<4x16x8xf32>, vector<4x16x8xf32> -> vector<4x16x8xf32>
    "tpu.trace_stop"() : () -> ()
    %122 = vector.shape_cast %121 : vector<4x16x8xf32> to vector<64x8xf32>
    %c1_73 = arith.constant 1 : index
    %c0_74 = arith.constant 0 : index
    %c0_75 = arith.constant 0 : index
    %123 = vector.load %arg12[%c1_73, %c0_74, %c0_75] : memref<2x8x16xf32, #tpu.memory_space<vmem>>, vector<1x8x16xf32>
    %124 = vector.shape_cast %123 : vector<1x8x16xf32> to vector<8x16xf32>
    %cst_76 = arith.constant dense<0.000000e+00> : vector<64x16xf32>
    %125 = tpu.matmul %122, %124, %cst_76 {dimension_numbers = #tpu.dot_dimension_numbers<[1], [0], [0], [1], [0, 0, 1, 1], [], []>} : vector<64x8xf32>, vector<8x16xf32>, vector<64x16xf32> -> vector<64x16xf32>
    %126 = arith.addf %78, %125 : vector<64x16xf32>
    %c0_77 = arith.constant 0 : index
    %c0_78 = arith.constant 0 : index
    %127 = vector.load %arg13[%c0_77, %c0_78] : memref<1x16xf32, #tpu.memory_space<vmem>>, vector<1x16xf32>
    %128 = vector.shape_cast %127 : vector<1x16xf32> to vector<16xf32>
    %129 = vector.shape_cast %128 : vector<16xf32> to vector<1x16xf32>
    %130 = vector.broadcast %129 : vector<1x16xf32> to vector<64x16xf32>
    %131 = arith.addf %126, %130 : vector<64x16xf32>
    %132 = arith.addf %0, %131 : vector<64x16xf32>
    %c0_79 = arith.constant 0 : index
    %c0_80 = arith.constant 0 : index
    %133 = vector.load %arg14[%c0_79, %c0_80] : memref<1x16xf32, #tpu.memory_space<vmem>>, vector<1x16xf32>
    %134 = vector.shape_cast %133 : vector<1x16xf32> to vector<16xf32>
    %c0_81 = arith.constant 0 : index
    %c0_82 = arith.constant 0 : index
    %135 = vector.load %arg15[%c0_81, %c0_82] : memref<1x16xf32, #tpu.memory_space<vmem>>, vector<1x16xf32>
    %136 = vector.shape_cast %135 : vector<1x16xf32> to vector<16xf32>
    %cst_83 = arith.constant dense<0.000000e+00> : vector<64xf32>
    %137 = vector.multi_reduction <add>, %132, %cst_83 [1] : vector<64x16xf32> to vector<64xf32>
    %138 = vector.shape_cast %137 : vector<64xf32> to vector<64x1xf32>
    %cst_84 = arith.constant 1.600000e+01 : f32
    %139 = vector.broadcast %cst_84 : f32 to vector<64x1xf32>
    %140 = arith.divf %138, %139 : vector<64x1xf32>
    %141 = vector.broadcast %140 : vector<64x1xf32> to vector<64x16xf32>
    %142 = arith.subf %132, %141 : vector<64x16xf32>
    %143 = arith.mulf %142, %142 : vector<64x16xf32>
    %cst_85 = arith.constant dense<0.000000e+00> : vector<64xf32>
    %144 = vector.multi_reduction <add>, %143, %cst_85 [1] : vector<64x16xf32> to vector<64xf32>
    %145 = vector.shape_cast %144 : vector<64xf32> to vector<64x1xf32>
    %cst_86 = arith.constant 1.600000e+01 : f32
    %146 = vector.broadcast %cst_86 : f32 to vector<64x1xf32>
    %147 = arith.divf %145, %146 : vector<64x1xf32>
    %148 = vector.broadcast %140 : vector<64x1xf32> to vector<64x16xf32>
    %149 = arith.subf %132, %148 : vector<64x16xf32>
    %cst_87 = arith.constant 9.99999974E-6 : f32
    %150 = vector.broadcast %cst_87 : f32 to vector<64x1xf32>
    %151 = arith.addf %147, %150 : vector<64x1xf32>
    %152 = math.rsqrt %151 : vector<64x1xf32>
    %153 = vector.broadcast %152 : vector<64x1xf32> to vector<64x16xf32>
    %154 = arith.mulf %149, %153 : vector<64x16xf32>
    %155 = vector.shape_cast %134 : vector<16xf32> to vector<1x16xf32>
    %156 = vector.broadcast %155 : vector<1x16xf32> to vector<64x16xf32>
    %157 = arith.mulf %154, %156 : vector<64x16xf32>
    %158 = vector.shape_cast %136 : vector<16xf32> to vector<1x16xf32>
    %159 = vector.broadcast %158 : vector<1x16xf32> to vector<64x16xf32>
    %160 = arith.addf %157, %159 : vector<64x16xf32>
    %c0_88 = arith.constant 0 : index
    %c0_89 = arith.constant 0 : index
    %161 = vector.load %arg16[%c0_88, %c0_89] : memref<16x64xf32, #tpu.memory_space<vmem>>, vector<16x64xf32>
    %cst_90 = arith.constant dense<0.000000e+00> : vector<64x64xf32>
    %162 = tpu.matmul %160, %161, %cst_90 {dimension_numbers = #tpu.dot_dimension_numbers<[1], [0], [0], [1], [0, 0, 1, 1], [], []>} : vector<64x16xf32>, vector<16x64xf32>, vector<64x64xf32> -> vector<64x64xf32>
    %c0_91 = arith.constant 0 : index
    %c0_92 = arith.constant 0 : index
    %163 = vector.load %arg17[%c0_91, %c0_92] : memref<1x64xf32, #tpu.memory_space<vmem>>, vector<1x64xf32>
    %164 = vector.shape_cast %163 : vector<1x64xf32> to vector<64xf32>
    %165 = vector.shape_cast %164 : vector<64xf32> to vector<1x64xf32>
    %166 = vector.broadcast %165 : vector<1x64xf32> to vector<64x64xf32>
    %167 = arith.addf %162, %166 : vector<64x64xf32>
    %cst_93 = arith.constant 5.000000e-01 : f32
    %168 = vector.broadcast %cst_93 : f32 to vector<64x64xf32>
    %169 = arith.mulf %168, %167 : vector<64x64xf32>
    %cst_94 = arith.constant 1.41421354 : f32
    %170 = vector.broadcast %cst_94 : f32 to vector<64x64xf32>
    %171 = arith.divf %167, %170 : vector<64x64xf32>
    %172 = math.erf %171 : vector<64x64xf32>
    %cst_95 = arith.constant 1.000000e+00 : f32
    %173 = vector.broadcast %cst_95 : f32 to vector<64x64xf32>
    %174 = arith.addf %173, %172 : vector<64x64xf32>
    %175 = arith.mulf %169, %174 : vector<64x64xf32>
    %c0_96 = arith.constant 0 : index
    %c0_97 = arith.constant 0 : index
    %176 = vector.load %arg18[%c0_96, %c0_97] : memref<64x16xf32, #tpu.memory_space<vmem>>, vector<64x16xf32>
    %cst_98 = arith.constant dense<0.000000e+00> : vector<64x16xf32>
    %177 = tpu.matmul %175, %176, %cst_98 {dimension_numbers = #tpu.dot_dimension_numbers<[1], [0], [0], [1], [0, 0, 1, 1], [], []>} : vector<64x64xf32>, vector<64x16xf32>, vector<64x16xf32> -> vector<64x16xf32>
    %178 = arith.addf %132, %177 : vector<64x16xf32>
    %c0_99 = arith.constant 0 : index
    %c0_100 = arith.constant 0 : index
    %179 = vector.load %arg19[%c0_99, %c0_100] : memref<1x16xf32, #tpu.memory_space<vmem>>, vector<1x16xf32>
    %180 = vector.shape_cast %179 : vector<1x16xf32> to vector<16xf32>
    %181 = vector.shape_cast %180 : vector<16xf32> to vector<1x16xf32>
    %182 = vector.broadcast %181 : vector<1x16xf32> to vector<64x16xf32>
    %183 = arith.addf %178, %182 : vector<64x16xf32>
    %c0_101 = arith.constant 0 : index
    %c0_102 = arith.constant 0 : index
    %184 = vector.load %arg20[%c0_101, %c0_102] : memref<64x16xf32, #tpu.memory_space<vmem>>, vector<64x16xf32>
    tpu.vector_store %arg20[%c0_101, %c0_102], %183 {strides = array<i32>} : memref<64x16xf32, #tpu.memory_space<vmem>>, vector<64x16xf32>,
    return
  }
  func.func @transform_0(%arg0: i32) -> (i32, i32) {
    %c0_i32 = arith.constant 0 : i32
    %c0_i32_0 = arith.constant 0 : i32
    return %arg0, %c0_i32 : i32, i32
  }
  func.func @transform_1(%arg0: i32) -> (i32, i32) {
    %c0_i32 = arith.constant 0 : i32
    %c0_i32_0 = arith.constant 0 : i32
    return %arg0, %c0_i32 : i32, i32
  }
  func.func @transform_2(%arg0: i32) -> (i32, i32, i32) {
    %c0_i32 = arith.constant 0 : i32
    %c0_i32_0 = arith.constant 0 : i32
    %c0_i32_1 = arith.constant 0 : i32
    %c0_i32_2 = arith.constant 0 : i32
    return %c0_i32, %c0_i32_0, %c0_i32_1 : i32, i32, i32
  }
  func.func @transform_3(%arg0: i32) -> (i32, i32) {
    %c0_i32 = arith.constant 0 : i32
    %c0_i32_0 = arith.constant 0 : i32
    %c0_i32_1 = arith.constant 0 : i32
    return %c0_i32, %c0_i32_0 : i32, i32
  }
  func.func @transform_4(%arg0: i32) -> (i32, i32) {
    %c0_i32 = arith.constant 0 : i32
    %c0_i32_0 = arith.constant 0 : i32
    %c0_i32_1 = arith.constant 0 : i32
    return %c0_i32, %c0_i32_0 : i32, i32
  }
  func.func @transform_5(%arg0: i32) -> (i32, i32, i32) {
    %c0_i32 = arith.constant 0 : i32
    %c0_i32_0 = arith.constant 0 : i32
    %c0_i32_1 = arith.constant 0 : i32
    %c0_i32_2 = arith.constant 0 : i32
    return %c0_i32, %c0_i32_0, %c0_i32_1 : i32, i32, i32
  }
  func.func @transform_6(%arg0: i32) -> (i32, i32, i32) {
    %c0_i32 = arith.constant 0 : i32
    %c0_i32_0 = arith.constant 0 : i32
    %c0_i32_1 = arith.constant 0 : i32
    %c0_i32_2 = arith.constant 0 : i32
    return %c0_i32, %c0_i32_0, %c0_i32_1 : i32, i32, i32
  }
  func.func @transform_7(%arg0: i32) -> (i32, i32, i32) {
    %c0_i32 = arith.constant 0 : i32
    %c0_i32_0 = arith.constant 0 : i32
    %c0_i32_1 = arith.constant 0 : i32
    %c0_i32_2 = arith.constant 0 : i32
    return %c0_i32, %c0_i32_0, %c0_i32_1 : i32, i32, i32
  }
  func.func @transform_8(%arg0: i32) -> (i32, i32, i32) {
    %c0_i32 = arith.constant 0 : i32
    %c0_i32_0 = arith.constant 0 : i32
    %c0_i32_1 = arith.constant 0 : i32
    %c0_i32_2 = arith.constant 0 : i32
    return %c0_i32, %c0_i32_0, %c0_i32_1 : i32, i32, i32
  }
  func.func @transform_9(%arg0: i32) -> (i32, i32, i32) {
    %c0_i32 = arith.constant 0 : i32
    %c0_i32_0 = arith.constant 0 : i32
    %c0_i32_1 = arith.constant 0 : i32
    %c0_i32_2 = arith.constant 0 : i32
    return %c0_i32, %c0_i32_0, %c0_i32_1 : i32, i32, i32
  }
  func.func @transform_10(%arg0: i32) -> (i32, i32, i32) {
    %c0_i32 = arith.constant 0 : i32
    %c0_i32_0 = arith.constant 0 : i32
    %c0_i32_1 = arith.constant 0 : i32
    %c0_i32_2 = arith.constant 0 : i32
    return %c0_i32, %c0_i32_0, %c0_i32_1 : i32, i32, i32
  }
  func.func @transform_11(%arg0: i32) -> (i32, i32, i32) {
    %c0_i32 = arith.constant 0 : i32
    %c0_i32_0 = arith.constant 0 : i32
    %c0_i32_1 = arith.constant 0 : i32
    %c0_i32_2 = arith.constant 0 : i32
    return %c0_i32, %c0_i32_0, %c0_i32_1 : i32, i32, i32
  }
  func.func @transform_12(%arg0: i32) -> (i32, i32) {
    %c0_i32 = arith.constant 0 : i32
    %c0_i32_0 = arith.constant 0 : i32
    %c0_i32_1 = arith.constant 0 : i32
    return %c0_i32, %c0_i32_0 : i32, i32
  }
  func.func @transform_13(%arg0: i32) -> (i32, i32) {
    %c0_i32 = arith.constant 0 : i32
    %c0_i32_0 = arith.constant 0 : i32
    %c0_i32_1 = arith.constant 0 : i32
    return %c0_i32, %c0_i32_0 : i32, i32
  }
  func.func @transform_14(%arg0: i32) -> (i32, i32) {
    %c0_i32 = arith.constant 0 : i32
    %c0_i32_0 = arith.constant 0 : i32
    %c0_i32_1 = arith.constant 0 : i32
    return %c0_i32, %c0_i32_0 : i32, i32
  }
  func.func @transform_15(%arg0: i32) -> (i32, i32) {
    %c0_i32 = arith.constant 0 : i32
    %c0_i32_0 = arith.constant 0 : i32
    %c0_i32_1 = arith.constant 0 : i32
    return %c0_i32, %c0_i32_0 : i32, i32
  }
  func.func @transform_16(%arg0: i32) -> (i32, i32) {
    %c0_i32 = arith.constant 0 : i32
    %c0_i32_0 = arith.constant 0 : i32
    %c0_i32_1 = arith.constant 0 : i32
    return %c0_i32, %c0_i32_0 : i32, i32
  }
  func.func @transform_17(%arg0: i32) -> (i32, i32) {
    %c0_i32 = arith.constant 0 : i32
    %c0_i32_0 = arith.constant 0 : i32
    %c0_i32_1 = arith.constant 0 : i32
    return %c0_i32, %c0_i32_0 : i32, i32
  }
  func.func @transform_18(%arg0: i32) -> (i32, i32) {
    %c0_i32 = arith.constant 0 : i32
    %c0_i32_0 = arith.constant 0 : i32
    %c0_i32_1 = arith.constant 0 : i32
    return %c0_i32, %c0_i32_0 : i32, i32
  }
  func.func @transform_19(%arg0: i32) -> (i32, i32) {
    %c0_i32 = arith.constant 0 : i32
    %c0_i32_0 = arith.constant 0 : i32
    return %arg0, %c0_i32 : i32, i32
  }
}

module attributes {stable_mosaic.version = 11 : i64} {
  func.func @_swin_block_kernel(%arg0: i32, %arg1: memref<64x16xf32, #tpu.memory_space<vmem>>, %arg2: memref<64x16xf32, #tpu.memory_space<vmem>>, %arg3: memref<2x4x16x16xf32, #tpu.memory_space<vmem>>, %arg4: memref<1x16xf32, #tpu.memory_space<vmem>>, %arg5: memref<1x16xf32, #tpu.memory_space<vmem>>, %arg6: memref<2x16x8xf32, #tpu.memory_space<vmem>>, %arg7: memref<2x1x8xf32, #tpu.memory_space<vmem>>, %arg8: memref<2x16x8xf32, #tpu.memory_space<vmem>>, %arg9: memref<2x1x8xf32, #tpu.memory_space<vmem>>, %arg10: memref<2x16x8xf32, #tpu.memory_space<vmem>>, %arg11: memref<2x1x8xf32, #tpu.memory_space<vmem>>, %arg12: memref<2x8x16xf32, #tpu.memory_space<vmem>>, %arg13: memref<1x16xf32, #tpu.memory_space<vmem>>, %arg14: memref<1x16xf32, #tpu.memory_space<vmem>>, %arg15: memref<1x16xf32, #tpu.memory_space<vmem>>, %arg16: memref<16x64xf32, #tpu.memory_space<vmem>>, %arg17: memref<1x64xf32, #tpu.memory_space<vmem>>, %arg18: memref<64x16xf32, #tpu.memory_space<vmem>>, %arg19: memref<1x16xf32, #tpu.memory_space<vmem>>, %arg20: memref<64x16xf32, #tpu.memory_space<vmem>>) attributes {dimension_semantics = [#tpu.dimension_semantics<parallel>], iteration_bounds = array<i64: 2>, scalar_prefetch = 0 : i64, scratch_operands = 0 : i64, tpu.core_type = #tpu.core_type<tc>, window_params = [{transform_indices = @transform_0, window_bounds = array<i64: 64, 16>}, {transform_indices = @transform_1, window_bounds = array<i64: 64, 16>}, {pipeline_mode = #tpu.pipeline_mode<synchronous>, transform_indices = @transform_2, window_bounds = array<i64: 2, 4, 16, 16>}, {pipeline_mode = #tpu.pipeline_mode<synchronous>, transform_indices = @transform_3, window_bounds = array<i64: 1, 16>}, {pipeline_mode = #tpu.pipeline_mode<synchronous>, transform_indices = @transform_4, window_bounds = array<i64: 1, 16>}, {pipeline_mode = #tpu.pipeline_mode<synchronous>, transform_indices = @transform_5, window_bounds = array<i64: 2, 16, 8>}, {pipeline_mode = #tpu.pipeline_mode<synchronous>, transform_indices = @transform_6, window_bounds = array<i64: 2, 1, 8>}, {pipeline_mode = #tpu.pipeline_mode<synchronous>, transform_indices = @transform_7, window_bounds = array<i64: 2, 16, 8>}, {pipeline_mode = #tpu.pipeline_mode<synchronous>, transform_indices = @transform_8, window_bounds = array<i64: 2, 1, 8>}, {pipeline_mode = #tpu.pipeline_mode<synchronous>, transform_indices = @transform_9, window_bounds = array<i64: 2, 16, 8>}, {pipeline_mode = #tpu.pipeline_mode<synchronous>, transform_indices = @transform_10, window_bounds = array<i64: 2, 1, 8>}, {pipeline_mode = #tpu.pipeline_mode<synchronous>, transform_indices = @transform_11, window_bounds = array<i64: 2, 8, 16>}, {pipeline_mode = #tpu.pipeline_mode<synchronous>, transform_indices = @transform_12, window_bounds = array<i64: 1, 16>}, {pipeline_mode = #tpu.pipeline_mode<synchronous>, transform_indices = @transform_13, window_bounds = array<i64: 1, 16>}, {pipeline_mode = #tpu.pipeline_mode<synchronous>, transform_indices = @transform_14, window_bounds = array<i64: 1, 16>}, {pipeline_mode = #tpu.pipeline_mode<synchronous>, transform_indices = @transform_15, window_bounds = array<i64: 16, 64>}, {pipeline_mode = #tpu.pipeline_mode<synchronous>, transform_indices = @transform_16, window_bounds = array<i64: 1, 64>}, {pipeline_mode = #tpu.pipeline_mode<synchronous>, transform_indices = @transform_17, window_bounds = array<i64: 64, 16>}, {pipeline_mode = #tpu.pipeline_mode<synchronous>, transform_indices = @transform_18, window_bounds = array<i64: 1, 16>}, {transform_indices = @transform_19, window_bounds = array<i64: 64, 16>}]} {
    %c0 = arith.constant 0 : index
    %c0_0 = arith.constant 0 : index
    %0 = vector.load %arg1[%c0, %c0_0] : memref<64x16xf32, #tpu.memory_space<vmem>>, vector<64x16xf32>
    %c0_1 = arith.constant 0 : index
    %c0_2 = arith.constant 0 : index
    %1 = vector.load %arg2[%c0_1, %c0_2] : memref<64x16xf32, #tpu.memory_space<vmem>>, vector<64x16xf32>
    %c0_3 = arith.constant 0 : index
    %c0_4 = arith.constant 0 : index
    %2 = vector.load %arg4[%c0_3, %c0_4] : memref<1x16xf32, #tpu.memory_space<vmem>>, vector<1x16xf32>
    %3 = vector.shape_cast %2 : vector<1x16xf32> to vector<16xf32>
    %c0_5 = arith.constant 0 : index
    %c0_6 = arith.constant 0 : index
    %4 = vector.load %arg5[%c0_5, %c0_6] : memref<1x16xf32, #tpu.memory_space<vmem>>, vector<1x16xf32>
    %5 = vector.shape_cast %4 : vector<1x16xf32> to vector<16xf32>
    %cst = arith.constant dense<0.000000e+00> : vector<64xf32>
    %6 = vector.multi_reduction <add>, %0, %cst [1] : vector<64x16xf32> to vector<64xf32>
    %7 = vector.shape_cast %6 : vector<64xf32> to vector<64x1xf32>
    %cst_7 = arith.constant 1.600000e+01 : f32
    %8 = vector.broadcast %cst_7 : f32 to vector<64x1xf32>
    %9 = arith.divf %7, %8 : vector<64x1xf32>
    %10 = vector.broadcast %9 : vector<64x1xf32> to vector<64x16xf32>
    %11 = arith.subf %0, %10 : vector<64x16xf32>
    %12 = arith.mulf %11, %11 : vector<64x16xf32>
    %cst_8 = arith.constant dense<0.000000e+00> : vector<64xf32>
    %13 = vector.multi_reduction <add>, %12, %cst_8 [1] : vector<64x16xf32> to vector<64xf32>
    %14 = vector.shape_cast %13 : vector<64xf32> to vector<64x1xf32>
    %cst_9 = arith.constant 1.600000e+01 : f32
    %15 = vector.broadcast %cst_9 : f32 to vector<64x1xf32>
    %16 = arith.divf %14, %15 : vector<64x1xf32>
    %17 = vector.broadcast %9 : vector<64x1xf32> to vector<64x16xf32>
    %18 = arith.subf %0, %17 : vector<64x16xf32>
    %cst_10 = arith.constant 9.99999974E-6 : f32
    %19 = vector.broadcast %cst_10 : f32 to vector<64x1xf32>
    %20 = arith.addf %16, %19 : vector<64x1xf32>
    %21 = math.rsqrt %20 : vector<64x1xf32>
    %22 = vector.broadcast %21 : vector<64x1xf32> to vector<64x16xf32>
    %23 = arith.mulf %18, %22 : vector<64x16xf32>
    %24 = vector.shape_cast %3 : vector<16xf32> to vector<1x16xf32>
    %25 = vector.broadcast %24 : vector<1x16xf32> to vector<64x16xf32>
    %26 = arith.mulf %23, %25 : vector<64x16xf32>
    %27 = vector.shape_cast %5 : vector<16xf32> to vector<1x16xf32>
    %28 = vector.broadcast %27 : vector<1x16xf32> to vector<64x16xf32>
    %29 = arith.addf %26, %28 : vector<64x16xf32>
    %cst_11 = arith.constant 0.000000e+00 : f32
    %30 = vector.broadcast %cst_11 : f32 to vector<64x16xf32>
    %c0_12 = arith.constant 0 : index
    %c0_13 = arith.constant 0 : index
    %c0_14 = arith.constant 0 : index
    %31 = vector.load %arg6[%c0_12, %c0_13, %c0_14] : memref<2x16x8xf32, #tpu.memory_space<vmem>>, vector<1x16x8xf32>
    %32 = vector.shape_cast %31 : vector<1x16x8xf32> to vector<16x8xf32>
    %cst_15 = arith.constant dense<0.000000e+00> : vector<64x8xf32>
    %33 = tpu.matmul %1, %32, %cst_15 {dimension_numbers = #tpu.dot_dimension_numbers<[1], [0], [0], [1], [0, 0, 1, 1], [], []>} : vector<64x16xf32>, vector<16x8xf32>, vector<64x8xf32> -> vector<64x8xf32>
    %c0_16 = arith.constant 0 : index
    %c0_17 = arith.constant 0 : index
    %c0_18 = arith.constant 0 : index
    %34 = vector.load %arg7[%c0_16, %c0_17, %c0_18] : memref<2x1x8xf32, #tpu.memory_space<vmem>>, vector<1x1x8xf32>
    %35 = vector.shape_cast %34 : vector<1x1x8xf32> to vector<1x8xf32>
    %36 = vector.broadcast %35 : vector<1x8xf32> to vector<64x8xf32>
    %37 = arith.addf %33, %36 : vector<64x8xf32>
    %c0_19 = arith.constant 0 : index
    %c0_20 = arith.constant 0 : index
    %c0_21 = arith.constant 0 : index
    %38 = vector.load %arg8[%c0_19, %c0_20, %c0_21] : memref<2x16x8xf32, #tpu.memory_space<vmem>>, vector<1x16x8xf32>
    %39 = vector.shape_cast %38 : vector<1x16x8xf32> to vector<16x8xf32>
    %cst_22 = arith.constant dense<0.000000e+00> : vector<64x8xf32>
    %40 = tpu.matmul %29, %39, %cst_22 {dimension_numbers = #tpu.dot_dimension_numbers<[1], [0], [0], [1], [0, 0, 1, 1], [], []>} : vector<64x16xf32>, vector<16x8xf32>, vector<64x8xf32> -> vector<64x8xf32>
    %c0_23 = arith.constant 0 : index
    %c0_24 = arith.constant 0 : index
    %c0_25 = arith.constant 0 : index
    %41 = vector.load %arg9[%c0_23, %c0_24, %c0_25] : memref<2x1x8xf32, #tpu.memory_space<vmem>>, vector<1x1x8xf32>
    %42 = vector.shape_cast %41 : vector<1x1x8xf32> to vector<1x8xf32>
    %43 = vector.broadcast %42 : vector<1x8xf32> to vector<64x8xf32>
    %44 = arith.addf %40, %43 : vector<64x8xf32>
    %c0_26 = arith.constant 0 : index
    %c0_27 = arith.constant 0 : index
    %c0_28 = arith.constant 0 : index
    %45 = vector.load %arg10[%c0_26, %c0_27, %c0_28] : memref<2x16x8xf32, #tpu.memory_space<vmem>>, vector<1x16x8xf32>
    %46 = vector.shape_cast %45 : vector<1x16x8xf32> to vector<16x8xf32>
    %cst_29 = arith.constant dense<0.000000e+00> : vector<64x8xf32>
    %47 = tpu.matmul %29, %46, %cst_29 {dimension_numbers = #tpu.dot_dimension_numbers<[1], [0], [0], [1], [0, 0, 1, 1], [], []>} : vector<64x16xf32>, vector<16x8xf32>, vector<64x8xf32> -> vector<64x8xf32>
    %c0_30 = arith.constant 0 : index
    %c0_31 = arith.constant 0 : index
    %c0_32 = arith.constant 0 : index
    %48 = vector.load %arg11[%c0_30, %c0_31, %c0_32] : memref<2x1x8xf32, #tpu.memory_space<vmem>>, vector<1x1x8xf32>
    %49 = vector.shape_cast %48 : vector<1x1x8xf32> to vector<1x8xf32>
    %50 = vector.broadcast %49 : vector<1x8xf32> to vector<64x8xf32>
    %51 = arith.addf %47, %50 : vector<64x8xf32>
    %52 = vector.shape_cast %37 : vector<64x8xf32> to vector<4x16x8xf32>
    %53 = vector.shape_cast %44 : vector<64x8xf32> to vector<4x16x8xf32>
    %54 = vector.shape_cast %51 : vector<64x8xf32> to vector<4x16x8xf32>
    "tpu.trace_start"() <{level = 10 : i32, message = "wld,wmd->wlm"}> : () -> ()
    %cst_33 = arith.constant dense<0.000000e+00> : vector<4x16x16xf32>
    %55 = tpu.matmul %52, %53, %cst_33 {dimension_numbers = #tpu.dot_dimension_numbers<[2], [2], [1], [1], [0, 0, 0, 1, 1, 1], [0], [0]>} : vector<4x16x8xf32>, vector<4x16x8xf32>, vector<4x16x16xf32> -> vector<4x16x16xf32>
    "tpu.trace_stop"() : () -> ()
    %c0_34 = arith.constant 0 : index
    %c0_35 = arith.constant 0 : index
    %c0_36 = arith.constant 0 : index
    %c0_37 = arith.constant 0 : index
    %56 = vector.load %arg3[%c0_34, %c0_35, %c0_36, %c0_37] : memref<2x4x16x16xf32, #tpu.memory_space<vmem>>, vector<1x4x16x16xf32>
    %57 = vector.shape_cast %56 : vector<1x4x16x16xf32> to vector<4x16x16xf32>
    %58 = arith.addf %55, %57 : vector<4x16x16xf32>
    %cst_38 = arith.constant dense<0xFF800000> : vector<4x16xf32>
    %59 = vector.multi_reduction <maximumf>, %58, %cst_38 [2] : vector<4x16x16xf32> to vector<4x16xf32>
    %60 = vector.shape_cast %59 : vector<4x16xf32> to vector<4x16x1xf32>
    %61 = vector.broadcast %60 : vector<4x16x1xf32> to vector<4x16x16xf32>
    %62 = arith.subf %58, %61 : vector<4x16x16xf32>
    %63 = math.exp %62 : vector<4x16x16xf32>
    %cst_39 = arith.constant dense<0.000000e+00> : vector<4x16xf32>
    %64 = vector.multi_reduction <add>, %63, %cst_39 [2] : vector<4x16x16xf32> to vector<4x16xf32>
    %65 = vector.shape_cast %64 : vector<4x16xf32> to vector<4x16x1xf32>
    %cst_40 = arith.constant 1.000000e+00 : f32
    %66 = vector.broadcast %cst_40 : f32 to vector<4x16x1xf32>
    %67 = arith.addf %65, %66 : vector<4x16x1xf32>
    %68 = tpu.reciprocal %67 {approx = true} : vector<4x16x1xf32> -> vector<4x16x1xf32>
    %69 = vector.broadcast %68 : vector<4x16x1xf32> to vector<4x16x16xf32>
    %70 = arith.mulf %63, %69 : vector<4x16x16xf32>
    "tpu.trace_start"() <{level = 10 : i32, message = "wlm,wmd->wld"}> : () -> ()
    %cst_41 = arith.constant dense<0.000000e+00> : vector<4x16x8xf32>
    %71 = tpu.matmul %70, %54, %cst_41 {dimension_numbers = #tpu.dot_dimension_numbers<[2], [1], [1], [2], [0, 0, 0, 1, 1, 2], [0], [0]>} : vector<4x16x16xf32>, vector<4x16x8xf32>, vector<4x16x8xf32> -> vector<4x16x8xf32>
    "tpu.trace_stop"() : () -> ()
    %72 = vector.shape_cast %71 : vector<4x16x8xf32> to vector<64x8xf32>
    %c0_42 = arith.constant 0 : index
    %c0_43 = arith.constant 0 : index
    %c0_44 = arith.constant 0 : index
    %73 = vector.load %arg12[%c0_42, %c0_43, %c0_44] : memref<2x8x16xf32, #tpu.memory_space<vmem>>, vector<1x8x16xf32>
    %74 = vector.shape_cast %73 : vector<1x8x16xf32> to vector<8x16xf32>
    %cst_45 = arith.constant dense<0.000000e+00> : vector<64x16xf32>
    %75 = tpu.matmul %72, %74, %cst_45 {dimension_numbers = #tpu.dot_dimension_numbers<[1], [0], [0], [1], [0, 0, 1, 1], [], []>} : vector<64x8xf32>, vector<8x16xf32>, vector<64x16xf32> -> vector<64x16xf32>
    %76 = arith.addf %30, %75 : vector<64x16xf32>
    %c1 = arith.constant 1 : index
    %c0_46 = arith.constant 0 : index
    %c0_47 = arith.constant 0 : index
    %77 = vector.load %arg6[%c1, %c0_46, %c0_47] : memref<2x16x8xf32, #tpu.memory_space<vmem>>, vector<1x16x8xf32>
    %78 = vector.shape_cast %77 : vector<1x16x8xf32> to vector<16x8xf32>
    %cst_48 = arith.constant dense<0.000000e+00> : vector<64x8xf32>
    %79 = tpu.matmul %1, %78, %cst_48 {dimension_numbers = #tpu.dot_dimension_numbers<[1], [0], [0], [1], [0, 0, 1, 1], [], []>} : vector<64x16xf32>, vector<16x8xf32>, vector<64x8xf32> -> vector<64x8xf32>
    %c1_49 = arith.constant 1 : index
    %c0_50 = arith.constant 0 : index
    %c0_51 = arith.constant 0 : index
    %80 = vector.load %arg7[%c1_49, %c0_50, %c0_51] : memref<2x1x8xf32, #tpu.memory_space<vmem>>, vector<1x1x8xf32>
    %81 = vector.shape_cast %80 : vector<1x1x8xf32> to vector<1x8xf32>
    %82 = vector.broadcast %81 : vector<1x8xf32> to vector<64x8xf32>
    %83 = arith.addf %79, %82 : vector<64x8xf32>
    %c1_52 = arith.constant 1 : index
    %c0_53 = arith.constant 0 : index
    %c0_54 = arith.constant 0 : index
    %84 = vector.load %arg8[%c1_52, %c0_53, %c0_54] : memref<2x16x8xf32, #tpu.memory_space<vmem>>, vector<1x16x8xf32>
    %85 = vector.shape_cast %84 : vector<1x16x8xf32> to vector<16x8xf32>
    %cst_55 = arith.constant dense<0.000000e+00> : vector<64x8xf32>
    %86 = tpu.matmul %29, %85, %cst_55 {dimension_numbers = #tpu.dot_dimension_numbers<[1], [0], [0], [1], [0, 0, 1, 1], [], []>} : vector<64x16xf32>, vector<16x8xf32>, vector<64x8xf32> -> vector<64x8xf32>
    %c1_56 = arith.constant 1 : index
    %c0_57 = arith.constant 0 : index
    %c0_58 = arith.constant 0 : index
    %87 = vector.load %arg9[%c1_56, %c0_57, %c0_58] : memref<2x1x8xf32, #tpu.memory_space<vmem>>, vector<1x1x8xf32>
    %88 = vector.shape_cast %87 : vector<1x1x8xf32> to vector<1x8xf32>
    %89 = vector.broadcast %88 : vector<1x8xf32> to vector<64x8xf32>
    %90 = arith.addf %86, %89 : vector<64x8xf32>
    %c1_59 = arith.constant 1 : index
    %c0_60 = arith.constant 0 : index
    %c0_61 = arith.constant 0 : index
    %91 = vector.load %arg10[%c1_59, %c0_60, %c0_61] : memref<2x16x8xf32, #tpu.memory_space<vmem>>, vector<1x16x8xf32>
    %92 = vector.shape_cast %91 : vector<1x16x8xf32> to vector<16x8xf32>
    %cst_62 = arith.constant dense<0.000000e+00> : vector<64x8xf32>
    %93 = tpu.matmul %29, %92, %cst_62 {dimension_numbers = #tpu.dot_dimension_numbers<[1], [0], [0], [1], [0, 0, 1, 1], [], []>} : vector<64x16xf32>, vector<16x8xf32>, vector<64x8xf32> -> vector<64x8xf32>
    %c1_63 = arith.constant 1 : index
    %c0_64 = arith.constant 0 : index
    %c0_65 = arith.constant 0 : index
    %94 = vector.load %arg11[%c1_63, %c0_64, %c0_65] : memref<2x1x8xf32, #tpu.memory_space<vmem>>, vector<1x1x8xf32>
    %95 = vector.shape_cast %94 : vector<1x1x8xf32> to vector<1x8xf32>
    %96 = vector.broadcast %95 : vector<1x8xf32> to vector<64x8xf32>
    %97 = arith.addf %93, %96 : vector<64x8xf32>
    %98 = vector.shape_cast %83 : vector<64x8xf32> to vector<4x16x8xf32>
    %99 = vector.shape_cast %90 : vector<64x8xf32> to vector<4x16x8xf32>
    %100 = vector.shape_cast %97 : vector<64x8xf32> to vector<4x16x8xf32>
    "tpu.trace_start"() <{level = 10 : i32, message = "wld,wmd->wlm"}> : () -> ()
    %cst_66 = arith.constant dense<0.000000e+00> : vector<4x16x16xf32>
    %101 = tpu.matmul %98, %99, %cst_66 {dimension_numbers = #tpu.dot_dimension_numbers<[2], [2], [1], [1], [0, 0, 0, 1, 1, 1], [0], [0]>} : vector<4x16x8xf32>, vector<4x16x8xf32>, vector<4x16x16xf32> -> vector<4x16x16xf32>
    "tpu.trace_stop"() : () -> ()
    %c1_67 = arith.constant 1 : index
    %c0_68 = arith.constant 0 : index
    %c0_69 = arith.constant 0 : index
    %c0_70 = arith.constant 0 : index
    %102 = vector.load %arg3[%c1_67, %c0_68, %c0_69, %c0_70] : memref<2x4x16x16xf32, #tpu.memory_space<vmem>>, vector<1x4x16x16xf32>
    %103 = vector.shape_cast %102 : vector<1x4x16x16xf32> to vector<4x16x16xf32>
    %104 = arith.addf %101, %103 : vector<4x16x16xf32>
    %cst_71 = arith.constant dense<0xFF800000> : vector<4x16xf32>
    %105 = vector.multi_reduction <maximumf>, %104, %cst_71 [2] : vector<4x16x16xf32> to vector<4x16xf32>
    %106 = vector.shape_cast %105 : vector<4x16xf32> to vector<4x16x1xf32>
    %107 = vector.broadcast %106 : vector<4x16x1xf32> to vector<4x16x16xf32>
    %108 = arith.subf %104, %107 : vector<4x16x16xf32>
    %109 = math.exp %108 : vector<4x16x16xf32>
    %cst_72 = arith.constant dense<0.000000e+00> : vector<4x16xf32>
    %110 = vector.multi_reduction <add>, %109, %cst_72 [2] : vector<4x16x16xf32> to vector<4x16xf32>
    %111 = vector.shape_cast %110 : vector<4x16xf32> to vector<4x16x1xf32>
    %cst_73 = arith.constant 1.000000e+00 : f32
    %112 = vector.broadcast %cst_73 : f32 to vector<4x16x1xf32>
    %113 = arith.addf %111, %112 : vector<4x16x1xf32>
    %114 = tpu.reciprocal %113 {approx = true} : vector<4x16x1xf32> -> vector<4x16x1xf32>
    %115 = vector.broadcast %114 : vector<4x16x1xf32> to vector<4x16x16xf32>
    %116 = arith.mulf %109, %115 : vector<4x16x16xf32>
    "tpu.trace_start"() <{level = 10 : i32, message = "wlm,wmd->wld"}> : () -> ()
    %cst_74 = arith.constant dense<0.000000e+00> : vector<4x16x8xf32>
    %117 = tpu.matmul %116, %100, %cst_74 {dimension_numbers = #tpu.dot_dimension_numbers<[2], [1], [1], [2], [0, 0, 0, 1, 1, 2], [0], [0]>} : vector<4x16x16xf32>, vector<4x16x8xf32>, vector<4x16x8xf32> -> vector<4x16x8xf32>
    "tpu.trace_stop"() : () -> ()
    %118 = vector.shape_cast %117 : vector<4x16x8xf32> to vector<64x8xf32>
    %c1_75 = arith.constant 1 : index
    %c0_76 = arith.constant 0 : index
    %c0_77 = arith.constant 0 : index
    %119 = vector.load %arg12[%c1_75, %c0_76, %c0_77] : memref<2x8x16xf32, #tpu.memory_space<vmem>>, vector<1x8x16xf32>
    %120 = vector.shape_cast %119 : vector<1x8x16xf32> to vector<8x16xf32>
    %cst_78 = arith.constant dense<0.000000e+00> : vector<64x16xf32>
    %121 = tpu.matmul %118, %120, %cst_78 {dimension_numbers = #tpu.dot_dimension_numbers<[1], [0], [0], [1], [0, 0, 1, 1], [], []>} : vector<64x8xf32>, vector<8x16xf32>, vector<64x16xf32> -> vector<64x16xf32>
    %122 = arith.addf %76, %121 : vector<64x16xf32>
    %c0_79 = arith.constant 0 : index
    %c0_80 = arith.constant 0 : index
    %123 = vector.load %arg13[%c0_79, %c0_80] : memref<1x16xf32, #tpu.memory_space<vmem>>, vector<1x16xf32>
    %124 = vector.shape_cast %123 : vector<1x16xf32> to vector<16xf32>
    %125 = vector.shape_cast %124 : vector<16xf32> to vector<1x16xf32>
    %126 = vector.broadcast %125 : vector<1x16xf32> to vector<64x16xf32>
    %127 = arith.addf %122, %126 : vector<64x16xf32>
    %128 = arith.addf %0, %127 : vector<64x16xf32>
    %c0_81 = arith.constant 0 : index
    %c0_82 = arith.constant 0 : index
    %129 = vector.load %arg14[%c0_81, %c0_82] : memref<1x16xf32, #tpu.memory_space<vmem>>, vector<1x16xf32>
    %130 = vector.shape_cast %129 : vector<1x16xf32> to vector<16xf32>
    %c0_83 = arith.constant 0 : index
    %c0_84 = arith.constant 0 : index
    %131 = vector.load %arg15[%c0_83, %c0_84] : memref<1x16xf32, #tpu.memory_space<vmem>>, vector<1x16xf32>
    %132 = vector.shape_cast %131 : vector<1x16xf32> to vector<16xf32>
    %cst_85 = arith.constant dense<0.000000e+00> : vector<64xf32>
    %133 = vector.multi_reduction <add>, %128, %cst_85 [1] : vector<64x16xf32> to vector<64xf32>
    %134 = vector.shape_cast %133 : vector<64xf32> to vector<64x1xf32>
    %cst_86 = arith.constant 1.600000e+01 : f32
    %135 = vector.broadcast %cst_86 : f32 to vector<64x1xf32>
    %136 = arith.divf %134, %135 : vector<64x1xf32>
    %137 = vector.broadcast %136 : vector<64x1xf32> to vector<64x16xf32>
    %138 = arith.subf %128, %137 : vector<64x16xf32>
    %139 = arith.mulf %138, %138 : vector<64x16xf32>
    %cst_87 = arith.constant dense<0.000000e+00> : vector<64xf32>
    %140 = vector.multi_reduction <add>, %139, %cst_87 [1] : vector<64x16xf32> to vector<64xf32>
    %141 = vector.shape_cast %140 : vector<64xf32> to vector<64x1xf32>
    %cst_88 = arith.constant 1.600000e+01 : f32
    %142 = vector.broadcast %cst_88 : f32 to vector<64x1xf32>
    %143 = arith.divf %141, %142 : vector<64x1xf32>
    %144 = vector.broadcast %136 : vector<64x1xf32> to vector<64x16xf32>
    %145 = arith.subf %128, %144 : vector<64x16xf32>
    %cst_89 = arith.constant 9.99999974E-6 : f32
    %146 = vector.broadcast %cst_89 : f32 to vector<64x1xf32>
    %147 = arith.addf %143, %146 : vector<64x1xf32>
    %148 = math.rsqrt %147 : vector<64x1xf32>
    %149 = vector.broadcast %148 : vector<64x1xf32> to vector<64x16xf32>
    %150 = arith.mulf %145, %149 : vector<64x16xf32>
    %151 = vector.shape_cast %130 : vector<16xf32> to vector<1x16xf32>
    %152 = vector.broadcast %151 : vector<1x16xf32> to vector<64x16xf32>
    %153 = arith.mulf %150, %152 : vector<64x16xf32>
    %154 = vector.shape_cast %132 : vector<16xf32> to vector<1x16xf32>
    %155 = vector.broadcast %154 : vector<1x16xf32> to vector<64x16xf32>
    %156 = arith.addf %153, %155 : vector<64x16xf32>
    %c0_90 = arith.constant 0 : index
    %c0_91 = arith.constant 0 : index
    %157 = vector.load %arg16[%c0_90, %c0_91] : memref<16x64xf32, #tpu.memory_space<vmem>>, vector<16x64xf32>
    %cst_92 = arith.constant dense<0.000000e+00> : vector<64x64xf32>
    %158 = tpu.matmul %156, %157, %cst_92 {dimension_numbers = #tpu.dot_dimension_numbers<[1], [0], [0], [1], [0, 0, 1, 1], [], []>} : vector<64x16xf32>, vector<16x64xf32>, vector<64x64xf32> -> vector<64x64xf32>
    %c0_93 = arith.constant 0 : index
    %c0_94 = arith.constant 0 : index
    %159 = vector.load %arg17[%c0_93, %c0_94] : memref<1x64xf32, #tpu.memory_space<vmem>>, vector<1x64xf32>
    %160 = vector.shape_cast %159 : vector<1x64xf32> to vector<64xf32>
    %161 = vector.shape_cast %160 : vector<64xf32> to vector<1x64xf32>
    %162 = vector.broadcast %161 : vector<1x64xf32> to vector<64x64xf32>
    %163 = arith.addf %158, %162 : vector<64x64xf32>
    %cst_95 = arith.constant 5.000000e-01 : f32
    %164 = vector.broadcast %cst_95 : f32 to vector<64x64xf32>
    %165 = arith.mulf %164, %163 : vector<64x64xf32>
    %cst_96 = arith.constant 1.41421354 : f32
    %166 = vector.broadcast %cst_96 : f32 to vector<64x64xf32>
    %167 = arith.divf %163, %166 : vector<64x64xf32>
    %168 = math.erf %167 : vector<64x64xf32>
    %cst_97 = arith.constant 1.000000e+00 : f32
    %169 = vector.broadcast %cst_97 : f32 to vector<64x64xf32>
    %170 = arith.addf %169, %168 : vector<64x64xf32>
    %171 = arith.mulf %165, %170 : vector<64x64xf32>
    %c0_98 = arith.constant 0 : index
    %c0_99 = arith.constant 0 : index
    %172 = vector.load %arg18[%c0_98, %c0_99] : memref<64x16xf32, #tpu.memory_space<vmem>>, vector<64x16xf32>
    %cst_100 = arith.constant dense<0.000000e+00> : vector<64x16xf32>
    %173 = tpu.matmul %171, %172, %cst_100 {dimension_numbers = #tpu.dot_dimension_numbers<[1], [0], [0], [1], [0, 0, 1, 1], [], []>} : vector<64x64xf32>, vector<64x16xf32>, vector<64x16xf32> -> vector<64x16xf32>
    %174 = arith.addf %128, %173 : vector<64x16xf32>
    %c0_101 = arith.constant 0 : index
    %c0_102 = arith.constant 0 : index
    %175 = vector.load %arg19[%c0_101, %c0_102] : memref<1x16xf32, #tpu.memory_space<vmem>>, vector<1x16xf32>
    %176 = vector.shape_cast %175 : vector<1x16xf32> to vector<16xf32>
    %177 = vector.shape_cast %176 : vector<16xf32> to vector<1x16xf32>
    %178 = vector.broadcast %177 : vector<1x16xf32> to vector<64x16xf32>
    %179 = arith.addf %174, %178 : vector<64x16xf32>
    %c0_103 = arith.constant 0 : index
    %c0_104 = arith.constant 0 : index
    %180 = vector.load %arg20[%c0_103, %c0_104] : memref<64x16xf32, #tpu.memory_space<vmem>>, vector<64x16xf32>
    tpu.vector_store %arg20[%c0_103, %c0_104], %179 {strides = array<i32>} : memref<64x16xf32, #tpu.memory_space<vmem>>, vector<64x16xf32>,
    return
  }
  func.func @transform_0(%arg0: i32) -> (i32, i32) {
    %c0_i32 = arith.constant 0 : i32
    %c0_i32_0 = arith.constant 0 : i32
    return %arg0, %c0_i32 : i32, i32
  }
  func.func @transform_1(%arg0: i32) -> (i32, i32) {
    %c0_i32 = arith.constant 0 : i32
    %c0_i32_0 = arith.constant 0 : i32
    return %arg0, %c0_i32 : i32, i32
  }
  func.func @transform_2(%arg0: i32) -> (i32, i32, i32, i32) {
    %c0_i32 = arith.constant 0 : i32
    %c0_i32_0 = arith.constant 0 : i32
    %c0_i32_1 = arith.constant 0 : i32
    %c0_i32_2 = arith.constant 0 : i32
    %c0_i32_3 = arith.constant 0 : i32
    return %c0_i32, %c0_i32_0, %c0_i32_1, %c0_i32_2 : i32, i32, i32, i32
  }
  func.func @transform_3(%arg0: i32) -> (i32, i32) {
    %c0_i32 = arith.constant 0 : i32
    %c0_i32_0 = arith.constant 0 : i32
    %c0_i32_1 = arith.constant 0 : i32
    return %c0_i32, %c0_i32_0 : i32, i32
  }
  func.func @transform_4(%arg0: i32) -> (i32, i32) {
    %c0_i32 = arith.constant 0 : i32
    %c0_i32_0 = arith.constant 0 : i32
    %c0_i32_1 = arith.constant 0 : i32
    return %c0_i32, %c0_i32_0 : i32, i32
  }
  func.func @transform_5(%arg0: i32) -> (i32, i32, i32) {
    %c0_i32 = arith.constant 0 : i32
    %c0_i32_0 = arith.constant 0 : i32
    %c0_i32_1 = arith.constant 0 : i32
    %c0_i32_2 = arith.constant 0 : i32
    return %c0_i32, %c0_i32_0, %c0_i32_1 : i32, i32, i32
  }
  func.func @transform_6(%arg0: i32) -> (i32, i32, i32) {
    %c0_i32 = arith.constant 0 : i32
    %c0_i32_0 = arith.constant 0 : i32
    %c0_i32_1 = arith.constant 0 : i32
    %c0_i32_2 = arith.constant 0 : i32
    return %c0_i32, %c0_i32_0, %c0_i32_1 : i32, i32, i32
  }
  func.func @transform_7(%arg0: i32) -> (i32, i32, i32) {
    %c0_i32 = arith.constant 0 : i32
    %c0_i32_0 = arith.constant 0 : i32
    %c0_i32_1 = arith.constant 0 : i32
    %c0_i32_2 = arith.constant 0 : i32
    return %c0_i32, %c0_i32_0, %c0_i32_1 : i32, i32, i32
  }
  func.func @transform_8(%arg0: i32) -> (i32, i32, i32) {
    %c0_i32 = arith.constant 0 : i32
    %c0_i32_0 = arith.constant 0 : i32
    %c0_i32_1 = arith.constant 0 : i32
    %c0_i32_2 = arith.constant 0 : i32
    return %c0_i32, %c0_i32_0, %c0_i32_1 : i32, i32, i32
  }
  func.func @transform_9(%arg0: i32) -> (i32, i32, i32) {
    %c0_i32 = arith.constant 0 : i32
    %c0_i32_0 = arith.constant 0 : i32
    %c0_i32_1 = arith.constant 0 : i32
    %c0_i32_2 = arith.constant 0 : i32
    return %c0_i32, %c0_i32_0, %c0_i32_1 : i32, i32, i32
  }
  func.func @transform_10(%arg0: i32) -> (i32, i32, i32) {
    %c0_i32 = arith.constant 0 : i32
    %c0_i32_0 = arith.constant 0 : i32
    %c0_i32_1 = arith.constant 0 : i32
    %c0_i32_2 = arith.constant 0 : i32
    return %c0_i32, %c0_i32_0, %c0_i32_1 : i32, i32, i32
  }
  func.func @transform_11(%arg0: i32) -> (i32, i32, i32) {
    %c0_i32 = arith.constant 0 : i32
    %c0_i32_0 = arith.constant 0 : i32
    %c0_i32_1 = arith.constant 0 : i32
    %c0_i32_2 = arith.constant 0 : i32
    return %c0_i32, %c0_i32_0, %c0_i32_1 : i32, i32, i32
  }
  func.func @transform_12(%arg0: i32) -> (i32, i32) {
    %c0_i32 = arith.constant 0 : i32
    %c0_i32_0 = arith.constant 0 : i32
    %c0_i32_1 = arith.constant 0 : i32
    return %c0_i32, %c0_i32_0 : i32, i32
  }
  func.func @transform_13(%arg0: i32) -> (i32, i32) {
    %c0_i32 = arith.constant 0 : i32
    %c0_i32_0 = arith.constant 0 : i32
    %c0_i32_1 = arith.constant 0 : i32
    return %c0_i32, %c0_i32_0 : i32, i32
  }
  func.func @transform_14(%arg0: i32) -> (i32, i32) {
    %c0_i32 = arith.constant 0 : i32
    %c0_i32_0 = arith.constant 0 : i32
    %c0_i32_1 = arith.constant 0 : i32
    return %c0_i32, %c0_i32_0 : i32, i32
  }
  func.func @transform_15(%arg0: i32) -> (i32, i32) {
    %c0_i32 = arith.constant 0 : i32
    %c0_i32_0 = arith.constant 0 : i32
    %c0_i32_1 = arith.constant 0 : i32
    return %c0_i32, %c0_i32_0 : i32, i32
  }
  func.func @transform_16(%arg0: i32) -> (i32, i32) {
    %c0_i32 = arith.constant 0 : i32
    %c0_i32_0 = arith.constant 0 : i32
    %c0_i32_1 = arith.constant 0 : i32
    return %c0_i32, %c0_i32_0 : i32, i32
  }
  func.func @transform_17(%arg0: i32) -> (i32, i32) {
    %c0_i32 = arith.constant 0 : i32
    %c0_i32_0 = arith.constant 0 : i32
    %c0_i32_1 = arith.constant 0 : i32
    return %c0_i32, %c0_i32_0 : i32, i32
  }
  func.func @transform_18(%arg0: i32) -> (i32, i32) {
    %c0_i32 = arith.constant 0 : i32
    %c0_i32_0 = arith.constant 0 : i32
    %c0_i32_1 = arith.constant 0 : i32
    return %c0_i32, %c0_i32_0 : i32, i32
  }
  func.func @transform_19(%arg0: i32) -> (i32, i32) {
    %c0_i32 = arith.constant 0 : i32
    %c0_i32_0 = arith.constant 0 : i32
    return %arg0, %c0_i32 : i32, i32
  }
}

module attributes {stable_mosaic.version = 11 : i64} {
  func.func @_patch_merge_kernel(%arg0: i32, %arg1: memref<32x64xf32, #tpu.memory_space<vmem>>, %arg2: memref<1x64xf32, #tpu.memory_space<vmem>>, %arg3: memref<1x64xf32, #tpu.memory_space<vmem>>, %arg4: memref<64x32xf32, #tpu.memory_space<vmem>>, %arg5: memref<32x32xf32, #tpu.memory_space<vmem>>) attributes {dimension_semantics = [#tpu.dimension_semantics<arbitrary>], iteration_bounds = array<i64: 1>, scalar_prefetch = 0 : i64, scratch_operands = 0 : i64, tpu.core_type = #tpu.core_type<tc>, window_params = [{pipeline_mode = #tpu.pipeline_mode<synchronous>, transform_indices = @transform_0, window_bounds = array<i64: 32, 64>}, {pipeline_mode = #tpu.pipeline_mode<synchronous>, transform_indices = @transform_1, window_bounds = array<i64: 1, 64>}, {pipeline_mode = #tpu.pipeline_mode<synchronous>, transform_indices = @transform_2, window_bounds = array<i64: 1, 64>}, {pipeline_mode = #tpu.pipeline_mode<synchronous>, transform_indices = @transform_3, window_bounds = array<i64: 64, 32>}, {pipeline_mode = #tpu.pipeline_mode<synchronous>, transform_indices = @transform_4, window_bounds = array<i64: 32, 32>}]} {
    %c0 = arith.constant 0 : index
    %c0_0 = arith.constant 0 : index
    %0 = vector.load %arg1[%c0, %c0_0] : memref<32x64xf32, #tpu.memory_space<vmem>>, vector<32x64xf32>
    %c0_1 = arith.constant 0 : index
    %c0_2 = arith.constant 0 : index
    %1 = vector.load %arg2[%c0_1, %c0_2] : memref<1x64xf32, #tpu.memory_space<vmem>>, vector<1x64xf32>
    %2 = vector.shape_cast %1 : vector<1x64xf32> to vector<64xf32>
    %c0_3 = arith.constant 0 : index
    %c0_4 = arith.constant 0 : index
    %3 = vector.load %arg3[%c0_3, %c0_4] : memref<1x64xf32, #tpu.memory_space<vmem>>, vector<1x64xf32>
    %4 = vector.shape_cast %3 : vector<1x64xf32> to vector<64xf32>
    %cst = arith.constant dense<0.000000e+00> : vector<32xf32>
    %5 = vector.multi_reduction <add>, %0, %cst [1] : vector<32x64xf32> to vector<32xf32>
    %6 = vector.shape_cast %5 : vector<32xf32> to vector<32x1xf32>
    %cst_5 = arith.constant 6.400000e+01 : f32
    %7 = vector.broadcast %cst_5 : f32 to vector<32x1xf32>
    %8 = arith.divf %6, %7 : vector<32x1xf32>
    %9 = vector.broadcast %8 : vector<32x1xf32> to vector<32x64xf32>
    %10 = arith.subf %0, %9 : vector<32x64xf32>
    %11 = arith.mulf %10, %10 : vector<32x64xf32>
    %cst_6 = arith.constant dense<0.000000e+00> : vector<32xf32>
    %12 = vector.multi_reduction <add>, %11, %cst_6 [1] : vector<32x64xf32> to vector<32xf32>
    %13 = vector.shape_cast %12 : vector<32xf32> to vector<32x1xf32>
    %cst_7 = arith.constant 6.400000e+01 : f32
    %14 = vector.broadcast %cst_7 : f32 to vector<32x1xf32>
    %15 = arith.divf %13, %14 : vector<32x1xf32>
    %16 = vector.broadcast %8 : vector<32x1xf32> to vector<32x64xf32>
    %17 = arith.subf %0, %16 : vector<32x64xf32>
    %cst_8 = arith.constant 9.99999974E-6 : f32
    %18 = vector.broadcast %cst_8 : f32 to vector<32x1xf32>
    %19 = arith.addf %15, %18 : vector<32x1xf32>
    %20 = math.rsqrt %19 : vector<32x1xf32>
    %21 = vector.broadcast %20 : vector<32x1xf32> to vector<32x64xf32>
    %22 = arith.mulf %17, %21 : vector<32x64xf32>
    %23 = vector.shape_cast %2 : vector<64xf32> to vector<1x64xf32>
    %24 = vector.broadcast %23 : vector<1x64xf32> to vector<32x64xf32>
    %25 = arith.mulf %22, %24 : vector<32x64xf32>
    %26 = vector.shape_cast %4 : vector<64xf32> to vector<1x64xf32>
    %27 = vector.broadcast %26 : vector<1x64xf32> to vector<32x64xf32>
    %28 = arith.addf %25, %27 : vector<32x64xf32>
    %c0_9 = arith.constant 0 : index
    %c0_10 = arith.constant 0 : index
    %29 = vector.load %arg4[%c0_9, %c0_10] : memref<64x32xf32, #tpu.memory_space<vmem>>, vector<64x32xf32>
    %cst_11 = arith.constant dense<0.000000e+00> : vector<32x32xf32>
    %30 = tpu.matmul %28, %29, %cst_11 {dimension_numbers = #tpu.dot_dimension_numbers<[1], [0], [0], [1], [0, 0, 1, 1], [], []>} : vector<32x64xf32>, vector<64x32xf32>, vector<32x32xf32> -> vector<32x32xf32>
    %c0_12 = arith.constant 0 : index
    %c0_13 = arith.constant 0 : index
    %31 = vector.load %arg5[%c0_12, %c0_13] : memref<32x32xf32, #tpu.memory_space<vmem>>, vector<32x32xf32>
    tpu.vector_store %arg5[%c0_12, %c0_13], %30 {strides = array<i32>} : memref<32x32xf32, #tpu.memory_space<vmem>>, vector<32x32xf32>,
    return
  }
  func.func @transform_0(%arg0: i32) -> (i32, i32) {
    %c0_i32 = arith.constant 0 : i32
    %c0_i32_0 = arith.constant 0 : i32
    %c0_i32_1 = arith.constant 0 : i32
    return %c0_i32, %c0_i32_0 : i32, i32
  }
  func.func @transform_1(%arg0: i32) -> (i32, i32) {
    %c0_i32 = arith.constant 0 : i32
    %c0_i32_0 = arith.constant 0 : i32
    %c0_i32_1 = arith.constant 0 : i32
    return %c0_i32, %c0_i32_0 : i32, i32
  }
  func.func @transform_2(%arg0: i32) -> (i32, i32) {
    %c0_i32 = arith.constant 0 : i32
    %c0_i32_0 = arith.constant 0 : i32
    %c0_i32_1 = arith.constant 0 : i32
    return %c0_i32, %c0_i32_0 : i32, i32
  }
  func.func @transform_3(%arg0: i32) -> (i32, i32) {
    %c0_i32 = arith.constant 0 : i32
    %c0_i32_0 = arith.constant 0 : i32
    %c0_i32_1 = arith.constant 0 : i32
    return %c0_i32, %c0_i32_0 : i32, i32
  }
  func.func @transform_4(%arg0: i32) -> (i32, i32) {
    %c0_i32 = arith.constant 0 : i32
    %c0_i32_0 = arith.constant 0 : i32
    %c0_i32_1 = arith.constant 0 : i32
    return %c0_i32, %c0_i32_0 : i32, i32
  }
}

</mosaic_0001>

<bundles_post_ra>
// kernel: basic_block_forward.5
= control target key start
LH: loop header
LB: loop body
LE: loop exit
PB: predicated region body
PF: predicated region fallthrough
CT: control target
= control target key end

     0   :  { %vm24_vm0 = vcmask 523264   ;;  %s437_s0 = inlined_call_operand.vmem [shape: f32[32,64], index: 0, kind: input, shape index: {}]   ;;  %s438_s1 = inlined_call_operand.vmem [shape: f32[1,64], index: 1, kind: input, shape index: {}]   ;;  %s439_s2 = inlined_call_operand.vmem [shape: f32[1,64], index: 2, kind: input, shape index: {}]   ;;  %s440_s3 = inlined_call_operand.vmem [shape: f32[64,32], index: 3, kind: input, shape index: {}]   ;;  %s441_s4 = inlined_call_operand.hbm [shape: f32[32,32], index: 4, kind: output, shape index: {}]  }
   0x1   :  { %v18_v0 = vld [vmem:[%s437_s0] sm:$0xff]  ;;  %v19_v1 = vld [vmem:[%s437_s0 + $0x8] sm:$0xff]  ;;  %v20_v2 = vld [vmem:[%s437_s0 + $0x10] sm:$0xff] }
   0x2   :  { %v25_v3 = vsel %vm24_vm0, %v18_v0, 0.0  ;;  %v28_v4 = vsel %vm24_vm0, %v19_v1, 0.0  ;;  %v21_v5 = vld [vmem:[%s437_s0 + $0x18] sm:$0xff] }
   0x3   :  { %9 = vsyncpa [#allocation3], 0  ;;  %26 = vadd.xlane.f32.xlu0 %v25_v3  ;;  %29 = vadd.xlane.f32.xlu1 %v28_v4  ;;  %v31_v6 = vsel %vm24_vm0, %v20_v2, 0.0  ;;  %v34_v7 = vsel %vm24_vm0, %v21_v5, 0.0  ;;  %v98_v28 = vld [vmem:[%s440_s3] sm:$0xff]  ;;  %v99_v29 = vld [vmem:[%s440_s3 + $0x8] sm:$0xff] }
   0x4   :  { %v264_v30 = vpack.c.bf16 %v99_v29, %v98_v28  ;;  %v100_v31 = vld [vmem:[%s440_s3 + $0x10] sm:$0xff]  ;;  %v101_v32 = vld [vmem:[%s440_s3 + $0x18] sm:$0xff]  ;;  %v102_v34 = vld [vmem:[%s440_s3 + $0x20] sm:$0xff]  ;;  %vm203_vm1 = vcmask 261120  }
   0x5   :  { %v268_v33 = vpack.c.bf16 %v101_v32, %v100_v31  ;;  %v103_v35 = vld [vmem:[%s440_s3 + $0x28] sm:$0xff]  ;;  %v104_v37 = vld [vmem:[%s440_s3 + $0x30] sm:$0xff]  ;;  %v105_v38 = vld [vmem:[%s440_s3 + $0x38] sm:$0xff] }
   0x6   :  { %265 = vmatprep.subr.bf16.mxu0 %v264_v30  ;;  %280 = vmatprep.subr.bf16.mxu1 %v264_v30  ;;  %v272_v36 = vpack.c.bf16 %v103_v35, %v102_v34  ;;  %v276_v39 = vpack.c.bf16 %v105_v38, %v104_v37  ;;  %v224_v53 = vld [vmem:[%s438_s1] ss:$0 sm:$0xff]  ;;  %s323_s1 = smov [#allocation2]  }
   0x7   :  { %32 = vadd.xlane.f32.xlu0 %v31_v6  ;;  %35 = vadd.xlane.f32.xlu1 %v34_v7  ;;  %v225_v55 = vld [vmem:[%s439_s2] ss:$0 sm:$0xff]  ;;  %s213_s2 = sshll.u32 %s323_s1, 4  ;;  %s214_s2 = int_to_ptr.vmem [resolvable:$true] %s213_s2 }
   0x8   :  { %267 = vmatpush3.bf16.msra.mxu0 %v264_v30  ;;  %284 = vmatpush3.bf16.msra.mxu1 %v264_v30  ;;  %s299_s15 = scalar_lea.vmem %s214_s2, 512  ;;  %p304_p1 = scmp.lt.s32.totalorder %s214_s2, %s214_s2 }
   0x9   :  { %269 = vmatprep.subr.bf16.mxu0 %v268_v33  ;;  %281 = vmatprep.subr.bf16.mxu1 %v268_v33  ;;  %p300_p0 = scmp.ne.s32.totalorder %s214_s2, %s299_s15  ;;  %p305_p2 = scmp.lt.s32.totalorder %s299_s15, %s299_s15 }
   0xb   :  { %p306_p3 = por %p305_p2, %p304_p1 }
   0xc   :  { %271 = vmatpush3.bf16.msra.mxu0 %v268_v33  ;;  %285 = vmatpush3.bf16.msra.mxu1 %v268_v33 }
   0xd   :  { %273 = vmatprep.subr.bf16.mxu0 %v272_v36  ;;  %282 = vmatprep.subr.bf16.mxu1 %v272_v36  ;;  %p307_p4 = pnand %p306_p3, %p300_p0 }
  0x10   :  { %275 = vmatpush3.bf16.msra.mxu0 %v272_v36  ;;  %286 = vmatpush3.bf16.msra.mxu1 %v272_v36 }
  0x11   :  { %277 = vmatprep.subr.bf16.mxu0 %v276_v39  ;;  %283 = vmatprep.subr.bf16.mxu1 %v276_v39 }
  0x14   :  { %279 = vmatpush3.bf16.msra.mxu0 %v276_v39  ;;  %287 = vmatpush3.bf16.msra.mxu1 %v276_v39 }
  0x90   :  { %v27_v8 = vpop.xlane.xlu0 %26  ;;  %v30_v9 = vpop.xlane.xlu1 %29 }
  0x91   :  { %v38_v10 = vmul.f32 0.015625, %v27_v8  ;;  %v39_v11 = vmul.f32 0.015625, %v30_v9 }
  0x93   :  { %v367_v12 = vsub.f32 %v18_v0, %v38_v10  ;;  %v369_v13 = vsub.f32 %v19_v1, %v39_v11 }
  0x94   :  { %v33_v14 = vpop.xlane.xlu0 %32  ;;  %v36_v15 = vpop.xlane.xlu1 %35 }
  0x95   :  { %v40_v16 = vmul.f32 0.015625, %v33_v14  ;;  %v41_v17 = vmul.f32 0.015625, %v36_v15  ;;  %v46_v18 = vmul.f32 %v367_v12, %v367_v12  ;;  %v47_v19 = vmul.f32 %v369_v13, %v369_v13 }
  0x97   :  { %v375_v20 = vsub.f32 %v20_v2, %v40_v16  ;;  %v377_v21 = vsub.f32 %v21_v5, %v41_v17  ;;  %v50_v22 = vsel %vm24_vm0, %v46_v18, 0.0  ;;  %v53_v23 = vsel %vm24_vm0, %v47_v19, 0.0 }
  0x98   :  { %51 = vadd.xlane.f32.xlu0 %v50_v22 }
  0x99   :  { %v48_v24 = vmul.f32 %v375_v20, %v375_v20  ;;  %v49_v25 = vmul.f32 %v377_v21, %v377_v21 }
  0x9b   :  { %v56_v26 = vsel %vm24_vm0, %v48_v24, 0.0  ;;  %v59_v27 = vsel %vm24_vm0, %v49_v25, 0.0 }
  0x9c   :  { %54 = vadd.xlane.f32.xlu0 %v53_v23  ;;  %57 = vadd.xlane.f32.xlu1 %v56_v26 }
  0xa0   :  { %60 = vadd.xlane.f32.xlu1 %v59_v27 }
 0x125   :  { %v52_v40 = vpop.xlane.xlu0 %51 }
 0x126   :  { %v62_v41 = vmul.f32 0.015625, %v52_v40 }
 0x128   :  { %v66_v42 = vadd.f32 1e-05, %v62_v41 }
 0x129   :  { %v58_v43 = vpop.xlane.xlu1 %57  ;;  %v55_v44 = vpop.xlane.xlu0 %54 }
 0x12a   :  { %291 = vrsqrt.f32 %v66_v42  ;;  %v64_v45 = vmul.f32 0.015625, %v58_v43  ;;  %v63_v46 = vmul.f32 0.015625, %v55_v44 }
 0x12c   :  { %v68_v47 = vadd.f32 1e-05, %v64_v45  ;;  %v67_v48 = vadd.f32 1e-05, %v63_v46 }
 0x12d   :  { %v61_v49 = vpop.xlane.xlu1 %60 }
 0x12e   :  { %293 = vrsqrt.f32 %v68_v47  ;;  %v65_v50 = vmul.f32 0.015625, %v61_v49 }
 0x12f   :  { %295 = vrsqrt.f32 %v67_v48 }
 0x130   :  { %v69_v51 = vadd.f32 1e-05, %v65_v50 }
 0x132   :  { %297 = vrsqrt.f32 %v69_v51 }
 0x134   :  { %v292_v52 = vpop.eup %291 }
 0x135   :  { %v74_v54 = vmul.f32 %v292_v52, %v367_v12 }
 0x137   :  { %v84_v56 = vmul.f32 %v224_v53, %v74_v54 }
 0x138   :  { %v294_v57 = vpop.eup %293 }
 0x139   :  { %v296_v58 = vpop.eup %295  ;;  %v94_v59 = vadd.f32 %v225_v55, %v84_v56  ;;  %v76_v60 = vmul.f32 %v294_v57, %v375_v20 }
 0x13a   :  { %v75_v61 = vmul.f32 %v296_v58, %v369_v13 }
 0x13b   :  { %258 = vmatprep.mubr.msk.f32.mxu0 %vm24_vm0, %v94_v59  ;;  %v86_v62 = vmul.f32 %v224_v53, %v76_v60 }
 0x13c   :  { %v298_v63 = vpop.eup %297  ;;  %v85_v0 = vmul.f32 %v224_v53, %v75_v61 }
 0x13d   :  { %v96_v1 = vadd.f32 %v225_v55, %v86_v62  ;;  %v77_v2 = vmul.f32 %v298_v63, %v377_v21 }
 0x13e   :  { %v95_v3 = vadd.f32 %v225_v55, %v85_v0 }
 0x13f   :  { %261 = vmatprep.mubr.msk.f32.mxu1 %vm24_vm0, %v96_v1  ;;  %v87_v4 = vmul.f32 %v224_v53, %v77_v2 }
 0x140   :  { %259 = vmatmul.mubr.msk.f32.vlgmr.msra.gmra.mrb[0].mxu0 %vm24_vm0, %v95_v3 }
 0x141   :  { %v97_v5 = vadd.f32 %v225_v55, %v87_v4 }
 0x143   :  { %262 = vmatmul.mubr.msk.f32.vlgmr.msra.gmra.mrb[0].mxu1 %vm24_vm0, %v97_v5 }
 0x213   :  { %v260_v6 = vpop.f32.mrb[0].mxu0 }
 0x214   :  { %205 = vst.msk [vmem:[#allocation2 + $0x8] sm:$0xff] %vm203_vm1, %v260_v6  ;;  %v184_v7 = vpop.f32.mrb[1].mxu0 }
 0x215   :  { %204 = vst.msk [vmem:[#allocation2] sm:$0xff] %vm203_vm1, %v184_v7 }
 0x216   :  { %v263_v8 = vpop.f32.mrb[0].mxu1 }
 0x217   :  { %207 = vst.msk [vmem:[#allocation2 + $0x18] sm:$0xff] %vm203_vm1, %v263_v8  ;;  %v194_v9 = vpop.f32.mrb[1].mxu1 }
 0x218   :  { %206 = vst.msk [vmem:[#allocation2 + $0x10] sm:$0xff] %vm203_vm1, %v194_v9 }
 0x219   :  { %310 = shalt.err (!%p307_p4)
}
 0x21a   :  { %s311_s18 = scalar_lea.hbm %s441_s4, 512 }
 0x21b   :  { %p312_p5 = scmp.ne.s32.totalorder %s441_s4, %s311_s18  ;;  %p315_p6 = scmp.lt.u32.totalorder %s311_s18, %s441_s4 }
 0x21d   :  { %p317_p7 = pnand %p315_p6, %p312_p5 }
 0x21f   :  { %320 = shalt.err (!%p317_p7)
}
 0x220   :  { %s324_s0 = smov 128   ;;  %s325_s23 = smov 8  }
 0x221   :  { %219 = dma.vmem_to_hbm [thread:$0]  %s214_s2, 512, %s441_s4, [#allocation3], %s324_s0, %s324_s0, %s325_s23  }
 0x222   :  { %321 = dma.done.wait [#allocation3], 512  }
 0x223   :  { %322 = vsyncadd [#allocation3], 4294966784 }
 0x224   :  { %223 = vsyncpa [#allocation3], 1 }

// kernel: basic_block_forward.3
= control target key start
LH: loop header
LB: loop body
LE: loop exit
PB: predicated region body
PF: predicated region fallthrough
CT: control target
= control target key end

     0   :  { %s5527_s0 = inlined_call_operand.vmem [shape: f32[128,16], index: 0, kind: input, shape index: {}]   ;;  %s5528_s1 = inlined_call_operand.vmem [shape: f32[128,16], index: 1, kind: input, shape index: {}]   ;;  %s5529_s2 = inlined_call_operand.vmem [shape: f32[2,16,16], index: 2, kind: input, shape index: {}]   ;;  %s5530_s3 = inlined_call_operand.vmem [shape: f32[1,16], index: 3, kind: input, shape index: {}]   ;;  %s5531_s4 = inlined_call_operand.vmem [shape: f32[1,16], index: 4, kind: input, shape index: {}]   ;;  %s5532_s5 = inlined_call_operand.vmem [shape: f32[2,16,8], index: 5, kind: input, shape index: {}]   ;;  %s5533_s6 = inlined_call_operand.vmem [shape: f32[2,1,8], index: 6, kind: input, shape index: {}]   ;;  %s5534_s7 = inlined_call_operand.vmem [shape: f32[2,16,8], index: 7, kind: input, shape index: {}]   ;;  %s5535_s8 = inlined_call_operand.vmem [shape: f32[2,1,8], index: 8, kind: input, shape index: {}]   ;;  %s5536_s9 = inlined_call_operand.vmem [shape: f32[2,16,8], index: 9, kind: input, shape index: {}]   ;;  %s5537_s10 = inlined_call_operand.vmem [shape: f32[2,1,8], index: 10, kind: input, shape index: {}]   ;;  %s5538_s11 = inlined_call_operand.vmem [shape: f32[2,8,16], index: 11, kind: input, shape index: {}]   ;;  %s5539_s12 = inlined_call_operand.vmem [shape: f32[1,16], index: 12, kind: input, shape index: {}]   ;;  %s5540_s13 = inlined_call_operand.vmem [shape: f32[1,16], index: 13, kind: input, shape index: {}]   ;;  %s5541_s14 = inlined_call_operand.vmem [shape: f32[1,16], index: 14, kind: input, shape index: {}]   ;;  %s5542_s15 = inlined_call_operand.vmem [shape: f32[16,64], index: 15, kind: input, shape index: {}]   ;;  %s5543_s16 = inlined_call_operand.vmem [shape: f32[1,64], index: 16, kind: input, shape index: {}]   ;;  %s5544_s17 = inlined_call_operand.vmem [shape: f32[64,16], index: 17, kind: input, shape index: {}]   ;;  %s5545_s18 = inlined_call_operand.vmem [shape: f32[1,16], index: 18, kind: input, shape index: {}]   ;;  %s5546_s19 = inlined_call_operand.vmem [shape: f32[128,16], index: 19, kind: output, shape index: {}]  }
   0x1   :  { %5548 = sst [smem:[#allocation2_spill]] %s5527_s0  ;;  %s4876_s0 = smov 0  }
   0x2   :  { %5549 = sst [smem:[#allocation3_spill]] %s5528_s1 }
   0x3   :  { %5550 = sst [smem:[#allocation4_spill]] %s5529_s2 }
   0x4   :  { %5551 = sst [smem:[#allocation5_spill]] %s5530_s3 }
   0x5 LB: > { %s3894_s30 = sadd.s32 4294967295, %s4774_s0   ;;  %p3898_p0 = scmp.ge.s32.totalorder %s4774_s0, 1  ;;  %s4774_s0 = sphi %s4876_s0, %s29_s0  }
   0x6   : > { %p549_p1 = scmp.lt.s32.totalorder %s4774_s0, 3 }
   0x8   : > { %p550_p2 = pnand %p3898_p0, %p549_p1 }
   0x9   : > { %s3899_s20 = sshll.u32 (!%p550_p2), %s3894_s30, 3  ;;  %vm646_vm0 = vcmask (!%p550_p2), 130048   ;;  %s5552_s2 = sld [smem:[#allocation2_spill]] (!%p550_p2)  ;;  %v780_v56 = vld [vmem:[%s5532_s5] sm:$0xff] (!%p550_p2)  ;;  %v781_v57 = vld [vmem:[%s5532_s5 + $0x8] sm:$0xff] (!%p550_p2)  ;;  %vm1172_vm1 = vcmask (!%p550_p2), 64512  }
   0xa   : > { %553 = sbr.rel (%p550_p2) target bundleno = 3100 (0xc1c), region = 96  ;;  %p611_p3 = scmp.lt.s32.totalorder (!%p550_p2), %s3899_s20, 15  ;;  %v4508_v58 = vpack.c.bf16 (!%p550_p2), %v781_v57, %v780_v56  ;;  %vm5087_vm2 = vmpackc.low (!%p550_p2), %vm1172_vm1, %vm1172_vm1  ;;  %vm3665_vm3 = vcmask (!%p550_p2), 523264  }
   0xb   : > { %s5553_s29 = sld [smem:[#allocation3_spill]] (!%p550_p2)  ;;  %s5557_s28 = sld [smem:[#allocation4_spill]] (!%p550_p2) }
   0xc   : > { %4509 = vmatprep.subr.bf16.mxu0 (!%p550_p2), %v4508_v58 }
   0xd   : > { %4511 = vmatpush3.bf16.msra.mxu0 (!%p550_p2), %v4508_v58 }
  0x11   : > { %s5559_s20 = smov (!%p611_p3, %s3899_s20), 15 }
  0x12   : > { %s4884_s21 = sshll.u32 %s5559_s20, 3 }
  0x13   : > { %s4890_s23 = scalar_lea.vmem %s5552_s2, %s4884_s21  ;;  %s620_s30 = scalar_lea.vmem %s5553_s29, %s4884_s21 }
  0x14   : > { %v628_v0 = vld [vmem:[%s4890_s23] sm:$0xff]  ;;  %v630_v1 = vld [vmem:[%s4890_s23 + $0x10] sm:$0xff]  ;;  %v629_v2 = vld [vmem:[%s4890_s23 + $0x8] sm:$0xff]  ;;  %s5554_s29 = sld [smem:[#allocation5_spill]]  ;;  %s626_s20 = scalar_lea.vmem %s5546_s19, %s4884_s21 }
  0x15   : > { %v647_v3 = vsel %vm646_vm0, %v628_v0, 0.0  ;;  %v653_v4 = vsel %vm646_vm0, %v630_v1, 0.0  ;;  %v631_v5 = vld [vmem:[%s4890_s23 + $0x18] sm:$0xff]  ;;  %v650_v6 = vsel %vm646_vm0, %v629_v2, 0.0  ;;  %v632_v8 = vld [vmem:[%s4890_s23 + $0x20] sm:$0xff]  ;;  %v633_v9 = vld [vmem:[%s4890_s23 + $0x28] sm:$0xff] }
  0x16   : > { %648 = vadd.xlane.f32.xlu0 %v647_v3  ;;  %654 = vadd.xlane.f32.xlu1 %v653_v4  ;;  %v656_v7 = vsel %vm646_vm0, %v631_v5, 0.0  ;;  %v659_v10 = vsel %vm646_vm0, %v632_v8, 0.0  ;;  %v662_v11 = vsel %vm646_vm0, %v633_v9, 0.0  ;;  %v634_v12 = vld [vmem:[%s4890_s23 + $0x30] sm:$0xff]  ;;  %v635_v13 = vld [vmem:[%s4890_s23 + $0x38] sm:$0xff]  ;;  %v4958_v59 = vld [vmem:[%s620_s30] sm:$0xff] }
  0x17   : > { %v665_v14 = vsel %vm646_vm0, %v634_v12, 0.0  ;;  %v668_v15 = vsel %vm646_vm0, %v635_v13, 0.0  ;;  %4232 = vmatprep.mubr.msk.f32.mxu0 %vm646_vm0, %v4958_v59  ;;  %v4962_v60 = vld [vmem:[%s620_s30 + $0x8] sm:$0xff]  ;;  %v4966_v61 = vld [vmem:[%s620_s30 + $0x10] sm:$0xff]  ;;  %v4970_v62 = vld [vmem:[%s620_s30 + $0x18] sm:$0xff] }
  0x18   : > { %4233 = vmatmul.mubr.msk.f32.vlgmr.msra.gmra.mrb[0].mxu0 %vm646_vm0, %v4962_v60  ;;  %v4974_v63 = vld [vmem:[%s620_s30 + $0x20] sm:$0xff]  ;;  %v919_v3 = vld [vmem:[%s5534_s7 + $0x8] sm:$0xff]  ;;  %v4992_v4 = vld [vmem:[%s620_s30 + $0x38] sm:$0xff] }
  0x19   : > { %4235 = vmatprep.mubr.msk.f32.mxu0 %vm646_vm0, %v4966_v61 }
  0x1a   : > { %651 = vadd.xlane.f32.xlu0 %v650_v6  ;;  %657 = vadd.xlane.f32.xlu1 %v656_v7  ;;  %v1056_v6 = vld [vmem:[%s5536_s9] sm:$0xff]  ;;  %v1057_v7 = vld [vmem:[%s5536_s9 + $0x8] sm:$0xff] }
  0x1c   : > { %4236 = vmatmul.mubr.msk.f32.gmra.mrb[2].mxu0 %vm646_vm0, %v4970_v62 }
  0x1d   : > { %4238 = vmatprep.mubr.msk.f32.mxu0 %vm646_vm0, %v4974_v63 }
  0x1e   : > { %660 = vadd.xlane.f32.xlu0 %v659_v10  ;;  %663 = vadd.xlane.f32.xlu1 %v662_v11 }
  0x22   : > { %666 = vadd.xlane.f32.xlu0 %v665_v14  ;;  %669 = vadd.xlane.f32.xlu1 %v668_v15 }
  0xa3   : > { %v649_v16 = vpop.xlane.xlu0 %648  ;;  %v655_v17 = vpop.xlane.xlu1 %654 }
  0xa4   : > { %v672_v18 = vmul.f32 0.0625, %v649_v16  ;;  %v674_v19 = vmul.f32 0.0625, %v655_v17 }
  0xa6   : > { %v4908_v20 = vsub.f32 %v628_v0, %v672_v18  ;;  %v4910_v21 = vsub.f32 %v630_v1, %v674_v19  ;;  %v4978_v0 = vld [vmem:[%s620_s30 + $0x28] sm:$0xff]  ;;  %v4982_v1 = vld [vmem:[%s620_s30 + $0x30] sm:$0xff] }
  0xa7   : > { %v652_v22 = vpop.xlane.xlu0 %651  ;;  %v658_v23 = vpop.xlane.xlu1 %657  ;;  %4239 = vmatmul.mubr.msk.f32.gmra.mrb[4].mxu0 %vm646_vm0, %v4978_v0 }
  0xa8   : > { %v673_v24 = vmul.f32 0.0625, %v652_v22  ;;  %v675_v25 = vmul.f32 0.0625, %v658_v23  ;;  %v688_v26 = vmul.f32 %v4908_v20, %v4908_v20  ;;  %v690_v27 = vmul.f32 %v4910_v21, %v4910_v21  ;;  %4241 = vmatprep.mubr.msk.f32.mxu0 %vm646_vm0, %v4982_v1 }
  0xaa   : > { %v4916_v28 = vsub.f32 %v629_v2, %v673_v24  ;;  %v4918_v29 = vsub.f32 %v631_v5, %v675_v25  ;;  %v696_v30 = vsel %vm646_vm0, %v688_v26, 0.0  ;;  %v702_v33 = vsel %vm646_vm0, %v690_v27, 0.0  ;;  %v918_v2 = vld [vmem:[%s5534_s7] sm:$0xff] }
  0xab   : > { %697 = vadd.xlane.f32.xlu0 %v696_v30  ;;  %v661_v31 = vpop.xlane.xlu0 %660  ;;  %v664_v32 = vpop.xlane.xlu1 %663  ;;  %v4512_v5 = vpack.c.bf16 %v919_v3, %v918_v2  ;;  %4242 = vmatmul.mubr.msk.f32.gmra.mrb[6].mxu0 %vm646_vm0, %v4992_v4 }
  0xac   : > { %v676_v34 = vmul.f32 0.0625, %v661_v31  ;;  %v677_v35 = vmul.f32 0.0625, %v664_v32  ;;  %v689_v36 = vmul.f32 %v4916_v28, %v4916_v28  ;;  %v691_v37 = vmul.f32 %v4918_v29, %v4918_v29 }
  0xad   : > { %4513 = vmatprep.subr.bf16.mxu1 %v4512_v5 }
  0xae   : > { %v4926_v38 = vsub.f32 %v632_v8, %v676_v34  ;;  %v4928_v39 = vsub.f32 %v633_v9, %v677_v35  ;;  %v699_v40 = vsel %vm646_vm0, %v689_v36, 0.0  ;;  %v705_v43 = vsel %vm646_vm0, %v691_v37, 0.0  ;;  %4515 = vmatpush3.bf16.msra.mxu1 %v4512_v5  ;;  %v3905_v35 = vld [vmem:[%s5554_s29] ss:$0 sm:$0xff] }
  0xaf   : > { %703 = vadd.xlane.f32.xlu0 %v702_v33  ;;  %700 = vadd.xlane.f32.xlu1 %v699_v40  ;;  %v667_v41 = vpop.xlane.xlu0 %666  ;;  %v670_v42 = vpop.xlane.xlu1 %669  ;;  %v4516_v8 = vpack.c.bf16 %v1057_v7, %v1056_v6 }
  0xb0   : > { %v678_v44 = vmul.f32 0.0625, %v667_v41  ;;  %v679_v45 = vmul.f32 0.0625, %v670_v42  ;;  %v692_v46 = vmul.f32 %v4926_v38, %v4926_v38  ;;  %v693_v47 = vmul.f32 %v4928_v39, %v4928_v39  ;;  %v3906_v41 = vld [vmem:[%s5531_s4] ss:$0 sm:$0xff] }
  0xb1   : > { %4517 = vmatprep.subr.bf16.mxu0 %v4516_v8 }
  0xb2   : > { %v4936_v48 = vsub.f32 %v634_v12, %v678_v44  ;;  %v4938_v49 = vsub.f32 %v635_v13, %v679_v45  ;;  %v708_v50 = vsel %vm646_vm0, %v692_v46, 0.0  ;;  %v711_v51 = vsel %vm646_vm0, %v693_v47, 0.0  ;;  %4519 = vmatpush3.bf16.msra.mxu0 %v4516_v8 }
  0xb3   : > { %706 = vadd.xlane.f32.xlu1 %v705_v43  ;;  %709 = vadd.xlane.f32.xlu0 %v708_v50 }
  0xb4   : > { %v694_v52 = vmul.f32 %v4936_v48, %v4936_v48  ;;  %v695_v53 = vmul.f32 %v4938_v49, %v4938_v49 }
  0xb6   : > { %v714_v54 = vsel %vm646_vm0, %v694_v52, 0.0  ;;  %v717_v55 = vsel %vm646_vm0, %v695_v53, 0.0 }
  0xb7   : > { %712 = vadd.xlane.f32.xlu1 %v711_v51  ;;  %715 = vadd.xlane.f32.xlu0 %v714_v54 }
  0xbb   : > { %718 = vadd.xlane.f32.xlu1 %v717_v55 }
 0x138   : > { %v698_v9 = vpop.xlane.xlu0 %697 }
 0x139   : > { %v720_v10 = vmul.f32 0.0625, %v698_v9 }
 0x13b   : > { %v728_v11 = vadd.f32 1e-05, %v720_v10 }
 0x13c   : > { %v701_v12 = vpop.xlane.xlu1 %700  ;;  %v704_v13 = vpop.xlane.xlu0 %703 }
 0x13d   : > { %4648 = vrsqrt.f32 %v728_v11  ;;  %v721_v14 = vmul.f32 0.0625, %v701_v12  ;;  %v722_v15 = vmul.f32 0.0625, %v704_v13  ;;  %v4234_v12 = vpop.f32.mrb[0].mxu0 }
 0x13f   : > { %v729_v16 = vadd.f32 1e-05, %v721_v14  ;;  %v730_v17 = vadd.f32 1e-05, %v722_v15  ;;  %v879_v14 = vpop.f32.mrb[1].mxu0 }
 0x140   : > { %v707_v18 = vpop.xlane.xlu1 %706  ;;  %v710_v19 = vpop.xlane.xlu0 %709 }
 0x141   : > { %4650 = vrsqrt.f32 %v729_v16  ;;  %v723_v22 = vmul.f32 0.0625, %v707_v18  ;;  %v724_v23 = vmul.f32 0.0625, %v710_v19  ;;  %v4237_v15 = vpop.f32.mrb[2].mxu0 }
 0x142   : > { %4652 = vrsqrt.f32 %v730_v17  ;;  %v889_v17 = vpop.f32.mrb[3].mxu0 }
 0x143   : > { %v731_v24 = vadd.f32 1e-05, %v723_v22  ;;  %v732_v25 = vadd.f32 1e-05, %v724_v23 }
 0x144   : > { %v713_v26 = vpop.xlane.xlu1 %712  ;;  %v716_v27 = vpop.xlane.xlu0 %715 }
 0x145   : > { %4654 = vrsqrt.f32 %v731_v24  ;;  %v725_v30 = vmul.f32 0.0625, %v713_v26  ;;  %v726_v31 = vmul.f32 0.0625, %v716_v27 }
 0x146   : > { %4656 = vrsqrt.f32 %v732_v25 }
 0x147   : > { %v4649_v32 = vpop.eup %4648  ;;  %v733_v33 = vadd.f32 1e-05, %v725_v30  ;;  %v734_v34 = vadd.f32 1e-05, %v726_v31 }
 0x148   : > { %v719_v36 = vpop.xlane.xlu1 %718  ;;  %v744_v37 = vmul.f32 %v4649_v32, %v4908_v20  ;;  %v3916_v32 = vld [vmem:[%s5535_s8] ss:$0 sm:$0xff] }
 0x149   : > { %4658 = vrsqrt.f32 %v733_v33  ;;  %v727_v40 = vmul.f32 0.0625, %v719_v36  ;;  %v3925_v33 = vld [vmem:[%s5537_s10] ss:$0 sm:$0xff] }
 0x14a   : > { %4660 = vrsqrt.f32 %v734_v34  ;;  %v758_v42 = vmul.f32 %v3905_v35, %v744_v37 }
 0x14b   : > { %v4651_v43 = vpop.eup %4650  ;;  %v735_v44 = vadd.f32 1e-05, %v727_v40 }
 0x14c   : > { %v4653_v45 = vpop.eup %4652  ;;  %v5009_v46 = vadd.f32 %v3906_v41, %v758_v42  ;;  %v745_v47 = vmul.f32 %v4651_v43, %v4916_v28 }
 0x14d   : > { %4662 = vrsqrt.f32 %v735_v44  ;;  %v746_v50 = vmul.f32 %v4653_v45, %v4910_v21 }
 0x14e   : > { %4248 = vmatprep.mubr.msk.f32.mxu1 %vm646_vm0, %v5009_v46  ;;  %4264 = vmatprep.mubr.msk.f32.mxu0 %vm646_vm0, %v5009_v46  ;;  %v759_v20 = vmul.f32 %v3905_v35, %v745_v47 }
 0x14f   : > { %v4655_v51 = vpop.eup %4654  ;;  %v760_v52 = vmul.f32 %v3905_v35, %v746_v50 }
 0x150   : > { %v4657_v53 = vpop.eup %4656  ;;  %v5017_v54 = vadd.f32 %v3906_v41, %v759_v20  ;;  %v747_v55 = vmul.f32 %v4655_v51, %v4918_v29 }
 0x151   : > { %v5020_v56 = vadd.f32 %v3906_v41, %v760_v52  ;;  %v748_v28 = vmul.f32 %v4657_v53, %v4926_v38 }
 0x152   : > { %4249 = vmatmul.mubr.msk.f32.vlgmr.msra.gmra.mrb[0].mxu1 %vm646_vm0, %v5017_v54  ;;  %4265 = vmatmul.mubr.msk.f32.vlgmr.msra.gmra.mrb[8].mxu0 %vm646_vm0, %v5017_v54  ;;  %v761_v21 = vmul.f32 %v3905_v35, %v747_v55 }
 0x153   : > { %v4659_v57 = vpop.eup %4658  ;;  %4251 = vmatprep.mubr.msk.f32.mxu1 %vm646_vm0, %v5020_v56  ;;  %4267 = vmatprep.mubr.msk.f32.mxu0 %vm646_vm0, %v5020_v56  ;;  %v762_v58 = vmul.f32 %v3905_v35, %v748_v28 }
 0x154   : > { %v4661_v29 = vpop.eup %4660  ;;  %v5031_v2 = vadd.f32 %v3906_v41, %v761_v21  ;;  %v749_v38 = vmul.f32 %v4659_v57, %v4928_v39 }
 0x155   : > { %v5034_v3 = vadd.f32 %v3906_v41, %v762_v58  ;;  %v750_v5 = vmul.f32 %v4661_v29, %v4936_v48 }
 0x156   : > { %4252 = vmatmul.mubr.msk.f32.gmra.mrb[2].mxu1 %vm646_vm0, %v5031_v2  ;;  %4268 = vmatmul.mubr.msk.f32.gmra.mrb[10].mxu0 %vm646_vm0, %v5031_v2  ;;  %v763_v6 = vmul.f32 %v3905_v35, %v749_v38 }
 0x157   : > { %v4663_v7 = vpop.eup %4662  ;;  %4254 = vmatprep.mubr.msk.f32.mxu1 %vm646_vm0, %v5034_v3  ;;  %4270 = vmatprep.mubr.msk.f32.mxu0 %vm646_vm0, %v5034_v3  ;;  %v764_v8 = vmul.f32 %v3905_v35, %v750_v5 }
 0x158   : > { %v5045_v39 = vadd.f32 %v3906_v41, %v763_v6  ;;  %v751_v9 = vmul.f32 %v4663_v7, %v4938_v49  ;;  %v3907_v49 = vld [vmem:[%s5533_s6] ss:$0 sm:$0xff] }
 0x159   : > { %v5048_v48 = vadd.f32 %v3906_v41, %v764_v8  ;;  %v885_v13 = vadd.f32 %v4234_v12, %v3907_v49  ;;  %v5067_v16 = vadd.f32 %v4237_v15, %v3907_v49  ;;  %v5069_v18 = vadd.f32 %v3907_v49, %v889_v17 }
 0x15a   : > { %4255 = vmatmul.mubr.msk.f32.gmra.mrb[4].mxu1 %vm646_vm0, %v5045_v39  ;;  %4271 = vmatmul.mubr.msk.f32.gmra.mrb[12].mxu0 %vm646_vm0, %v5045_v39  ;;  %v765_v10 = vmul.f32 %v3905_v35, %v751_v9  ;;  %v880_v30 = vadd.f32 %v3907_v49, %v879_v14 }
 0x15b   : > { %4257 = vmatprep.mubr.msk.f32.mxu1 %vm646_vm0, %v5048_v48  ;;  %4273 = vmatprep.mubr.msk.f32.mxu0 %vm646_vm0, %v5048_v48 }
 0x15c   : > { %v5058_v11 = vadd.f32 %v3906_v41, %v765_v10 }
 0x15e   : > { %4258 = vmatmul.mubr.msk.f32.gmra.mrb[6].mxu1 %vm646_vm0, %v5058_v11  ;;  %4274 = vmatmul.mubr.msk.f32.gmra.mrb[14].mxu0 %vm646_vm0, %v5058_v11 }
 0x15f   : > { %4280 = vmatprep.mubr.msk.f32.mxu1 %vm1172_vm1, %v880_v30 }
 0x17a   : > { %v4240_v19 = vpop.f32.mrb[4].mxu0 }
 0x17b   : > { %v5071_v22 = vadd.f32 %v4240_v19, %v3907_v49  ;;  %v899_v23 = vpop.f32.mrb[5].mxu0 }
 0x17c   : > { %v900_v31 = vadd.f32 %v3907_v49, %v899_v23 }
 0x17e   : > { %v4243_v24 = vpop.f32.mrb[6].mxu0  ;;  %4294 = vmatprep.mubr.msk.f32.mxu0 %vm1172_vm1, %v900_v31 }
 0x17f   : > { %v5073_v25 = vadd.f32 %v4243_v24, %v3907_v49  ;;  %v909_v26 = vpop.f32.mrb[7].mxu0 }
 0x180   : > { %v5075_v27 = vadd.f32 %v3907_v49, %v909_v26 }
 0x225   : > { %v4250_v34 = vpop.f32.mrb[0].mxu1  ;;  %v4266_v35 = vpop.f32.mrb[8].mxu0 }
 0x226   : > { %v1023_v36 = vadd.f32 %v4250_v34, %v3916_v32  ;;  %v1137_v37 = vadd.f32 %v4266_v35, %v3925_v33  ;;  %v1017_v40 = vpop.f32.mrb[1].mxu1  ;;  %v1131_v41 = vpop.f32.mrb[9].mxu0 }
 0x227   : > { %v1018_v42 = vadd.f32 %v3916_v32, %v1017_v40  ;;  %v1132_v43 = vadd.f32 %v3925_v33, %v1131_v41 }
 0x229   : > { %v4520_v45 = vpack.c.bf16 %v1023_v36, %v1018_v42  ;;  %v4544_v47 = vpack.c.bf16 %v1137_v37, %v1132_v43  ;;  %v4253_v50 = vpop.f32.mrb[2].mxu1  ;;  %v4269_v20 = vpop.f32.mrb[10].mxu0 }
 0x22a   : > { %v1033_v51 = vadd.f32 %v4253_v50, %v3916_v32  ;;  %v1147_v52 = vadd.f32 %v4269_v20, %v3925_v33  ;;  %v1027_v53 = vpop.f32.mrb[3].mxu1  ;;  %v1141_v55 = vpop.f32.mrb[11].mxu0 }
 0x22b   : > { %v1028_v28 = vadd.f32 %v3916_v32, %v1027_v53  ;;  %v1142_v21 = vadd.f32 %v3925_v33, %v1141_v55  ;;  %4522 = vmatprep.subr.msk.bf16.mxu1 %vm5087_vm2, %v4520_v45 }
 0x22c   : > { %4525 = vmatpush3.bf16.xpose.msk.msra.mxu1 %vm5087_vm2, %v4520_v45 }
 0x22d   : > { %v4526_v57 = vpack.c.bf16 %v1033_v51, %v1028_v28  ;;  %v4548_v58 = vpack.c.bf16 %v1147_v52, %v1142_v21  ;;  %v4256_v29 = vpop.f32.mrb[4].mxu1  ;;  %v4272_v38 = vpop.f32.mrb[12].mxu0 }
 0x22e   : > { %v1043_v5 = vadd.f32 %v4256_v29, %v3916_v32  ;;  %v1157_v6 = vadd.f32 %v4272_v38, %v3925_v33  ;;  %v1037_v7 = vpop.f32.mrb[5].mxu1  ;;  %v1151_v8 = vpop.f32.mrb[13].mxu0 }
 0x22f   : > { %v1038_v9 = vadd.f32 %v3916_v32, %v1037_v7  ;;  %v1152_v10 = vadd.f32 %v3925_v33, %v1151_v8  ;;  %4528 = vmatprep.subr.msk.bf16.mxu1 %vm5087_vm2, %v4526_v57 }
 0x231   : > { %v4532_v49 = vpack.c.bf16 %v1043_v5, %v1038_v9  ;;  %v5097_v12 = vpack.c.bf16 %v1157_v6, %v1152_v10  ;;  %v4259_v14 = vpop.f32.mrb[6].mxu1  ;;  %v4275_v15 = vpop.f32.mrb[14].mxu0 }
 0x232   : > { %v1053_v17 = vadd.f32 %v4259_v14, %v3916_v32  ;;  %v1167_v19 = vadd.f32 %v4275_v15, %v3925_v33  ;;  %v1047_v23 = vpop.f32.mrb[7].mxu1  ;;  %v1161_v24 = vpop.f32.mrb[15].mxu0 }
 0x233   : > { %v1048_v26 = vadd.f32 %v3916_v32, %v1047_v23  ;;  %v1162_v30 = vadd.f32 %v3925_v33, %v1161_v24  ;;  %4281 = vmatmul.mubr.msk.f32.vlgmr.msra.gmra.mrb[8].mxu1 %vm1172_vm1, %v885_v13  ;;  %4534 = vmatprep.subr.msk.bf16.mxu0 %vm5087_vm2, %v4532_v49  ;;  %v1170_v33 = vld [vmem:[%s5557_s28] sm:$0xff] }
 0x234   : > { %4531 = vmatpush3.bf16.xpose.msk.msra.mxu1 %vm5087_vm2, %v4526_v57  ;;  %4537 = vmatpush3.bf16.xpose.msk.msra.mxu0 %vm5087_vm2, %v4532_v49 }
 0x235   : > { %v4538_v31 = vpack.c.bf16 %v1053_v17, %v1048_v26  ;;  %v5106_v34 = vpack.c.bf16 %v1167_v19, %v1162_v30  ;;  %4545 = vmatprep.subr.bf16.mxu0 %v4544_v47  ;;  %4287 = vmatprep.mubr.msk.f32.mxu1 %vm1172_vm1, %v5069_v18  ;;  %v1171_v18 = vld [vmem:[%s5557_s28 + $0x8] sm:$0xff] }
 0x237   : > { %4540 = vmatprep.subr.msk.bf16.mxu1 %vm5087_vm2, %v4538_v31 }
 0x23b   : > { %4288 = vmatmul.mubr.msk.f32.vlgmr.msra.gmra.mrb[10].mxu1 %vm1172_vm1, %v5067_v16  ;;  %4295 = vmatmul.mubr.msk.f32.vlgmr.msra.gmra.mrb[16].mxu0 %vm1172_vm1, %v5071_v22 }
 0x23c   : > { %4543 = vmatpush3.bf16.xpose.msk.msra.mxu1 %vm5087_vm2, %v4538_v31  ;;  %4547 = vmatpush3.bf16.msra.mxu0 %v4544_v47 }
 0x23d   : > { %4549 = vmatprep.subr.bf16.mxu1 %v4548_v58  ;;  %4553 = vmatprep.subr.bf16.mxu0 %v5097_v12 }
 0x23e   : > { %4301 = vmatprep.mubr.msk.f32.mxu1 %vm1172_vm1, %v5075_v27 }
 0x243   : > { %4302 = vmatmul.mubr.msk.f32.vlgmr.msra.gmra.mrb[12].mxu1 %vm1172_vm1, %v5073_v25 }
 0x244   : > { %4551 = vmatpush3.bf16.msra.mxu1 %v4548_v58 }
 0x245   : > { %4557 = vmatprep.subr.bf16.mxu1 %v5106_v34 }
 0x306   : > { %v4282_v13 = vpop.f32.mrb[8].mxu1 }
 0x307   : > { %v1251_v16 = vpop.f32.mrb[9].mxu1  ;;  %v1257_v47 = vadd.f32 %v4282_v13, %v1171_v18 }
 0x308   : > { %v1252_v20 = vadd.f32 %v1251_v16, %v1170_v33 }
 0x309   : > { %v1524_v53 = vsel %vm646_vm0, %v1257_v47, -inf }
 0x30a   : > { %v1521_v28 = vsel %vm646_vm0, %v1252_v20, -inf }
 0x30e   : > { %v4289_v22 = vpop.f32.mrb[10].mxu1  ;;  %v4296_v32 = vpop.f32.mrb[16].mxu0 }
 0x30f   : > { %v1344_v35 = vadd.f32 %v4289_v22, %v1171_v18  ;;  %v1338_v27 = vpop.f32.mrb[11].mxu1  ;;  %v1425_v36 = vpop.f32.mrb[17].mxu0  ;;  %v1431_v52 = vadd.f32 %v4296_v32, %v1171_v18 }
 0x310   : > { %v1339_v37 = vadd.f32 %v1338_v27, %v1170_v33  ;;  %v1426_v55 = vadd.f32 %v1425_v36, %v1170_v33 }
 0x311   : > { %v1530_v25 = vsel %vm646_vm0, %v1344_v35, -inf  ;;  %v1536_v21 = vsel %vm646_vm0, %v1431_v52, -inf }
 0x312   : > { %1531 = vmax.xlane.f32.xlu1 %v1530_v25  ;;  %v1527_v40 = vsel %vm646_vm0, %v1339_v37, -inf  ;;  %v1533_v57 = vsel %vm646_vm0, %v1426_v55, -inf }
 0x313   : > { %1528 = vmax.xlane.f32.xlu0 %v1527_v40 }
 0x316   : > { %v4303_v41 = vpop.f32.mrb[12].mxu1 }
 0x317   : > { %v1518_v42 = vadd.f32 %v4303_v41, %v1171_v18  ;;  %v1512_v43 = vpop.f32.mrb[13].mxu1 }
 0x318   : > { %v1513_v45 = vadd.f32 %v1512_v43, %v1170_v33 }
 0x319   : > { %v1542_v50 = vsel %vm646_vm0, %v1518_v42, -inf }
 0x31a   : > { %1543 = vmax.xlane.f32.xlu1 %v1542_v50  ;;  %v1539_v51 = vsel %vm646_vm0, %v1513_v45, -inf }
 0x31b   : > { %1540 = vmax.xlane.f32.xlu0 %v1539_v51 }
 0x31e   : > { %1525 = vmax.xlane.f32.xlu1 %v1524_v53 }
 0x31f   : > { %1522 = vmax.xlane.f32.xlu0 %v1521_v28 }
 0x322   : > { %1537 = vmax.xlane.f32.xlu1 %v1536_v21 }
 0x323   : > { %1534 = vmax.xlane.f32.xlu0 %v1533_v57 }
 0x39f   : > { %v1532_v58 = vpop.xlane.xlu1 %1531 }
 0x3a0   : > { %v1548_v29 = vsub.f32 %v1344_v35, %v1532_v58  ;;  %v1529_v38 = vpop.xlane.xlu0 %1528 }
 0x3a1   : > { %v1547_v5 = vsub.f32 %v1339_v37, %v1529_v38 }
 0x3a2   : > { %v1559_v6 = vmul.f32 1.442695, %v1548_v29 }
 0x3a3   : > { %v1557_v7 = vmul.f32 1.442695, %v1547_v5 }
 0x3a4   : > { %4664 = vpow2.f32 %v1559_v6 }
 0x3a5   : > { %4666 = vpow2.f32 %v1557_v7 }
 0x3a7   : > { %v1544_v8 = vpop.xlane.xlu1 %1543 }
 0x3a8   : > { %v1552_v9 = vsub.f32 %v1518_v42, %v1544_v8  ;;  %v1541_v10 = vpop.xlane.xlu0 %1540 }
 0x3a9   : > { %v1551_v49 = vsub.f32 %v1513_v45, %v1541_v10  ;;  %v3971_v10 = vld [vmem:[%s5534_s7 + $0x18] sm:$0xff] }
 0x3aa   : > { %v1567_v14 = vmul.f32 1.442695, %v1552_v9  ;;  %v3970_v9 = vld [vmem:[%s5534_s7 + $0x10] sm:$0xff] }
 0x3ab   : > { %v1565_v15 = vmul.f32 1.442695, %v1551_v49  ;;  %v1526_v17 = vpop.xlane.xlu1 %1525 }
 0x3ac   : > { %4668 = vpow2.f32 %v1567_v14  ;;  %v1546_v19 = vsub.f32 %v1257_v47, %v1526_v17  ;;  %v1523_v23 = vpop.xlane.xlu0 %1522 }
 0x3ad   : > { %4670 = vpow2.f32 %v1565_v15  ;;  %v1545_v24 = vsub.f32 %v1252_v20, %v1523_v23  ;;  %v4564_v23 = vpack.c.bf16 %v3971_v10, %v3970_v9 }
 0x3ae   : > { %v4665_v26 = vpop.eup %4664  ;;  %v1555_v30 = vmul.f32 1.442695, %v1546_v19 }
 0x3af   : > { %v4667_v31 = vpop.eup %4666  ;;  %v1553_v13 = vmul.f32 1.442695, %v1545_v24  ;;  %v1538_v16 = vpop.xlane.xlu1 %1537  ;;  %v1578_v18 = vsel %vm646_vm0, %v4665_v26, 0.0 }
 0x3b0   : > { %4672 = vpow2.f32 %v1555_v30  ;;  %v1550_v22 = vsub.f32 %v1431_v52, %v1538_v16  ;;  %1579 = vadd.xlane.f32.xlu1 %v1578_v18  ;;  %v1535_v32 = vpop.xlane.xlu0 %1534  ;;  %v1575_v33 = vsel %vm646_vm0, %v4667_v31, 0.0 }
 0x3b1   : > { %4674 = vpow2.f32 %v1553_v13  ;;  %v1549_v35 = vsub.f32 %v1426_v55, %v1535_v32  ;;  %1576 = vadd.xlane.f32.xlu0 %v1575_v33  ;;  %v3959_v33 = vld [vmem:[%s5532_s5 + $0x18] sm:$0xff] }
 0x3b2   : > { %v1563_v27 = vmul.f32 1.442695, %v1550_v22 }
 0x3b3   : > { %v1561_v36 = vmul.f32 1.442695, %v1549_v35 }
 0x3b4   : > { %4676 = vpow2.f32 %v1563_v27 }
 0x3b5   : > { %4678 = vpow2.f32 %v1561_v36 }
 0x3b6   : > { %v4669_v37 = vpop.eup %4668 }
 0x3b7   : > { %v4671_v25 = vpop.eup %4670  ;;  %v1590_v40 = vsel %vm646_vm0, %v4669_v37, 0.0 }
 0x3b8   : > { %1591 = vadd.xlane.f32.xlu1 %v1590_v40  ;;  %v1587_v41 = vsel %vm646_vm0, %v4671_v25, 0.0  ;;  %v3983_v40 = vld [vmem:[%s5536_s9 + $0x18] sm:$0xff] }
 0x3b9   : > { %1588 = vadd.xlane.f32.xlu0 %v1587_v41 }
 0x3ba   : > { %v4673_v42 = vpop.eup %4672 }
 0x3bb   : > { %v4675_v43 = vpop.eup %4674  ;;  %v1572_v45 = vsel %vm646_vm0, %v4673_v42, 0.0 }
 0x3bc   : > { %1573 = vadd.xlane.f32.xlu1 %v1572_v45  ;;  %v1569_v47 = vsel %vm646_vm0, %v4675_v43, 0.0 }
 0x3bd   : > { %1570 = vadd.xlane.f32.xlu0 %v1569_v47 }
 0x3be   : > { %v5144_v50 = vpop.eup %4676 }
 0x3bf   : > { %v5146_v20 = vpop.eup %4678  ;;  %v1584_v51 = vsel %vm646_vm0, %v5144_v50, 0.0 }
 0x3c0   : > { %1585 = vadd.xlane.f32.xlu1 %v1584_v51  ;;  %v1581_v52 = vsel %vm646_vm0, %v5146_v20, 0.0 }
 0x3c1   : > { %1582 = vadd.xlane.f32.xlu0 %v1581_v52 }
 0x43d   : > { %v1580_v53 = vpop.xlane.xlu1 %1579 }
 0x43e   : > { %v1596_v55 = vadd.f32 1.0, %v1580_v53  ;;  %v1577_v28 = vpop.xlane.xlu0 %1576 }
 0x43f   : > { %v1595_v21 = vadd.f32 1.0, %v1577_v28 }
 0x440   : > { %4680 = vrcp.f32 %v1596_v55 }
 0x441   : > { %4682 = vrcp.f32 %v1595_v21 }
 0x445   : > { %v1592_v57 = vpop.xlane.xlu1 %1591 }
 0x446   : > { %v1600_v58 = vadd.f32 1.0, %v1592_v57  ;;  %v1589_v29 = vpop.xlane.xlu0 %1588 }
 0x447   : > { %v1599_v38 = vadd.f32 1.0, %v1589_v29 }
 0x448   : > { %4684 = vrcp.f32 %v1600_v58 }
 0x449   : > { %4686 = vrcp.f32 %v1599_v38  ;;  %v1574_v5 = vpop.xlane.xlu1 %1573 }
 0x44a   : > { %v4681_v6 = vpop.eup %4680  ;;  %v1594_v7 = vadd.f32 1.0, %v1574_v5  ;;  %v1571_v8 = vpop.xlane.xlu0 %1570 }
 0x44b   : > { %v4683_v49 = vpop.eup %4682  ;;  %v1593_v14 = vadd.f32 1.0, %v1571_v8  ;;  %v1612_v19 = vmul.f32 %v4681_v6, %v4665_v26  ;;  %v3958_v26 = vld [vmem:[%s5532_s5 + $0x10] sm:$0xff] }
 0x44c   : > { %4688 = vrcp.f32 %v1594_v7  ;;  %v1611_v15 = vmul.f32 %v4683_v49, %v4667_v31  ;;  %v4560_v36 = vpack.c.bf16 %v3959_v33, %v3958_v26 }
 0x44d   : > { %4690 = vrcp.f32 %v1593_v14  ;;  %v1586_v17 = vpop.xlane.xlu1 %1585 }
 0x44e   : > { %v1598_v24 = vadd.f32 1.0, %v1586_v17  ;;  %4315 = vmatprep.mubr.msk.f32.mxu1 %vm646_vm0, %v1611_v15  ;;  %v1583_v30 = vpop.xlane.xlu0 %1582 }
 0x44f   : > { %v1597_v13 = vadd.f32 1.0, %v1583_v30  ;;  %4316 = vmatmul.mubr.msk.f32.vlgmr.msra.gmra.mrb[14].mxu1 %vm646_vm0, %v1612_v19 }
 0x450   : > { %4692 = vrcp.f32 %v1598_v24  ;;  %4559 = vmatpush3.bf16.msra.mxu1 %v5106_v34 }
 0x451   : > { %4694 = vrcp.f32 %v1597_v13  ;;  %4565 = vmatprep.subr.bf16.mxu1 %v4564_v23 }
 0x452   : > { %v4685_v16 = vpop.eup %4684 }
 0x453   : > { %v4687_v18 = vpop.eup %4686  ;;  %v1616_v31 = vmul.f32 %v4685_v16, %v4669_v37  ;;  %v3985_v16 = vld [vmem:[%s5537_s10 + $0x1] ss:$0 sm:$0xff] }
 0x454   : > { %v1615_v22 = vmul.f32 %v4687_v18, %v4671_v25  ;;  %v3982_v25 = vld [vmem:[%s5536_s9 + $0x10] sm:$0xff] }
 0x455   : > { %v4568_v45 = vpack.c.bf16 %v3983_v40, %v3982_v25 }
 0x456   : > { %v4689_v32 = vpop.eup %4688  ;;  %4329 = vmatprep.mubr.msk.f32.mxu1 %vm646_vm0, %v1615_v22 }
 0x457   : > { %v4691_v35 = vpop.eup %4690  ;;  %4330 = vmatmul.mubr.msk.f32.vlgmr.msra.gmra.mrb[16].mxu1 %vm646_vm0, %v1616_v31  ;;  %v1610_v27 = vmul.f32 %v4689_v32, %v4673_v42 }
 0x458   : > { %4567 = vmatpush3.bf16.msra.mxu1 %v4564_v23  ;;  %4352 = vmatprep.mubr.msk.f32.mxu1 %vm646_vm0, %v5009_v46  ;;  %v1609_v34 = vmul.f32 %v4691_v35, %v4675_v43 }
 0x45a   : > { %v4693_v37 = vpop.eup %4692  ;;  %4308 = vmatprep.mubr.msk.f32.mxu0 %vm646_vm0, %v1609_v34 }
 0x45b   : > { %v4695_v41 = vpop.eup %4694  ;;  %4309 = vmatmul.mubr.msk.f32.vlgmr.msra.gmra.mrb[18].mxu0 %vm646_vm0, %v1610_v27  ;;  %4353 = vmatmul.mubr.msk.f32.vlgmr.msra.gmra.mrb[18].mxu1 %vm646_vm0, %v5017_v54  ;;  %v1614_v43 = vmul.f32 %v4693_v37, %v5144_v50  ;;  %v3961_v50 = vld [vmem:[%s5533_s6 + $0x1] ss:$0 sm:$0xff] }
 0x45c   : > { %4555 = vmatpush3.bf16.msra.mxu0 %v5097_v12  ;;  %4355 = vmatprep.mubr.msk.f32.mxu1 %vm646_vm0, %v5020_v56  ;;  %v1613_v42 = vmul.f32 %v4695_v41, %v5146_v20 }
 0x45d   : > { %4561 = vmatprep.subr.bf16.mxu0 %v4560_v36 }
 0x45e   : > { %4322 = vmatprep.mubr.msk.f32.mxu0 %vm646_vm0, %v1613_v42 }
 0x45f   : > { %4323 = vmatmul.mubr.msk.f32.vlgmr.msra.gmra.mrb[20].mxu0 %vm646_vm0, %v1614_v43  ;;  %4356 = vmatmul.mubr.msk.f32.gmra.mrb[20].mxu1 %vm646_vm0, %v5031_v2 }
 0x460   : > { %4563 = vmatpush3.bf16.msra.mxu0 %v4560_v36  ;;  %4358 = vmatprep.mubr.msk.f32.mxu1 %vm646_vm0, %v5034_v3 }
 0x461   : > { %4336 = vmatprep.mubr.msk.f32.mxu0 %vm646_vm0, %v4958_v59  ;;  %4569 = vmatprep.subr.bf16.mxu0 %v4568_v45 }
 0x463   : > { %4337 = vmatmul.mubr.msk.f32.vlgmr.msra.gmra.mrb[22].mxu0 %vm646_vm0, %v4962_v60  ;;  %4359 = vmatmul.mubr.msk.f32.gmra.mrb[22].mxu1 %vm646_vm0, %v5045_v39 }
 0x464   : > { %4361 = vmatprep.mubr.msk.f32.mxu1 %vm646_vm0, %v5048_v48  ;;  %4339 = vmatprep.mubr.msk.f32.mxu0 %vm646_vm0, %v4966_v61 }
 0x465   : > { %4571 = vmatpush3.bf16.msra.mxu0 %v4568_v45 }
 0x467   : > { %4340 = vmatmul.mubr.msk.f32.gmra.mrb[24].mxu0 %vm646_vm0, %v4970_v62  ;;  %4362 = vmatmul.mubr.msk.f32.gmra.mrb[24].mxu1 %vm646_vm0, %v5058_v11 }
 0x468   : > { %4342 = vmatprep.mubr.msk.f32.mxu0 %vm646_vm0, %v4974_v63  ;;  %v3973_v63 = vld [vmem:[%s5535_s8 + $0x1] ss:$0 sm:$0xff] }
 0x46b   : > { %4343 = vmatmul.mubr.msk.f32.gmra.mrb[26].mxu0 %vm646_vm0, %v4978_v0 }
 0x46c   : > { %4345 = vmatprep.mubr.msk.f32.mxu0 %vm646_vm0, %v4982_v1 }
 0x46f   : > { %4346 = vmatmul.mubr.msk.f32.gmra.mrb[28].mxu0 %vm646_vm0, %v4992_v4 }
 0x470   : > { %4368 = vmatprep.mubr.msk.f32.mxu0 %vm646_vm0, %v5009_v46 }
 0x473   : > { %4369 = vmatmul.mubr.msk.f32.vlgmr.msra.gmra.mrb[30].mxu0 %vm646_vm0, %v5017_v54 }
 0x474   : > { %4371 = vmatprep.mubr.msk.f32.mxu0 %vm646_vm0, %v5020_v56 }
 0x477   : > { %4372 = vmatmul.mubr.msk.f32.gmra.mrb[32].mxu0 %vm646_vm0, %v5031_v2 }
 0x478   : > { %4374 = vmatprep.mubr.msk.f32.mxu0 %vm646_vm0, %v5034_v3 }
 0x47b   : > { %4375 = vmatmul.mubr.msk.f32.gmra.mrb[34].mxu0 %vm646_vm0, %v5045_v39 }
 0x47c   : > { %4377 = vmatprep.mubr.msk.f32.mxu0 %vm646_vm0, %v5048_v48 }
 0x47f   : > { %4378 = vmatmul.mubr.msk.f32.gmra.mrb[36].mxu0 %vm646_vm0, %v5058_v11 }
 0x522   : > { %v5230_v59 = vpop.f32.mrb[14].mxu1 }
 0x523   : > { %v5232_v60 = vpop.f32.mrb[15].mxu1 }
 0x52a   : > { %v5234_v61 = vpop.f32.mrb[16].mxu1 }
 0x52b   : > { %v5236_v62 = vpop.f32.mrb[17].mxu1 }
 0x52e   : > { %v5241_v0 = vpop.f32.mrb[18].mxu0  ;;  %v4354_v1 = vpop.f32.mrb[18].mxu1 }
 0x52f   : > { %v2141_v4 = vadd.f32 %v4354_v1, %v3973_v63  ;;  %v5243_v46 = vpop.f32.mrb[19].mxu0  ;;  %v2135_v54 = vpop.f32.mrb[19].mxu1 }
 0x530   : > { %v2136_v56 = vadd.f32 %v3973_v63, %v2135_v54  ;;  %v3995_v54 = vld [vmem:[%s5557_s28 + $0x18] sm:$0xff] }
 0x532   : > { %v4572_v2 = vpack.c.bf16 %v2141_v4, %v2136_v56  ;;  %v5245_v3 = vpop.f32.mrb[20].mxu0  ;;  %v4357_v39 = vpop.f32.mrb[20].mxu1  ;;  %v3994_v56 = vld [vmem:[%s5557_s28 + $0x10] sm:$0xff] }
 0x533   : > { %v2151_v48 = vadd.f32 %v4357_v39, %v3973_v63  ;;  %v5247_v11 = vpop.f32.mrb[21].mxu0  ;;  %v2145_v12 = vpop.f32.mrb[21].mxu1 }
 0x534   : > { %v2146_v47 = vadd.f32 %v3973_v63, %v2145_v12  ;;  %4574 = vmatprep.subr.msk.bf16.mxu1 %vm5087_vm2, %v4572_v2 }
 0x535   : > { %4577 = vmatpush3.bf16.xpose.msk.msra.mxu1 %vm5087_vm2, %v4572_v2 }
 0x536   : > { %v4578_v20 = vpack.c.bf16 %v2151_v48, %v2146_v47  ;;  %v4360_v51 = vpop.f32.mrb[22].mxu1  ;;  %v4338_v52 = vpop.f32.mrb[22].mxu0 }
 0x537   : > { %v2161_v53 = vadd.f32 %v4360_v51, %v3973_v63  ;;  %v2155_v55 = vpop.f32.mrb[23].mxu1  ;;  %v2019_v28 = vpop.f32.mrb[23].mxu0  ;;  %v2025_v21 = vadd.f32 %v4338_v52, %v3961_v50 }
 0x538   : > { %v2156_v57 = vadd.f32 %v3973_v63, %v2155_v55  ;;  %v2020_v58 = vadd.f32 %v3961_v50, %v2019_v28  ;;  %4580 = vmatprep.subr.msk.bf16.mxu1 %vm5087_vm2, %v4578_v20 }
 0x53a   : > { %v4584_v29 = vpack.c.bf16 %v2161_v53, %v2156_v57  ;;  %v4363_v38 = vpop.f32.mrb[24].mxu1  ;;  %4384 = vmatprep.mubr.msk.f32.mxu1 %vm1172_vm1, %v2020_v58  ;;  %v4341_v5 = vpop.f32.mrb[24].mxu0 }
 0x53b   : > { %v2171_v6 = vadd.f32 %v4363_v38, %v3973_v63  ;;  %v2165_v7 = vpop.f32.mrb[25].mxu1  ;;  %v2029_v8 = vpop.f32.mrb[25].mxu0  ;;  %v2035_v23 = vadd.f32 %v4341_v5, %v3961_v50 }
 0x53c   : > { %v2166_v9 = vadd.f32 %v3973_v63, %v2165_v7  ;;  %4385 = vmatmul.mubr.msk.f32.vlgmr.msra.gmra.mrb[26].mxu1 %vm1172_vm1, %v2025_v21  ;;  %4586 = vmatprep.subr.msk.bf16.mxu0 %vm5087_vm2, %v4584_v29  ;;  %v2030_v10 = vadd.f32 %v3961_v50, %v2029_v8 }
 0x53d   : > { %4583 = vmatpush3.bf16.xpose.msk.msra.mxu1 %vm5087_vm2, %v4578_v20  ;;  %4589 = vmatpush3.bf16.xpose.msk.msra.mxu0 %vm5087_vm2, %v4584_v29 }
 0x53e   : > { %v4590_v49 = vpack.c.bf16 %v2171_v6, %v2166_v9  ;;  %v4344_v14 = vpop.f32.mrb[26].mxu0  ;;  %4391 = vmatprep.mubr.msk.f32.mxu1 %vm1172_vm1, %v2030_v10 }
 0x53f   : > { %v2039_v15 = vpop.f32.mrb[27].mxu0  ;;  %v2045_v17 = vadd.f32 %v4344_v14, %v3961_v50 }
 0x540   : > { %4592 = vmatprep.subr.msk.bf16.mxu1 %vm5087_vm2, %v4590_v49  ;;  %v2040_v19 = vadd.f32 %v3961_v50, %v2039_v15 }
 0x542   : > { %v4347_v24 = vpop.f32.mrb[28].mxu0  ;;  %4398 = vmatprep.mubr.msk.f32.mxu0 %vm1172_vm1, %v2040_v19 }
 0x543   : > { %v2049_v30 = vpop.f32.mrb[29].mxu0  ;;  %v2055_v26 = vadd.f32 %v4347_v24, %v3961_v50 }
 0x544   : > { %4392 = vmatmul.mubr.msk.f32.vlgmr.msra.gmra.mrb[28].mxu1 %vm1172_vm1, %v2035_v23  ;;  %v2050_v13 = vadd.f32 %v3961_v50, %v2049_v30  ;;  %4399 = vmatmul.mubr.msk.f32.vlgmr.msra.gmra.mrb[38].mxu0 %vm1172_vm1, %v2045_v17 }
 0x545   : > { %4595 = vmatpush3.bf16.xpose.msk.msra.mxu1 %vm5087_vm2, %v4590_v49 }
 0x546   : > { %v4370_v18 = vpop.f32.mrb[30].mxu0  ;;  %4405 = vmatprep.mubr.msk.f32.mxu1 %vm1172_vm1, %v2050_v13 }
 0x547   : > { %v2257_v22 = vadd.f32 %v4370_v18, %v3985_v16  ;;  %v2251_v31 = vpop.f32.mrb[31].mxu0 }
 0x548   : > { %v2252_v32 = vadd.f32 %v3985_v16, %v2251_v31 }
 0x54a   : > { %v4596_v33 = vpack.c.bf16 %v2257_v22, %v2252_v32  ;;  %v4373_v35 = vpop.f32.mrb[32].mxu0 }
 0x54b   : > { %v2267_v34 = vadd.f32 %v4373_v35, %v3985_v16  ;;  %v2261_v27 = vpop.f32.mrb[33].mxu0 }
 0x54c   : > { %v2262_v36 = vadd.f32 %v3985_v16, %v2261_v27  ;;  %4406 = vmatmul.mubr.msk.f32.vlgmr.msra.gmra.mrb[30].mxu1 %vm1172_vm1, %v2055_v26  ;;  %4597 = vmatprep.subr.bf16.mxu0 %v4596_v33 }
 0x54d   : > { %4599 = vmatpush3.bf16.msra.mxu0 %v4596_v33 }
 0x54e   : > { %v4600_v37 = vpack.c.bf16 %v2267_v34, %v2262_v36  ;;  %v4376_v25 = vpop.f32.mrb[34].mxu0 }
 0x54f   : > { %v2277_v44 = vadd.f32 %v4376_v25, %v3985_v16  ;;  %v2271_v40 = vpop.f32.mrb[35].mxu0 }
 0x550   : > { %v2272_v41 = vadd.f32 %v3985_v16, %v2271_v40  ;;  %4601 = vmatprep.subr.bf16.mxu1 %v4600_v37 }
 0x551   : > { %4603 = vmatpush3.bf16.msra.mxu1 %v4600_v37 }
 0x552   : > { %v5279_v42 = vpack.c.bf16 %v2277_v44, %v2272_v41  ;;  %v4379_v43 = vpop.f32.mrb[36].mxu0 }
 0x553   : > { %v2287_v45 = vadd.f32 %v4379_v43, %v3985_v16  ;;  %v2281_v63 = vpop.f32.mrb[37].mxu0 }
 0x554   : > { %v2282_v1 = vadd.f32 %v3985_v16, %v2281_v63  ;;  %4605 = vmatprep.subr.bf16.mxu0 %v5279_v42 }
 0x556   : > { %v5282_v4 = vpack.c.bf16 %v2287_v45, %v2282_v1 }
 0x558   : > { %4609 = vmatprep.subr.bf16.mxu1 %v5282_v4 }
 0x60f   : > { %v4386_v2 = vpop.f32.mrb[26].mxu1 }
 0x610   : > { %v2377_v39 = vadd.f32 %v4386_v2, %v3995_v54  ;;  %v2371_v48 = vpop.f32.mrb[27].mxu1 }
 0x611   : > { %v2372_v12 = vadd.f32 %v3994_v56, %v2371_v48 }
 0x612   : > { %v2644_v47 = vsel %vm646_vm0, %v2377_v39, -inf }
 0x613   : > { %2645 = vmax.xlane.f32.xlu1 %v2644_v47  ;;  %v2641_v50 = vsel %vm646_vm0, %v2372_v12, -inf }
 0x614   : > { %2642 = vmax.xlane.f32.xlu0 %v2641_v50 }
 0x617   : > { %v4393_v20 = vpop.f32.mrb[28].mxu1  ;;  %v4400_v51 = vpop.f32.mrb[38].mxu0 }
 0x618   : > { %v2464_v52 = vadd.f32 %v4393_v20, %v3995_v54  ;;  %v2458_v53 = vpop.f32.mrb[29].mxu1  ;;  %v2545_v55 = vpop.f32.mrb[39].mxu0  ;;  %v2551_v21 = vadd.f32 %v4400_v51, %v3995_v54 }
 0x619   : > { %v2459_v28 = vadd.f32 %v3994_v56, %v2458_v53  ;;  %v2546_v58 = vadd.f32 %v3994_v56, %v2545_v55 }
 0x61a   : > { %v2650_v57 = vsel %vm646_vm0, %v2464_v52, -inf  ;;  %v2656_v38 = vsel %vm646_vm0, %v2551_v21, -inf }
 0x61b   : > { %2651 = vmax.xlane.f32.xlu1 %v2650_v57  ;;  %v2647_v29 = vsel %vm646_vm0, %v2459_v28, -inf  ;;  %v2653_v6 = vsel %vm646_vm0, %v2546_v58, -inf }
 0x61c   : > { %2648 = vmax.xlane.f32.xlu0 %v2647_v29 }
 0x61f   : > { %2657 = vmax.xlane.f32.xlu1 %v2656_v38  ;;  %v4407_v5 = vpop.f32.mrb[30].mxu1 }
 0x620   : > { %v2638_v7 = vadd.f32 %v4407_v5, %v3995_v54  ;;  %v2632_v8 = vpop.f32.mrb[31].mxu1  ;;  %2654 = vmax.xlane.f32.xlu0 %v2653_v6 }
 0x621   : > { %v2633_v9 = vadd.f32 %v3994_v56, %v2632_v8 }
 0x622   : > { %v2662_v10 = vsel %vm646_vm0, %v2638_v7, -inf }
 0x623   : > { %2663 = vmax.xlane.f32.xlu1 %v2662_v10  ;;  %v2659_v49 = vsel %vm646_vm0, %v2633_v9, -inf }
 0x624   : > { %2660 = vmax.xlane.f32.xlu0 %v2659_v49 }
 0x6a0   : > { %v2646_v14 = vpop.xlane.xlu1 %2645 }
 0x6a1   : > { %v2666_v15 = vsub.f32 %v2377_v39, %v2646_v14  ;;  %v2643_v17 = vpop.xlane.xlu0 %2642 }
 0x6a2   : > { %v2665_v19 = vsub.f32 %v2372_v12, %v2643_v17 }
 0x6a3   : > { %v2675_v23 = vmul.f32 1.442695, %v2666_v15 }
 0x6a4   : > { %v2673_v24 = vmul.f32 1.442695, %v2665_v19 }
 0x6a5   : > { %4696 = vpow2.f32 %v2675_v23 }
 0x6a6   : > { %4698 = vpow2.f32 %v2673_v24 }
 0x6a8   : > { %v2652_v30 = vpop.xlane.xlu1 %2651 }
 0x6a9   : > { %v2668_v13 = vsub.f32 %v2464_v52, %v2652_v30  ;;  %v2649_v16 = vpop.xlane.xlu0 %2648 }
 0x6aa   : > { %v2667_v18 = vsub.f32 %v2459_v28, %v2649_v16 }
 0x6ab   : > { %v2679_v22 = vmul.f32 1.442695, %v2668_v13 }
 0x6ac   : > { %v2677_v31 = vmul.f32 1.442695, %v2667_v18  ;;  %v2658_v32 = vpop.xlane.xlu1 %2657 }
 0x6ad   : > { %4700 = vpow2.f32 %v2679_v22  ;;  %v2670_v26 = vsub.f32 %v2551_v21, %v2658_v32  ;;  %v2655_v33 = vpop.xlane.xlu0 %2654 }
 0x6ae   : > { %4702 = vpow2.f32 %v2677_v31  ;;  %v2669_v35 = vsub.f32 %v2546_v58, %v2655_v33 }
 0x6af   : > { %v4697_v34 = vpop.eup %4696  ;;  %v2683_v27 = vmul.f32 1.442695, %v2670_v26 }
 0x6b0   : > { %v4699_v36 = vpop.eup %4698  ;;  %v2681_v37 = vmul.f32 1.442695, %v2669_v35  ;;  %v2664_v25 = vpop.xlane.xlu1 %2663  ;;  %v2692_v44 = vsel %vm646_vm0, %v4697_v34, 0.0 }
 0x6b1   : > { %4704 = vpow2.f32 %v2683_v27  ;;  %v2672_v40 = vsub.f32 %v2638_v7, %v2664_v25  ;;  %2693 = vadd.xlane.f32.xlu1 %v2692_v44  ;;  %v2661_v41 = vpop.xlane.xlu0 %2660  ;;  %v2689_v43 = vsel %vm646_vm0, %v4699_v36, 0.0  ;;  %v4020_v27 = vld [vmem:[%s5538_s11 + $0x8] sm:$0xff] }
 0x6b2   : > { %4706 = vpow2.f32 %v2681_v37  ;;  %v2671_v45 = vsub.f32 %v2633_v9, %v2661_v41  ;;  %2690 = vadd.xlane.f32.xlu0 %v2689_v43 }
 0x6b3   : > { %v2687_v63 = vmul.f32 1.442695, %v2672_v40 }
 0x6b4   : > { %v2685_v1 = vmul.f32 1.442695, %v2671_v45 }
 0x6b5   : > { %4708 = vpow2.f32 %v2687_v63 }
 0x6b6   : > { %4710 = vpow2.f32 %v2685_v1 }
 0x6b7   : > { %v4701_v54 = vpop.eup %4700 }
 0x6b8   : > { %v4703_v56 = vpop.eup %4702  ;;  %v2698_v2 = vsel %vm646_vm0, %v4701_v54, 0.0 }
 0x6b9   : > { %2699 = vadd.xlane.f32.xlu1 %v2698_v2  ;;  %v2695_v39 = vsel %vm646_vm0, %v4703_v56, 0.0 }
 0x6ba   : > { %2696 = vadd.xlane.f32.xlu0 %v2695_v39 }
 0x6bb   : > { %v4705_v48 = vpop.eup %4704 }
 0x6bc   : > { %v4707_v12 = vpop.eup %4706  ;;  %v2704_v47 = vsel %vm646_vm0, %v4705_v48, 0.0 }
 0x6bd   : > { %2705 = vadd.xlane.f32.xlu1 %v2704_v47  ;;  %v2701_v50 = vsel %vm646_vm0, %v4707_v12, 0.0 }
 0x6be   : > { %2702 = vadd.xlane.f32.xlu0 %v2701_v50  ;;  %v4763_v50 = vld [vmem:[%s4890_s23 + $0x10] sm:$0xff] }
 0x6bf   : > { %v4709_v20 = vpop.eup %4708 }
 0x6c0   : > { %v4711_v51 = vpop.eup %4710  ;;  %v2710_v52 = vsel %vm646_vm0, %v4709_v20, 0.0 }
 0x6c1   : > { %2711 = vadd.xlane.f32.xlu1 %v2710_v52  ;;  %v2707_v53 = vsel %vm646_vm0, %v4711_v51, 0.0 }
 0x6c2   : > { %2708 = vadd.xlane.f32.xlu0 %v2707_v53 }
 0x73e   : > { %v2694_v55 = vpop.xlane.xlu1 %2693 }
 0x73f   : > { %v2714_v28 = vadd.f32 1.0, %v2694_v55  ;;  %v2691_v21 = vpop.xlane.xlu0 %2690 }
 0x740   : > { %v2713_v57 = vadd.f32 1.0, %v2691_v21 }
 0x741   : > { %4712 = vrcp.f32 %v2714_v28 }
 0x742   : > { %4714 = vrcp.f32 %v2713_v57  ;;  %v4764_v57 = vld [vmem:[%s4890_s23 + $0x28] sm:$0xff] }
 0x746   : > { %v2700_v58 = vpop.xlane.xlu1 %2699 }
 0x747   : > { %v2716_v29 = vadd.f32 1.0, %v2700_v58  ;;  %v2697_v38 = vpop.xlane.xlu0 %2696 }
 0x748   : > { %v2715_v5 = vadd.f32 1.0, %v2697_v38 }
 0x749   : > { %4716 = vrcp.f32 %v2716_v29  ;;  %v4765_v29 = vld [vmem:[%s4890_s23 + $0x20] sm:$0xff] }
 0x74a   : > { %4718 = vrcp.f32 %v2715_v5  ;;  %v2706_v6 = vpop.xlane.xlu1 %2705 }
 0x74b   : > { %v4713_v7 = vpop.eup %4712  ;;  %v2718_v8 = vadd.f32 1.0, %v2706_v6  ;;  %v2703_v9 = vpop.xlane.xlu0 %2702 }
 0x74c   : > { %v4715_v10 = vpop.eup %4714  ;;  %v2717_v49 = vadd.f32 1.0, %v2703_v9  ;;  %v2730_v17 = vmul.f32 %v4713_v7, %v4697_v34 }
 0x74d   : > { %4720 = vrcp.f32 %v2718_v8  ;;  %v2729_v14 = vmul.f32 %v4715_v10, %v4699_v36 }
 0x74e   : > { %4722 = vrcp.f32 %v2717_v49  ;;  %v2712_v15 = vpop.xlane.xlu1 %2711  ;;  %v4766_v49 = vld [vmem:[%s4890_s23 + $0x38] sm:$0xff] }
 0x74f   : > { %v2720_v19 = vadd.f32 1.0, %v2712_v15  ;;  %4412 = vmatprep.mubr.msk.f32.mxu0 %vm646_vm0, %v2729_v14  ;;  %v2709_v23 = vpop.xlane.xlu0 %2708  ;;  %v4767_v15 = vld [vmem:[%s4890_s23 + $0x30] sm:$0xff] }
 0x750   : > { %v2719_v24 = vadd.f32 1.0, %v2709_v23  ;;  %4413 = vmatmul.mubr.msk.f32.vlgmr.msra.gmra.mrb[40].mxu0 %vm646_vm0, %v2730_v17 }
 0x751   : > { %4724 = vrcp.f32 %v2720_v19  ;;  %4607 = vmatpush3.bf16.msra.mxu0 %v5279_v42 }
 0x752   : > { %4726 = vrcp.f32 %v2719_v24  ;;  %4436 = vmatprep.subr.mxu0 %v4020_v27 }
 0x753   : > { %v4717_v30 = vpop.eup %4716 }
 0x754   : > { %v4719_v13 = vpop.eup %4718  ;;  %v2732_v18 = vmul.f32 %v4717_v30, %v4701_v54 }
 0x755   : > { %v2731_v16 = vmul.f32 %v4719_v13, %v4703_v56 }
 0x757   : > { %v4721_v22 = vpop.eup %4720  ;;  %4419 = vmatprep.mubr.msk.f32.mxu1 %vm646_vm0, %v2731_v16 }
 0x758   : > { %v4723_v31 = vpop.eup %4722  ;;  %4420 = vmatmul.mubr.msk.f32.vlgmr.msra.gmra.mrb[32].mxu1 %vm646_vm0, %v2732_v18  ;;  %v2734_v26 = vmul.f32 %v4721_v22, %v4705_v48 }
 0x759   : > { %4611 = vmatpush3.bf16.msra.mxu1 %v5282_v4  ;;  %v2733_v32 = vmul.f32 %v4723_v31, %v4707_v12  ;;  %v1941_v4 = vld [vmem:[%s5538_s11] sm:$0xff]  ;;  %v4762_v12 = vld [vmem:[%s4890_s23 + $0x18] sm:$0xff] }
 0x75b   : > { %v4725_v33 = vpop.eup %4724  ;;  %4426 = vmatprep.mubr.msk.f32.mxu0 %vm646_vm0, %v2733_v32 }
 0x75c   : > { %v4727_v35 = vpop.eup %4726  ;;  %4427 = vmatmul.mubr.msk.f32.vlgmr.msra.gmra.mrb[42].mxu0 %vm646_vm0, %v2734_v26  ;;  %v2736_v34 = vmul.f32 %v4725_v33, %v4709_v20 }
 0x75d   : > { %v2735_v42 = vmul.f32 %v4727_v35, %v4711_v51  ;;  %4437 = vmatpush3.msra.mxu0 %v4020_v27 }
 0x75e   : > { %4450 = vmatprep.subr.mxu0 %v1941_v4 }
 0x75f   : > { %4433 = vmatprep.mubr.msk.f32.mxu1 %vm646_vm0, %v2735_v42 }
 0x760   : > { %4434 = vmatmul.mubr.msk.f32.vlgmr.msra.gmra.mrb[34].mxu1 %vm646_vm0, %v2736_v34 }
 0x823   : > { %v4414_v36 = vpop.f32.mrb[40].mxu0 }
 0x824   : > { %v2809_v37 = vpop.f32.mrb[41].mxu0 }
 0x825   : > { %4438 = vmatprep.mubr.msk.f32.mxu0 %vm1172_vm1, %v2809_v37 }
 0x826   : > { %4439 = vmatmul.mubr.msk.f32.vlgmr.msra.gmra.mrb[44].mxu0 %vm1172_vm1, %v4414_v36 }
 0x827   : > { %4451 = vmatpush3.msra.mxu0 %v1941_v4 }
 0x82b   : > { %v4421_v25 = vpop.f32.mrb[32].mxu1 }
 0x82c   : > { %v2890_v44 = vpop.f32.mrb[33].mxu1 }
 0x82d   : > { %4441 = vmatprep.mubr.msk.f32.mxu0 %vm1172_vm1, %v2890_v44 }
 0x82e   : > { %4442 = vmatmul.mubr.msk.f32.gmra.mrb[46].mxu0 %vm1172_vm1, %v4421_v25 }
 0x82f   : > { %v4428_v40 = vpop.f32.mrb[42].mxu0 }
 0x830   : > { %v2971_v41 = vpop.f32.mrb[43].mxu0 }
 0x831   : > { %4444 = vmatprep.mubr.msk.f32.mxu0 %vm1172_vm1, %v2971_v41 }
 0x832   : > { %4445 = vmatmul.mubr.msk.f32.gmra.mrb[48].mxu0 %vm1172_vm1, %v4428_v40 }
 0x833   : > { %v4435_v43 = vpop.f32.mrb[34].mxu1 }
 0x834   : > { %v3052_v45 = vpop.f32.mrb[35].mxu1 }
 0x835   : > { %4447 = vmatprep.mubr.msk.f32.mxu0 %vm1172_vm1, %v3052_v45 }
 0x836   : > { %4448 = vmatmul.mubr.msk.f32.gmra.mrb[50].mxu0 %vm1172_vm1, %v4435_v43 }
 0x837   : > { %4452 = vmatprep.mubr.msk.f32.mxu0 %vm1172_vm1, %v5243_v46 }
 0x83a   : > { %4453 = vmatmul.mubr.msk.f32.vlgmr.msra.gmra.mrb[44].mxu0 %vm1172_vm1, %v5241_v0  ;;  %v4037_v0 = vld [vmem:[%s5539_s12] ss:$0 sm:$0xff] }
 0x83b   : > { %4455 = vmatprep.mubr.msk.f32.mxu0 %vm1172_vm1, %v5232_v60 }
 0x83e   : > { %4456 = vmatmul.mubr.msk.f32.gmra.mrb[46].mxu0 %vm1172_vm1, %v5230_v59 }
 0x83f   : > { %4458 = vmatprep.mubr.msk.f32.mxu0 %vm1172_vm1, %v5247_v11  ;;  %v4760_v11 = vld [vmem:[%s4890_s23 + $0x8] sm:$0xff] }
 0x842   : > { %4459 = vmatmul.mubr.msk.f32.gmra.mrb[48].mxu0 %vm1172_vm1, %v5245_v3  ;;  %v4761_v3 = vld [vmem:[%s4890_s23] sm:$0xff] }
 0x843   : > { %4461 = vmatprep.mubr.msk.f32.mxu0 %vm1172_vm1, %v5236_v62 }
 0x846   : > { %4462 = vmatmul.mubr.msk.f32.gmra.mrb[50].mxu0 %vm1172_vm1, %v5234_v61 }
 0x90d   : > { %v4454_v60 = vpop.f32.mrb[44].mxu0 }
 0x90e   : > { %v3329_v46 = vadd.f32 %v4454_v60, %v4037_v0  ;;  %v3282_v59 = vpop.f32.mrb[45].mxu0 }
 0x90f   : > { %v3328_v63 = vadd.f32 %v4037_v0, %v3282_v59 }
 0x910   : > { %v5351_v1 = vadd.f32 %v4760_v11, %v3329_v46 }
 0x911   : > { %v5354_v54 = vadd.f32 %v4761_v3, %v3328_v63  ;;  %v4457_v62 = vpop.f32.mrb[46].mxu0 }
 0x912   : > { %v3331_v56 = vadd.f32 %v4457_v62, %v4037_v0  ;;  %v3292_v2 = vpop.f32.mrb[47].mxu0  ;;  %v3349_v61 = vsel %vm646_vm0, %v5351_v1, 0.0 }
 0x913   : > { %v3330_v39 = vadd.f32 %v4037_v0, %v3292_v2  ;;  %3350 = vadd.xlane.f32.xlu1 %v3349_v61  ;;  %v3346_v48 = vsel %vm646_vm0, %v5354_v54, 0.0 }
 0x914   : > { %v5361_v47 = vadd.f32 %v4762_v12, %v3331_v56  ;;  %3347 = vadd.xlane.f32.xlu0 %v3346_v48 }
 0x915   : > { %v5364_v20 = vadd.f32 %v4763_v50, %v3330_v39  ;;  %v4460_v51 = vpop.f32.mrb[48].mxu0 }
 0x916   : > { %v3333_v52 = vadd.f32 %v4460_v51, %v4037_v0  ;;  %v3302_v53 = vpop.f32.mrb[49].mxu0  ;;  %v3355_v55 = vsel %vm646_vm0, %v5361_v47, 0.0 }
 0x917   : > { %v3332_v28 = vadd.f32 %v4037_v0, %v3302_v53  ;;  %3356 = vadd.xlane.f32.xlu1 %v3355_v55  ;;  %v3352_v21 = vsel %vm646_vm0, %v5364_v20, 0.0  ;;  %v3478_v53 = vld [vmem:[%s5542_s15] sm:$0xff]  ;;  %v3479_v55 = vld [vmem:[%s5542_s15 + $0x8] sm:$0xff] }
 0x918   : > { %v5371_v58 = vadd.f32 %v4764_v57, %v3333_v52  ;;  %3353 = vadd.xlane.f32.xlu0 %v3352_v21 }
 0x919   : > { %v5374_v38 = vadd.f32 %v4765_v29, %v3332_v28  ;;  %v4463_v5 = vpop.f32.mrb[50].mxu0  ;;  %v4612_v28 = vpack.c.bf16 %v3479_v55, %v3478_v53 }
 0x91a   : > { %v3335_v6 = vadd.f32 %v4463_v5, %v4037_v0  ;;  %v3312_v7 = vpop.f32.mrb[51].mxu0  ;;  %v3361_v8 = vsel %vm646_vm0, %v5371_v58, 0.0 }
 0x91b   : > { %v3334_v9 = vadd.f32 %v4037_v0, %v3312_v7  ;;  %3362 = vadd.xlane.f32.xlu1 %v3361_v8  ;;  %v3358_v10 = vsel %vm646_vm0, %v5374_v38, 0.0  ;;  %4613 = vmatprep.subr.bf16.mxu1 %v4612_v28 }
 0x91c   : > { %v5381_v14 = vadd.f32 %v4766_v49, %v3335_v6  ;;  %3359 = vadd.xlane.f32.xlu0 %v3358_v10  ;;  %4615 = vmatpush3.bf16.msra.mxu1 %v4612_v28 }
 0x91d   : > { %v5384_v17 = vadd.f32 %v4767_v15, %v3334_v9 }
 0x91e   : > { %v3367_v19 = vsel %vm646_vm0, %v5381_v14, 0.0 }
 0x91f   : > { %3368 = vadd.xlane.f32.xlu1 %v3367_v19  ;;  %v3364_v23 = vsel %vm646_vm0, %v5384_v17, 0.0 }
 0x920   : > { %3365 = vadd.xlane.f32.xlu0 %v3364_v23 }
 0x9a0   : > { %v3351_v24 = vpop.xlane.xlu1 %3350 }
 0x9a1   : > { %v3371_v30 = vmul.f32 0.0625, %v3351_v24  ;;  %v3348_v13 = vpop.xlane.xlu0 %3347 }
 0x9a2   : > { %v3370_v16 = vmul.f32 0.0625, %v3348_v13 }
 0x9a3   : > { %v5391_v18 = vsub.f32 %v5351_v1, %v3371_v30 }
 0x9a4   : > { %v5394_v22 = vsub.f32 %v5354_v54, %v3370_v16  ;;  %v3357_v31 = vpop.xlane.xlu1 %3356 }
 0x9a5   : > { %v3373_v32 = vmul.f32 0.0625, %v3357_v31  ;;  %v3354_v26 = vpop.xlane.xlu0 %3353  ;;  %v3387_v33 = vmul.f32 %v5391_v18, %v5391_v18 }
 0x9a6   : > { %v3372_v35 = vmul.f32 0.0625, %v3354_v26  ;;  %v3386_v42 = vmul.f32 %v5394_v22, %v5394_v22 }
 0x9a7   : > { %v5401_v34 = vsub.f32 %v5361_v47, %v3373_v32  ;;  %v3397_v27 = vsel %vm646_vm0, %v3387_v33, 0.0 }
 0x9a8   : > { %v5405_v4 = vsub.f32 %v5364_v20, %v3372_v35  ;;  %v3363_v36 = vpop.xlane.xlu1 %3362  ;;  %3398 = vadd.xlane.f32.xlu1 %v3397_v27  ;;  %v3394_v37 = vsel %vm646_vm0, %v3386_v42, 0.0 }
 0x9a9   : > { %v3375_v25 = vmul.f32 0.0625, %v3363_v36  ;;  %v3360_v44 = vpop.xlane.xlu0 %3359  ;;  %3395 = vadd.xlane.f32.xlu0 %v3394_v37  ;;  %v3389_v40 = vmul.f32 %v5401_v34, %v5401_v34  ;;  %v4038_v36 = vld [vmem:[%s5540_s13] ss:$0 sm:$0xff] }
 0x9aa   : > { %v3374_v41 = vmul.f32 0.0625, %v3360_v44  ;;  %v3388_v43 = vmul.f32 %v5405_v4, %v5405_v4 }
 0x9ab   : > { %v5413_v45 = vsub.f32 %v5371_v58, %v3375_v25  ;;  %v3403_v0 = vsel %vm646_vm0, %v3389_v40, 0.0 }
 0x9ac   : > { %v5417_v60 = vsub.f32 %v5374_v38, %v3374_v41  ;;  %3404 = vadd.xlane.f32.xlu1 %v3403_v0  ;;  %v3369_v46 = vpop.xlane.xlu1 %3368  ;;  %v3400_v59 = vsel %vm646_vm0, %v3388_v43, 0.0  ;;  %v4039_v41 = vld [vmem:[%s5541_s14] ss:$0 sm:$0xff] }
 0x9ad   : > { %v3377_v63 = vmul.f32 0.0625, %v3369_v46  ;;  %3401 = vadd.xlane.f32.xlu0 %v3400_v59  ;;  %v3366_v11 = vpop.xlane.xlu0 %3365  ;;  %v3391_v3 = vmul.f32 %v5413_v45, %v5413_v45 }
 0x9ae   : > { %v3376_v62 = vmul.f32 0.0625, %v3366_v11  ;;  %v3390_v56 = vmul.f32 %v5417_v60, %v5417_v60 }
 0x9af   : > { %v5425_v2 = vsub.f32 %v5381_v14, %v3377_v63  ;;  %v3409_v61 = vsel %vm646_vm0, %v3391_v3, 0.0 }
 0x9b0   : > { %v5429_v39 = vsub.f32 %v5384_v17, %v3376_v62  ;;  %3410 = vadd.xlane.f32.xlu1 %v3409_v61  ;;  %v3406_v48 = vsel %vm646_vm0, %v3390_v56, 0.0 }
 0x9b1   : > { %3407 = vadd.xlane.f32.xlu0 %v3406_v48  ;;  %v3393_v12 = vmul.f32 %v5425_v2, %v5425_v2 }
 0x9b2   : > { %v3392_v50 = vmul.f32 %v5429_v39, %v5429_v39 }
 0x9b3   : > { %v3415_v51 = vsel %vm646_vm0, %v3393_v12, 0.0 }
 0x9b4   : > { %3416 = vadd.xlane.f32.xlu1 %v3415_v51  ;;  %v3412_v52 = vsel %vm646_vm0, %v3392_v50, 0.0 }
 0x9b5   : > { %3413 = vadd.xlane.f32.xlu0 %v3412_v52 }
 0xa35   : > { %v3399_v21 = vpop.xlane.xlu1 %3398 }
 0xa36   : > { %v3419_v57 = vmul.f32 0.0625, %v3399_v21  ;;  %v3396_v29 = vpop.xlane.xlu0 %3395 }
 0xa37   : > { %v3418_v5 = vmul.f32 0.0625, %v3396_v29 }
 0xa38   : > { %v3427_v6 = vadd.f32 1e-05, %v3419_v57 }
 0xa39   : > { %v3426_v7 = vadd.f32 1e-05, %v3418_v5  ;;  %v3405_v8 = vpop.xlane.xlu1 %3404 }
 0xa3a   : > { %4728 = vrsqrt.f32 %v3427_v6  ;;  %v3421_v9 = vmul.f32 0.0625, %v3405_v8  ;;  %v3402_v10 = vpop.xlane.xlu0 %3401  ;;  %v3660_v8 = vld [vmem:[%s5544_s17 + $0x18] sm:$0xff] }
 0xa3b   : > { %4730 = vrsqrt.f32 %v3426_v7  ;;  %v3420_v49 = vmul.f32 0.0625, %v3402_v10  ;;  %v3659_v7 = vld [vmem:[%s5544_s17 + $0x10] sm:$0xff]  ;;  %v3661_v10 = vld [vmem:[%s5544_s17 + $0x20] sm:$0xff] }
 0xa3c   : > { %v3429_v15 = vadd.f32 1e-05, %v3421_v9  ;;  %v4620_v9 = vpack.c.bf16 %v3660_v8, %v3659_v7 }
 0xa3d   : > { %v3428_v19 = vadd.f32 1e-05, %v3420_v49  ;;  %v3411_v23 = vpop.xlane.xlu1 %3410  ;;  %v3662_v49 = vld [vmem:[%s5544_s17 + $0x28] sm:$0xff] }
 0xa3e   : > { %4732 = vrsqrt.f32 %v3429_v15  ;;  %v3423_v24 = vmul.f32 0.0625, %v3411_v23  ;;  %v3408_v30 = vpop.xlane.xlu0 %3407  ;;  %v4624_v15 = vpack.c.bf16 %v3662_v49, %v3661_v10  ;;  %v3664_v23 = vld [vmem:[%s5544_s17 + $0x38] sm:$0xff] }
 0xa3f   : > { %4734 = vrsqrt.f32 %v3428_v19  ;;  %v3422_v13 = vmul.f32 0.0625, %v3408_v30  ;;  %v3663_v19 = vld [vmem:[%s5544_s17 + $0x30] sm:$0xff]  ;;  %v4040_v30 = vld [vmem:[%s5543_s16] ss:$0 sm:$0xff] }
 0xa40   : > { %v3431_v16 = vadd.f32 1e-05, %v3423_v24  ;;  %v4628_v24 = vpack.c.bf16 %v3664_v23, %v3663_v19 }
 0xa41   : > { %v3430_v31 = vadd.f32 1e-05, %v3422_v13  ;;  %v3417_v32 = vpop.xlane.xlu1 %3416 }
 0xa42   : > { %4736 = vrsqrt.f32 %v3431_v16  ;;  %v3425_v26 = vmul.f32 0.0625, %v3417_v32  ;;  %v3414_v33 = vpop.xlane.xlu0 %3413 }
 0xa43   : > { %4738 = vrsqrt.f32 %v3430_v31  ;;  %v3424_v35 = vmul.f32 0.0625, %v3414_v33 }
 0xa44   : > { %v4729_v42 = vpop.eup %4728  ;;  %v3433_v27 = vadd.f32 1e-05, %v3425_v26 }
 0xa45   : > { %v4731_v37 = vpop.eup %4730  ;;  %v3443_v25 = vmul.f32 %v4729_v42, %v5391_v18  ;;  %v3432_v44 = vadd.f32 1e-05, %v3424_v35 }
 0xa46   : > { %4740 = vrsqrt.f32 %v3433_v27  ;;  %v3442_v40 = vmul.f32 %v4731_v37, %v5394_v22 }
 0xa47   : > { %4742 = vrsqrt.f32 %v3432_v44  ;;  %v3457_v43 = vmul.f32 %v4038_v36, %v3443_v25 }
 0xa48   : > { %v4733_v0 = vpop.eup %4732  ;;  %v3456_v46 = vmul.f32 %v4038_v36, %v3442_v40 }
 0xa49   : > { %v4735_v59 = vpop.eup %4734  ;;  %v3445_v63 = vmul.f32 %v4733_v0, %v5401_v34  ;;  %v3471_v62 = vadd.f32 %v4039_v41, %v3457_v43 }
 0xa4a   : > { %v3470_v11 = vadd.f32 %v4039_v41, %v3456_v46  ;;  %v3444_v3 = vmul.f32 %v4735_v59, %v5405_v4 }
 0xa4b   : > { %v3459_v18 = vmul.f32 %v4038_v36, %v3445_v63 }
 0xa4c   : > { %v4737_v56 = vpop.eup %4736  ;;  %4468 = vmatprep.mubr.msk.f32.mxu1 %vm646_vm0, %v3470_v11  ;;  %v3458_v22 = vmul.f32 %v4038_v36, %v3444_v3 }
 0xa4d   : > { %v4739_v61 = vpop.eup %4738  ;;  %4469 = vmatmul.mubr.msk.f32.vlgmr.msra.gmra.mrb[36].mxu1 %vm646_vm0, %v3471_v62  ;;  %v3447_v48 = vmul.f32 %v4737_v56, %v5413_v45  ;;  %v3473_v51 = vadd.f32 %v4039_v41, %v3459_v18 }
 0xa4e   : > { %v3472_v12 = vadd.f32 %v4039_v41, %v3458_v22  ;;  %v3446_v50 = vmul.f32 %v4739_v61, %v5417_v60 }
 0xa4f   : > { %v3461_v52 = vmul.f32 %v4038_v36, %v3447_v48 }
 0xa50   : > { %v4741_v34 = vpop.eup %4740  ;;  %4471 = vmatprep.mubr.msk.f32.mxu1 %vm646_vm0, %v3472_v12  ;;  %v3460_v4 = vmul.f32 %v4038_v36, %v3446_v50 }
 0xa51   : > { %v4743_v53 = vpop.eup %4742  ;;  %4472 = vmatmul.mubr.msk.f32.gmra.mrb[38].mxu1 %vm646_vm0, %v3473_v51  ;;  %v3449_v55 = vmul.f32 %v4741_v34, %v5425_v2  ;;  %v3475_v57 = vadd.f32 %v4039_v41, %v3461_v52  ;;  %v3657_v2 = vld [vmem:[%s5544_s17] sm:$0xff] }
 0xa52   : > { %v3474_v28 = vadd.f32 %v4039_v41, %v3460_v4  ;;  %v3448_v21 = vmul.f32 %v4743_v53, %v5429_v39  ;;  %v3658_v39 = vld [vmem:[%s5544_s17 + $0x8] sm:$0xff] }
 0xa53   : > { %v3463_v29 = vmul.f32 %v4038_v36, %v3449_v55  ;;  %v4616_v6 = vpack.c.bf16 %v3658_v39, %v3657_v2 }
 0xa54   : > { %4474 = vmatprep.mubr.msk.f32.mxu1 %vm646_vm0, %v3474_v28  ;;  %v3462_v45 = vmul.f32 %v4038_v36, %v3448_v21 }
 0xa55   : > { %4475 = vmatmul.mubr.msk.f32.gmra.mrb[40].mxu1 %vm646_vm0, %v3475_v57  ;;  %v3477_v5 = vadd.f32 %v4039_v41, %v3463_v29  ;;  %4617 = vmatprep.subr.bf16.mxu1 %v4616_v6 }
 0xa56   : > { %v3476_v60 = vadd.f32 %v4039_v41, %v3462_v45  ;;  %4619 = vmatpush3.bf16.msra.mxu1 %v4616_v6 }
 0xa57   : > { %4621 = vmatprep.subr.bf16.mxu1 %v4620_v9 }
 0xa58   : > { %4477 = vmatprep.mubr.msk.f32.mxu1 %vm646_vm0, %v3476_v60 }
 0xa59   : > { %4478 = vmatmul.mubr.msk.f32.gmra.mrb[42].mxu1 %vm646_vm0, %v3477_v5 }
 0xa5a   : > { %4623 = vmatpush3.bf16.msra.mxu1 %v4620_v9 }
 0xa5b   : > { %4625 = vmatprep.subr.bf16.mxu1 %v4624_v15 }
 0xa5e   : > { %4627 = vmatpush3.bf16.msra.mxu1 %v4624_v15 }
 0xa5f   : > { %4629 = vmatprep.subr.bf16.mxu1 %v4628_v24 }
 0xa62   : > { %4631 = vmatpush3.bf16.msra.mxu1 %v4628_v24 }
 0xb20   : > { %v4470_v13 = vpop.f32.mrb[36].mxu1 }
 0xb21   : > { %v3583_v16 = vadd.f32 %v4470_v13, %v4040_v30  ;;  %v3577_v31 = vpop.f32.mrb[37].mxu1 }
 0xb22   : > { %v3578_v32 = vadd.f32 %v4040_v30, %v3577_v31 }
 0xb23   : > { %v3626_v26 = vmul.f32 0.70710677, %v3583_v16  ;;  %v3617_v50 = vmul.f32 0.5, %v3583_v16  ;;  %v4057_v16 = vld [vmem:[%s5545_s18] ss:$0 sm:$0xff] }
 0xb24   : > { %v3625_v33 = vmul.f32 0.70710677, %v3578_v32  ;;  %v4473_v35 = vpop.f32.mrb[38].mxu1  ;;  %v3616_v48 = vmul.f32 0.5, %v3578_v32 }
 0xb25   : > { %4744 = verf.f32 %v3626_v26  ;;  %v3593_v42 = vadd.f32 %v4473_v35, %v4040_v30  ;;  %v3587_v27 = vpop.f32.mrb[39].mxu1 }
 0xb26   : > { %4746 = verf.f32 %v3625_v33  ;;  %v3588_v36 = vadd.f32 %v4040_v30, %v3587_v27 }
 0xb27   : > { %v3628_v37 = vmul.f32 0.70710677, %v3593_v42  ;;  %v3619_v21 = vmul.f32 0.5, %v3593_v42 }
 0xb28   : > { %v3627_v25 = vmul.f32 0.70710677, %v3588_v36  ;;  %v4476_v44 = vpop.f32.mrb[40].mxu1  ;;  %v3618_v55 = vmul.f32 0.5, %v3588_v36 }
 0xb29   : > { %4748 = verf.f32 %v3628_v37  ;;  %v3603_v40 = vadd.f32 %v4476_v44, %v4040_v30  ;;  %v3597_v41 = vpop.f32.mrb[41].mxu1 }
 0xb2a   : > { %4750 = verf.f32 %v3627_v25  ;;  %v3598_v43 = vadd.f32 %v4040_v30, %v3597_v41 }
 0xb2b   : > { %v3630_v0 = vmul.f32 0.70710677, %v3603_v40  ;;  %v3621_v6 = vmul.f32 0.5, %v3603_v40 }
 0xb2c   : > { %v3629_v46 = vmul.f32 0.70710677, %v3598_v43  ;;  %v4479_v59 = vpop.f32.mrb[42].mxu1  ;;  %v3620_v2 = vmul.f32 0.5, %v3598_v43 }
 0xb2d   : > { %4752 = verf.f32 %v3630_v0  ;;  %v3613_v63 = vadd.f32 %v4479_v59, %v4040_v30  ;;  %v3607_v11 = vpop.f32.mrb[43].mxu1 }
 0xb2e   : > { %4754 = verf.f32 %v3629_v46  ;;  %v3608_v3 = vadd.f32 %v4040_v30, %v3607_v11 }
 0xb2f   : > { %v4745_v62 = vpop.eup %4744  ;;  %v3632_v18 = vmul.f32 0.70710677, %v3613_v63  ;;  %v3623_v23 = vmul.f32 0.5, %v3613_v63 }
 0xb30   : > { %v4747_v56 = vpop.eup %4746  ;;  %v3642_v22 = vadd.f32 1.0, %v4745_v62  ;;  %v3631_v61 = vmul.f32 0.70710677, %v3608_v3  ;;  %v3622_v15 = vmul.f32 0.5, %v3608_v3 }
 0xb31   : > { %v3641_v12 = vadd.f32 1.0, %v4747_v56  ;;  %4756 = verf.f32 %v3632_v18 }
 0xb32   : > { %4758 = verf.f32 %v3631_v61  ;;  %v3650_v4 = vmul.f32 %v3642_v22, %v3617_v50 }
 0xb33   : > { %v4749_v51 = vpop.eup %4748  ;;  %v3649_v52 = vmul.f32 %v3641_v12, %v3616_v48 }
 0xb34   : > { %v4751_v34 = vpop.eup %4750  ;;  %v3644_v53 = vadd.f32 1.0, %v4749_v51 }
 0xb35   : > { %v3643_v28 = vadd.f32 1.0, %v4751_v34  ;;  %4496 = vmatprep.mubr.msk.f32.mxu1 %vm3665_vm3, %v3649_v52 }
 0xb36   : > { %4497 = vmatmul.mubr.msk.f32.vlgmr.msra.gmra.mrb[44].mxu1 %vm3665_vm3, %v3650_v4  ;;  %v3652_v60 = vmul.f32 %v3644_v53, %v3619_v21 }
 0xb37   : > { %v4753_v57 = vpop.eup %4752  ;;  %v3651_v29 = vmul.f32 %v3643_v28, %v3618_v55 }
 0xb38   : > { %v4755_v45 = vpop.eup %4754  ;;  %v3646_v5 = vadd.f32 1.0, %v4753_v57 }
 0xb39   : > { %v3645_v39 = vadd.f32 1.0, %v4755_v45  ;;  %4499 = vmatprep.mubr.msk.f32.mxu1 %vm3665_vm3, %v3651_v29 }
 0xb3a   : > { %4500 = vmatmul.mubr.msk.f32.gmra.mrb[46].mxu1 %vm3665_vm3, %v3652_v60  ;;  %v3654_v10 = vmul.f32 %v3646_v5, %v3621_v6 }
 0xb3b   : > { %v4757_v7 = vpop.eup %4756  ;;  %v3653_v8 = vmul.f32 %v3645_v39, %v3620_v2 }
 0xb3c   : > { %v4759_v9 = vpop.eup %4758  ;;  %v3648_v49 = vadd.f32 1.0, %v4757_v7 }
 0xb3d   : > { %v3647_v19 = vadd.f32 1.0, %v4759_v9  ;;  %4502 = vmatprep.mubr.msk.f32.mxu1 %vm3665_vm3, %v3653_v8 }
 0xb3e   : > { %4503 = vmatmul.mubr.msk.f32.gmra.mrb[48].mxu1 %vm3665_vm3, %v3654_v10  ;;  %v3656_v30 = vmul.f32 %v3648_v49, %v3623_v23 }
 0xb3f   : > { %v3655_v24 = vmul.f32 %v3647_v19, %v3622_v15 }
 0xb41   : > { %4505 = vmatprep.mubr.msk.f32.mxu1 %vm3665_vm3, %v3655_v24 }
 0xb42   : > { %4506 = vmatmul.mubr.msk.f32.gmra.mrb[50].mxu1 %vm3665_vm3, %v3656_v30 }
 0xc09   : > { %v4498_v13 = vpop.f32.mrb[44].mxu1 }
 0xc0a   : > { %v3796_v31 = vadd.f32 %v4498_v13, %v5351_v1  ;;  %v3756_v32 = vpop.f32.mrb[45].mxu1 }
 0xc0b   : > { %v3795_v26 = vadd.f32 %v3756_v32, %v5354_v54 }
 0xc0c   : > { %v3811_v33 = vadd.f32 %v4057_v16, %v3796_v31 }
 0xc0d   : > { %v3810_v35 = vadd.f32 %v4057_v16, %v3795_v26  ;;  %v4501_v42 = vpop.f32.mrb[46].mxu1 }
 0xc0e   : > { %3819 = vst.msk [vmem:[%s626_s20 + $0x8] sm:$0xff] %vm646_vm0, %v3811_v33  ;;  %v3798_v27 = vadd.f32 %v4501_v42, %v5361_v47  ;;  %v3766_v36 = vpop.f32.mrb[47].mxu1 }
 0xc0f   : > { %3818 = vst.msk [vmem:[%s626_s20] sm:$0xff] %vm646_vm0, %v3810_v35  ;;  %v3797_v37 = vadd.f32 %v3766_v36, %v5364_v20 }
 0xc10   : > { %v3813_v1 = vadd.f32 %v4057_v16, %v3798_v27 }
 0xc11   : > { %v3812_v25 = vadd.f32 %v4057_v16, %v3797_v37  ;;  %v4504_v44 = vpop.f32.mrb[48].mxu1 }
 0xc12   : > { %3821 = vst.msk [vmem:[%s626_s20 + $0x18] sm:$0xff] %vm646_vm0, %v3813_v1  ;;  %v3800_v40 = vadd.f32 %v4504_v44, %v5371_v58  ;;  %v3776_v54 = vpop.f32.mrb[49].mxu1 }
 0xc13   : > { %3820 = vst.msk [vmem:[%s626_s20 + $0x10] sm:$0xff] %vm646_vm0, %v3812_v25  ;;  %v3799_v41 = vadd.f32 %v3776_v54, %v5374_v38 }
 0xc14   : > { %v3815_v43 = vadd.f32 %v4057_v16, %v3800_v40 }
 0xc15   : > { %v3814_v0 = vadd.f32 %v4057_v16, %v3799_v41  ;;  %v4507_v47 = vpop.f32.mrb[50].mxu1 }
 0xc16   : > { %3823 = vst.msk [vmem:[%s626_s20 + $0x28] sm:$0xff] %vm646_vm0, %v3815_v43  ;;  %v3802_v46 = vadd.f32 %v4507_v47, %v5381_v14  ;;  %v3786_v20 = vpop.f32.mrb[51].mxu1 }
 0xc17   : > { %3822 = vst.msk [vmem:[%s626_s20 + $0x20] sm:$0xff] %vm646_vm0, %v3814_v0  ;;  %v3801_v59 = vadd.f32 %v3786_v20, %v5384_v17 }
 0xc18   : > { %v3817_v63 = vadd.f32 %v4057_v16, %v3802_v46 }
 0xc19   : > { %v3816_v11 = vadd.f32 %v4057_v16, %v3801_v59 }
 0xc1a   : > { %3825 = vst.msk [vmem:[%s626_s20 + $0x38] sm:$0xff] %vm646_vm0, %v3817_v63 }
 0xc1b   : > { %3824 = vst.msk [vmem:[%s626_s20 + $0x30] sm:$0xff] %vm646_vm0, %v3816_v11 }
 0xc1c PF: > { %s29_s0 = sadd.s32 1, %s4774_s0  }
 0xc1d   : > { %p26_p4 = scmp.ge.s32.totalorder %s29_s0, 4  }
 0xc1f   :  { %28 = sbr.rel (!%p26_p4) target bundleno = 5 (0x5), region = 137 }

// kernel: basic_block_forward.4
= control target key start
LH: loop header
LB: loop body
LE: loop exit
PB: predicated region body
PF: predicated region fallthrough
CT: control target
= control target key end

     0   :  { %s5581_s0 = inlined_call_operand.vmem [shape: f32[128,16], index: 0, kind: input, shape index: {}]   ;;  %s5582_s1 = inlined_call_operand.vmem [shape: f32[128,16], index: 1, kind: input, shape index: {}]   ;;  %s5583_s2 = inlined_call_operand.vmem [shape: f32[2,4,16,16], index: 2, kind: input, shape index: {}]   ;;  %s5584_s3 = inlined_call_operand.vmem [shape: f32[1,16], index: 3, kind: input, shape index: {}]   ;;  %s5585_s4 = inlined_call_operand.vmem [shape: f32[1,16], index: 4, kind: input, shape index: {}]   ;;  %s5586_s5 = inlined_call_operand.vmem [shape: f32[2,16,8], index: 5, kind: input, shape index: {}]   ;;  %s5587_s6 = inlined_call_operand.vmem [shape: f32[2,1,8], index: 6, kind: input, shape index: {}]   ;;  %s5588_s7 = inlined_call_operand.vmem [shape: f32[2,16,8], index: 7, kind: input, shape index: {}]   ;;  %s5589_s8 = inlined_call_operand.vmem [shape: f32[2,1,8], index: 8, kind: input, shape index: {}]   ;;  %s5590_s9 = inlined_call_operand.vmem [shape: f32[2,16,8], index: 9, kind: input, shape index: {}]   ;;  %s5591_s10 = inlined_call_operand.vmem [shape: f32[2,1,8], index: 10, kind: input, shape index: {}]   ;;  %s5592_s11 = inlined_call_operand.vmem [shape: f32[2,8,16], index: 11, kind: input, shape index: {}]   ;;  %s5593_s12 = inlined_call_operand.vmem [shape: f32[1,16], index: 12, kind: input, shape index: {}]   ;;  %s5594_s13 = inlined_call_operand.vmem [shape: f32[1,16], index: 13, kind: input, shape index: {}]   ;;  %s5595_s14 = inlined_call_operand.vmem [shape: f32[1,16], index: 14, kind: input, shape index: {}]   ;;  %s5596_s15 = inlined_call_operand.vmem [shape: f32[16,64], index: 15, kind: input, shape index: {}]   ;;  %s5597_s16 = inlined_call_operand.vmem [shape: f32[1,64], index: 16, kind: input, shape index: {}]   ;;  %s5598_s17 = inlined_call_operand.vmem [shape: f32[64,16], index: 17, kind: input, shape index: {}]   ;;  %s5599_s18 = inlined_call_operand.vmem [shape: f32[1,16], index: 18, kind: input, shape index: {}]   ;;  %s5600_s19 = inlined_call_operand.vmem [shape: f32[128,16], index: 19, kind: output, shape index: {}]  }
   0x1   :  { %5602 = sst [smem:[#allocation2_spill]] %s5581_s0  ;;  %s4894_s0 = smov 0  }
   0x2   :  { %5603 = sst [smem:[#allocation3_spill]] %s5582_s1 }
   0x3   :  { %5604 = sst [smem:[#allocation4_spill]] %s5583_s2 }
   0x4   :  { %5605 = sst [smem:[#allocation5_spill]] %s5584_s3 }
   0x5 LB: > { %s3906_s30 = sadd.s32 4294967295, %s4792_s0   ;;  %p3910_p0 = scmp.ge.s32.totalorder %s4792_s0, 1  ;;  %s4792_s0 = sphi %s4894_s0, %s29_s0  }
   0x6   : > { %p549_p1 = scmp.lt.s32.totalorder %s4792_s0, 3 }
   0x8   : > { %p550_p2 = pnand %p3910_p0, %p549_p1 }
   0x9   : > { %s3911_s20 = sshll.u32 (!%p550_p2), %s3906_s30, 3  ;;  %vm646_vm0 = vcmask (!%p550_p2), 130048   ;;  %s5606_s2 = sld [smem:[#allocation2_spill]] (!%p550_p2)  ;;  %v780_v56 = vld [vmem:[%s5586_s5] sm:$0xff] (!%p550_p2)  ;;  %v781_v57 = vld [vmem:[%s5586_s5 + $0x8] sm:$0xff] (!%p550_p2)  ;;  %vm1178_vm1 = vcmask (!%p550_p2), 64512  }
   0xa   : > { %553 = sbr.rel (%p550_p2) target bundleno = 3100 (0xc1c), region = 96  ;;  %p611_p3 = scmp.lt.s32.totalorder (!%p550_p2), %s3911_s20, 15  ;;  %v4526_v58 = vpack.c.bf16 (!%p550_p2), %v781_v57, %v780_v56  ;;  %vm5105_vm2 = vmpackc.low (!%p550_p2), %vm1178_vm1, %vm1178_vm1  ;;  %vm3677_vm3 = vcmask (!%p550_p2), 523264  }
   0xb   : > { %s5607_s29 = sld [smem:[#allocation3_spill]] (!%p550_p2)  ;;  %s5611_s28 = sld [smem:[#allocation4_spill]] (!%p550_p2) }
   0xc   : > { %4527 = vmatprep.subr.bf16.mxu0 (!%p550_p2), %v4526_v58 }
   0xd   : > { %4529 = vmatpush3.bf16.msra.mxu0 (!%p550_p2), %v4526_v58 }
  0x11   : > { %s5613_s20 = smov (!%p611_p3, %s3911_s20), 15 }
  0x12   : > { %s4902_s21 = sshll.u32 %s5613_s20, 3 }
  0x13   : > { %s4908_s23 = scalar_lea.vmem %s5606_s2, %s4902_s21  ;;  %s620_s30 = scalar_lea.vmem %s5607_s29, %s4902_s21 }
  0x14   : > { %v628_v0 = vld [vmem:[%s4908_s23] sm:$0xff]  ;;  %v630_v1 = vld [vmem:[%s4908_s23 + $0x10] sm:$0xff]  ;;  %v629_v2 = vld [vmem:[%s4908_s23 + $0x8] sm:$0xff]  ;;  %s5608_s29 = sld [smem:[#allocation5_spill]]  ;;  %s626_s22 = scalar_lea.vmem %s5600_s19, %s4902_s21 }
  0x15   : > { %v647_v3 = vsel %vm646_vm0, %v628_v0, 0.0  ;;  %v653_v4 = vsel %vm646_vm0, %v630_v1, 0.0  ;;  %v631_v5 = vld [vmem:[%s4908_s23 + $0x18] sm:$0xff]  ;;  %v650_v6 = vsel %vm646_vm0, %v629_v2, 0.0  ;;  %v632_v8 = vld [vmem:[%s4908_s23 + $0x20] sm:$0xff]  ;;  %v633_v9 = vld [vmem:[%s4908_s23 + $0x28] sm:$0xff] }
  0x16   : > { %648 = vadd.xlane.f32.xlu0 %v647_v3  ;;  %654 = vadd.xlane.f32.xlu1 %v653_v4  ;;  %v656_v7 = vsel %vm646_vm0, %v631_v5, 0.0  ;;  %v659_v10 = vsel %vm646_vm0, %v632_v8, 0.0  ;;  %v662_v11 = vsel %vm646_vm0, %v633_v9, 0.0  ;;  %v634_v12 = vld [vmem:[%s4908_s23 + $0x30] sm:$0xff]  ;;  %v635_v13 = vld [vmem:[%s4908_s23 + $0x38] sm:$0xff]  ;;  %v4976_v59 = vld [vmem:[%s620_s30] sm:$0xff] }
  0x17   : > { %v665_v14 = vsel %vm646_vm0, %v634_v12, 0.0  ;;  %v668_v15 = vsel %vm646_vm0, %v635_v13, 0.0  ;;  %4250 = vmatprep.mubr.msk.f32.mxu0 %vm646_vm0, %v4976_v59  ;;  %v4980_v60 = vld [vmem:[%s620_s30 + $0x8] sm:$0xff]  ;;  %v4984_v61 = vld [vmem:[%s620_s30 + $0x10] sm:$0xff]  ;;  %v4988_v62 = vld [vmem:[%s620_s30 + $0x18] sm:$0xff] }
  0x18   : > { %4251 = vmatmul.mubr.msk.f32.vlgmr.msra.gmra.mrb[0].mxu0 %vm646_vm0, %v4980_v60  ;;  %v4992_v63 = vld [vmem:[%s620_s30 + $0x20] sm:$0xff]  ;;  %v919_v3 = vld [vmem:[%s5588_s7 + $0x8] sm:$0xff]  ;;  %v5010_v4 = vld [vmem:[%s620_s30 + $0x38] sm:$0xff] }
  0x19   : > { %4253 = vmatprep.mubr.msk.f32.mxu0 %vm646_vm0, %v4984_v61 }
  0x1a   : > { %651 = vadd.xlane.f32.xlu0 %v650_v6  ;;  %657 = vadd.xlane.f32.xlu1 %v656_v7  ;;  %v1056_v6 = vld [vmem:[%s5590_s9] sm:$0xff]  ;;  %v1057_v7 = vld [vmem:[%s5590_s9 + $0x8] sm:$0xff] }
  0x1c   : > { %4254 = vmatmul.mubr.msk.f32.gmra.mrb[2].mxu0 %vm646_vm0, %v4988_v62 }
  0x1d   : > { %4256 = vmatprep.mubr.msk.f32.mxu0 %vm646_vm0, %v4992_v63 }
  0x1e   : > { %660 = vadd.xlane.f32.xlu0 %v659_v10  ;;  %663 = vadd.xlane.f32.xlu1 %v662_v11 }
  0x22   : > { %666 = vadd.xlane.f32.xlu0 %v665_v14  ;;  %669 = vadd.xlane.f32.xlu1 %v668_v15 }
  0xa3   : > { %v649_v16 = vpop.xlane.xlu0 %648  ;;  %v655_v17 = vpop.xlane.xlu1 %654 }
  0xa4   : > { %v672_v18 = vmul.f32 0.0625, %v649_v16  ;;  %v674_v19 = vmul.f32 0.0625, %v655_v17 }
  0xa6   : > { %v4926_v20 = vsub.f32 %v628_v0, %v672_v18  ;;  %v4928_v21 = vsub.f32 %v630_v1, %v674_v19  ;;  %v4996_v0 = vld [vmem:[%s620_s30 + $0x28] sm:$0xff]  ;;  %v5000_v1 = vld [vmem:[%s620_s30 + $0x30] sm:$0xff] }
  0xa7   : > { %v652_v22 = vpop.xlane.xlu0 %651  ;;  %v658_v23 = vpop.xlane.xlu1 %657  ;;  %4257 = vmatmul.mubr.msk.f32.gmra.mrb[4].mxu0 %vm646_vm0, %v4996_v0 }
  0xa8   : > { %v673_v24 = vmul.f32 0.0625, %v652_v22  ;;  %v675_v25 = vmul.f32 0.0625, %v658_v23  ;;  %v688_v26 = vmul.f32 %v4926_v20, %v4926_v20  ;;  %v690_v27 = vmul.f32 %v4928_v21, %v4928_v21  ;;  %4259 = vmatprep.mubr.msk.f32.mxu0 %vm646_vm0, %v5000_v1 }
  0xaa   : > { %v4934_v28 = vsub.f32 %v629_v2, %v673_v24  ;;  %v4936_v29 = vsub.f32 %v631_v5, %v675_v25  ;;  %v696_v30 = vsel %vm646_vm0, %v688_v26, 0.0  ;;  %v702_v33 = vsel %vm646_vm0, %v690_v27, 0.0  ;;  %v918_v2 = vld [vmem:[%s5588_s7] sm:$0xff] }
  0xab   : > { %697 = vadd.xlane.f32.xlu0 %v696_v30  ;;  %v661_v31 = vpop.xlane.xlu0 %660  ;;  %v664_v32 = vpop.xlane.xlu1 %663  ;;  %v4530_v5 = vpack.c.bf16 %v919_v3, %v918_v2  ;;  %4260 = vmatmul.mubr.msk.f32.gmra.mrb[6].mxu0 %vm646_vm0, %v5010_v4 }
  0xac   : > { %v676_v34 = vmul.f32 0.0625, %v661_v31  ;;  %v677_v35 = vmul.f32 0.0625, %v664_v32  ;;  %v689_v36 = vmul.f32 %v4934_v28, %v4934_v28  ;;  %v691_v37 = vmul.f32 %v4936_v29, %v4936_v29 }
  0xad   : > { %4531 = vmatprep.subr.bf16.mxu1 %v4530_v5 }
  0xae   : > { %v4944_v38 = vsub.f32 %v632_v8, %v676_v34  ;;  %v4946_v39 = vsub.f32 %v633_v9, %v677_v35  ;;  %v699_v40 = vsel %vm646_vm0, %v689_v36, 0.0  ;;  %v705_v43 = vsel %vm646_vm0, %v691_v37, 0.0  ;;  %4533 = vmatpush3.bf16.msra.mxu1 %v4530_v5  ;;  %v3917_v35 = vld [vmem:[%s5608_s29] ss:$0 sm:$0xff] }
  0xaf   : > { %703 = vadd.xlane.f32.xlu0 %v702_v33  ;;  %700 = vadd.xlane.f32.xlu1 %v699_v40  ;;  %v667_v41 = vpop.xlane.xlu0 %666  ;;  %v670_v42 = vpop.xlane.xlu1 %669  ;;  %v4534_v8 = vpack.c.bf16 %v1057_v7, %v1056_v6 }
  0xb0   : > { %v678_v44 = vmul.f32 0.0625, %v667_v41  ;;  %v679_v45 = vmul.f32 0.0625, %v670_v42  ;;  %v692_v46 = vmul.f32 %v4944_v38, %v4944_v38  ;;  %v693_v47 = vmul.f32 %v4946_v39, %v4946_v39  ;;  %v3918_v41 = vld [vmem:[%s5585_s4] ss:$0 sm:$0xff] }
  0xb1   : > { %4535 = vmatprep.subr.bf16.mxu0 %v4534_v8 }
  0xb2   : > { %v4954_v48 = vsub.f32 %v634_v12, %v678_v44  ;;  %v4956_v49 = vsub.f32 %v635_v13, %v679_v45  ;;  %v708_v50 = vsel %vm646_vm0, %v692_v46, 0.0  ;;  %v711_v51 = vsel %vm646_vm0, %v693_v47, 0.0  ;;  %4537 = vmatpush3.bf16.msra.mxu0 %v4534_v8 }
  0xb3   : > { %706 = vadd.xlane.f32.xlu1 %v705_v43  ;;  %709 = vadd.xlane.f32.xlu0 %v708_v50 }
  0xb4   : > { %v694_v52 = vmul.f32 %v4954_v48, %v4954_v48  ;;  %v695_v53 = vmul.f32 %v4956_v49, %v4956_v49 }
  0xb6   : > { %v714_v54 = vsel %vm646_vm0, %v694_v52, 0.0  ;;  %v717_v55 = vsel %vm646_vm0, %v695_v53, 0.0 }
  0xb7   : > { %712 = vadd.xlane.f32.xlu1 %v711_v51  ;;  %715 = vadd.xlane.f32.xlu0 %v714_v54 }
  0xbb   : > { %718 = vadd.xlane.f32.xlu1 %v717_v55 }
 0x138   : > { %v698_v9 = vpop.xlane.xlu0 %697 }
 0x139   : > { %v720_v10 = vmul.f32 0.0625, %v698_v9 }
 0x13b   : > { %v728_v11 = vadd.f32 1e-05, %v720_v10 }
 0x13c   : > { %v701_v12 = vpop.xlane.xlu1 %700  ;;  %v704_v13 = vpop.xlane.xlu0 %703 }
 0x13d   : > { %4666 = vrsqrt.f32 %v728_v11  ;;  %v721_v14 = vmul.f32 0.0625, %v701_v12  ;;  %v722_v15 = vmul.f32 0.0625, %v704_v13  ;;  %v4252_v12 = vpop.f32.mrb[0].mxu0 }
 0x13f   : > { %v729_v16 = vadd.f32 1e-05, %v721_v14  ;;  %v730_v17 = vadd.f32 1e-05, %v722_v15  ;;  %v879_v14 = vpop.f32.mrb[1].mxu0 }
 0x140   : > { %v707_v18 = vpop.xlane.xlu1 %706  ;;  %v710_v19 = vpop.xlane.xlu0 %709 }
 0x141   : > { %4668 = vrsqrt.f32 %v729_v16  ;;  %v723_v22 = vmul.f32 0.0625, %v707_v18  ;;  %v724_v23 = vmul.f32 0.0625, %v710_v19  ;;  %v4255_v15 = vpop.f32.mrb[2].mxu0 }
 0x142   : > { %4670 = vrsqrt.f32 %v730_v17  ;;  %v889_v17 = vpop.f32.mrb[3].mxu0 }
 0x143   : > { %v731_v24 = vadd.f32 1e-05, %v723_v22  ;;  %v732_v25 = vadd.f32 1e-05, %v724_v23 }
 0x144   : > { %v713_v26 = vpop.xlane.xlu1 %712  ;;  %v716_v27 = vpop.xlane.xlu0 %715 }
 0x145   : > { %4672 = vrsqrt.f32 %v731_v24  ;;  %v725_v30 = vmul.f32 0.0625, %v713_v26  ;;  %v726_v31 = vmul.f32 0.0625, %v716_v27 }
 0x146   : > { %4674 = vrsqrt.f32 %v732_v25 }
 0x147   : > { %v4667_v32 = vpop.eup %4666  ;;  %v733_v33 = vadd.f32 1e-05, %v725_v30  ;;  %v734_v34 = vadd.f32 1e-05, %v726_v31 }
 0x148   : > { %v719_v36 = vpop.xlane.xlu1 %718  ;;  %v744_v37 = vmul.f32 %v4667_v32, %v4926_v20  ;;  %v3928_v32 = vld [vmem:[%s5589_s8] ss:$0 sm:$0xff] }
 0x149   : > { %4676 = vrsqrt.f32 %v733_v33  ;;  %v727_v40 = vmul.f32 0.0625, %v719_v36  ;;  %v3937_v33 = vld [vmem:[%s5591_s10] ss:$0 sm:$0xff] }
 0x14a   : > { %4678 = vrsqrt.f32 %v734_v34  ;;  %v758_v42 = vmul.f32 %v3917_v35, %v744_v37 }
 0x14b   : > { %v4669_v43 = vpop.eup %4668  ;;  %v735_v44 = vadd.f32 1e-05, %v727_v40 }
 0x14c   : > { %v4671_v45 = vpop.eup %4670  ;;  %v5027_v46 = vadd.f32 %v3918_v41, %v758_v42  ;;  %v745_v47 = vmul.f32 %v4669_v43, %v4934_v28 }
 0x14d   : > { %4680 = vrsqrt.f32 %v735_v44  ;;  %v746_v50 = vmul.f32 %v4671_v45, %v4928_v21 }
 0x14e   : > { %4266 = vmatprep.mubr.msk.f32.mxu1 %vm646_vm0, %v5027_v46  ;;  %4282 = vmatprep.mubr.msk.f32.mxu0 %vm646_vm0, %v5027_v46  ;;  %v759_v20 = vmul.f32 %v3917_v35, %v745_v47 }
 0x14f   : > { %v4673_v51 = vpop.eup %4672  ;;  %v760_v52 = vmul.f32 %v3917_v35, %v746_v50 }
 0x150   : > { %v4675_v53 = vpop.eup %4674  ;;  %v5035_v54 = vadd.f32 %v3918_v41, %v759_v20  ;;  %v747_v55 = vmul.f32 %v4673_v51, %v4936_v29 }
 0x151   : > { %v5038_v56 = vadd.f32 %v3918_v41, %v760_v52  ;;  %v748_v28 = vmul.f32 %v4675_v53, %v4944_v38 }
 0x152   : > { %4267 = vmatmul.mubr.msk.f32.vlgmr.msra.gmra.mrb[0].mxu1 %vm646_vm0, %v5035_v54  ;;  %4283 = vmatmul.mubr.msk.f32.vlgmr.msra.gmra.mrb[8].mxu0 %vm646_vm0, %v5035_v54  ;;  %v761_v21 = vmul.f32 %v3917_v35, %v747_v55 }
 0x153   : > { %v4677_v57 = vpop.eup %4676  ;;  %4269 = vmatprep.mubr.msk.f32.mxu1 %vm646_vm0, %v5038_v56  ;;  %4285 = vmatprep.mubr.msk.f32.mxu0 %vm646_vm0, %v5038_v56  ;;  %v762_v58 = vmul.f32 %v3917_v35, %v748_v28 }
 0x154   : > { %v4679_v29 = vpop.eup %4678  ;;  %v5049_v2 = vadd.f32 %v3918_v41, %v761_v21  ;;  %v749_v38 = vmul.f32 %v4677_v57, %v4946_v39 }
 0x155   : > { %v5052_v3 = vadd.f32 %v3918_v41, %v762_v58  ;;  %v750_v5 = vmul.f32 %v4679_v29, %v4954_v48 }
 0x156   : > { %4270 = vmatmul.mubr.msk.f32.gmra.mrb[2].mxu1 %vm646_vm0, %v5049_v2  ;;  %4286 = vmatmul.mubr.msk.f32.gmra.mrb[10].mxu0 %vm646_vm0, %v5049_v2  ;;  %v763_v6 = vmul.f32 %v3917_v35, %v749_v38 }
 0x157   : > { %v4681_v7 = vpop.eup %4680  ;;  %4272 = vmatprep.mubr.msk.f32.mxu1 %vm646_vm0, %v5052_v3  ;;  %4288 = vmatprep.mubr.msk.f32.mxu0 %vm646_vm0, %v5052_v3  ;;  %v764_v8 = vmul.f32 %v3917_v35, %v750_v5 }
 0x158   : > { %v5063_v39 = vadd.f32 %v3918_v41, %v763_v6  ;;  %v751_v9 = vmul.f32 %v4681_v7, %v4956_v49  ;;  %v3919_v49 = vld [vmem:[%s5587_s6] ss:$0 sm:$0xff] }
 0x159   : > { %v5066_v48 = vadd.f32 %v3918_v41, %v764_v8  ;;  %v885_v13 = vadd.f32 %v4252_v12, %v3919_v49  ;;  %v5085_v16 = vadd.f32 %v4255_v15, %v3919_v49  ;;  %v5087_v18 = vadd.f32 %v3919_v49, %v889_v17 }
 0x15a   : > { %4273 = vmatmul.mubr.msk.f32.gmra.mrb[4].mxu1 %vm646_vm0, %v5063_v39  ;;  %4289 = vmatmul.mubr.msk.f32.gmra.mrb[12].mxu0 %vm646_vm0, %v5063_v39  ;;  %v765_v10 = vmul.f32 %v3917_v35, %v751_v9  ;;  %v880_v30 = vadd.f32 %v3919_v49, %v879_v14 }
 0x15b   : > { %4275 = vmatprep.mubr.msk.f32.mxu1 %vm646_vm0, %v5066_v48  ;;  %4291 = vmatprep.mubr.msk.f32.mxu0 %vm646_vm0, %v5066_v48 }
 0x15c   : > { %v5076_v11 = vadd.f32 %v3918_v41, %v765_v10 }
 0x15e   : > { %4276 = vmatmul.mubr.msk.f32.gmra.mrb[6].mxu1 %vm646_vm0, %v5076_v11  ;;  %4292 = vmatmul.mubr.msk.f32.gmra.mrb[14].mxu0 %vm646_vm0, %v5076_v11 }
 0x15f   : > { %4298 = vmatprep.mubr.msk.f32.mxu1 %vm1178_vm1, %v880_v30 }
 0x17a   : > { %v4258_v19 = vpop.f32.mrb[4].mxu0 }
 0x17b   : > { %v5089_v22 = vadd.f32 %v4258_v19, %v3919_v49  ;;  %v899_v23 = vpop.f32.mrb[5].mxu0 }
 0x17c   : > { %v900_v31 = vadd.f32 %v3919_v49, %v899_v23 }
 0x17e   : > { %v4261_v24 = vpop.f32.mrb[6].mxu0  ;;  %4312 = vmatprep.mubr.msk.f32.mxu0 %vm1178_vm1, %v900_v31 }
 0x17f   : > { %v5091_v25 = vadd.f32 %v4261_v24, %v3919_v49  ;;  %v909_v26 = vpop.f32.mrb[7].mxu0 }
 0x180   : > { %v5093_v27 = vadd.f32 %v3919_v49, %v909_v26 }
 0x225   : > { %v4268_v34 = vpop.f32.mrb[0].mxu1  ;;  %v4284_v35 = vpop.f32.mrb[8].mxu0 }
 0x226   : > { %v1023_v36 = vadd.f32 %v4268_v34, %v3928_v32  ;;  %v1137_v37 = vadd.f32 %v4284_v35, %v3937_v33  ;;  %v1017_v40 = vpop.f32.mrb[1].mxu1  ;;  %v1131_v41 = vpop.f32.mrb[9].mxu0 }
 0x227   : > { %v1018_v42 = vadd.f32 %v3928_v32, %v1017_v40  ;;  %v1132_v43 = vadd.f32 %v3937_v33, %v1131_v41  ;;  %v1177_v41 = vld [vmem:[%s5611_s28 + $0x38] sm:$0xff] }
 0x229   : > { %v4538_v45 = vpack.c.bf16 %v1023_v36, %v1018_v42  ;;  %v4562_v47 = vpack.c.bf16 %v1137_v37, %v1132_v43  ;;  %v4271_v50 = vpop.f32.mrb[2].mxu1  ;;  %v4287_v20 = vpop.f32.mrb[10].mxu0  ;;  %v1176_v42 = vld [vmem:[%s5611_s28 + $0x30] sm:$0xff]  ;;  %v1171_v43 = vld [vmem:[%s5611_s28 + $0x8] sm:$0xff] }
 0x22a   : > { %v1033_v51 = vadd.f32 %v4271_v50, %v3928_v32  ;;  %v1147_v52 = vadd.f32 %v4287_v20, %v3937_v33  ;;  %v1027_v53 = vpop.f32.mrb[3].mxu1  ;;  %v1141_v55 = vpop.f32.mrb[11].mxu0 }
 0x22b   : > { %v1028_v28 = vadd.f32 %v3928_v32, %v1027_v53  ;;  %v1142_v21 = vadd.f32 %v3937_v33, %v1141_v55  ;;  %4540 = vmatprep.subr.msk.bf16.mxu1 %vm5105_vm2, %v4538_v45 }
 0x22c   : > { %4543 = vmatpush3.bf16.xpose.msk.msra.mxu1 %vm5105_vm2, %v4538_v45 }
 0x22d   : > { %v4544_v57 = vpack.c.bf16 %v1033_v51, %v1028_v28  ;;  %v4566_v58 = vpack.c.bf16 %v1147_v52, %v1142_v21  ;;  %v4274_v29 = vpop.f32.mrb[4].mxu1  ;;  %v4290_v38 = vpop.f32.mrb[12].mxu0  ;;  %v1175_v28 = vld [vmem:[%s5611_s28 + $0x28] sm:$0xff] }
 0x22e   : > { %v1043_v5 = vadd.f32 %v4274_v29, %v3928_v32  ;;  %v1157_v6 = vadd.f32 %v4290_v38, %v3937_v33  ;;  %v1037_v7 = vpop.f32.mrb[5].mxu1  ;;  %v1151_v8 = vpop.f32.mrb[13].mxu0 }
 0x22f   : > { %v1038_v9 = vadd.f32 %v3928_v32, %v1037_v7  ;;  %v1152_v10 = vadd.f32 %v3937_v33, %v1151_v8  ;;  %4546 = vmatprep.subr.msk.bf16.mxu1 %vm5105_vm2, %v4544_v57 }
 0x231   : > { %v4550_v49 = vpack.c.bf16 %v1043_v5, %v1038_v9  ;;  %v5115_v12 = vpack.c.bf16 %v1157_v6, %v1152_v10  ;;  %v4277_v14 = vpop.f32.mrb[6].mxu1  ;;  %v4293_v15 = vpop.f32.mrb[14].mxu0 }
 0x232   : > { %v1053_v17 = vadd.f32 %v4277_v14, %v3928_v32  ;;  %v1167_v19 = vadd.f32 %v4293_v15, %v3937_v33  ;;  %v1047_v23 = vpop.f32.mrb[7].mxu1  ;;  %v1161_v24 = vpop.f32.mrb[15].mxu0 }
 0x233   : > { %v1048_v26 = vadd.f32 %v3928_v32, %v1047_v23  ;;  %v1162_v30 = vadd.f32 %v3937_v33, %v1161_v24  ;;  %4299 = vmatmul.mubr.msk.f32.vlgmr.msra.gmra.mrb[8].mxu1 %vm1178_vm1, %v885_v13  ;;  %4552 = vmatprep.subr.msk.bf16.mxu0 %vm5105_vm2, %v4550_v49 }
 0x234   : > { %4549 = vmatpush3.bf16.xpose.msk.msra.mxu1 %vm5105_vm2, %v4544_v57  ;;  %4555 = vmatpush3.bf16.xpose.msk.msra.mxu0 %vm5105_vm2, %v4550_v49  ;;  %v1174_v57 = vld [vmem:[%s5611_s28 + $0x20] sm:$0xff] }
 0x235   : > { %v4556_v31 = vpack.c.bf16 %v1053_v17, %v1048_v26  ;;  %v5124_v34 = vpack.c.bf16 %v1167_v19, %v1162_v30  ;;  %4563 = vmatprep.subr.bf16.mxu0 %v4562_v47  ;;  %4305 = vmatprep.mubr.msk.f32.mxu1 %vm1178_vm1, %v5087_v18  ;;  %v1173_v18 = vld [vmem:[%s5611_s28 + $0x18] sm:$0xff] }
 0x237   : > { %4558 = vmatprep.subr.msk.bf16.mxu1 %vm5105_vm2, %v4556_v31 }
 0x23b   : > { %4306 = vmatmul.mubr.msk.f32.vlgmr.msra.gmra.mrb[10].mxu1 %vm1178_vm1, %v5085_v16  ;;  %4313 = vmatmul.mubr.msk.f32.vlgmr.msra.gmra.mrb[16].mxu0 %vm1178_vm1, %v5089_v22  ;;  %v1172_v22 = vld [vmem:[%s5611_s28 + $0x10] sm:$0xff] }
 0x23c   : > { %4561 = vmatpush3.bf16.xpose.msk.msra.mxu1 %vm5105_vm2, %v4556_v31  ;;  %4565 = vmatpush3.bf16.msra.mxu0 %v4562_v47  ;;  %v1170_v47 = vld [vmem:[%s5611_s28] sm:$0xff] }
 0x23d   : > { %4567 = vmatprep.subr.bf16.mxu1 %v4566_v58  ;;  %4571 = vmatprep.subr.bf16.mxu0 %v5115_v12 }
 0x23e   : > { %4319 = vmatprep.mubr.msk.f32.mxu1 %vm1178_vm1, %v5093_v27 }
 0x243   : > { %4320 = vmatmul.mubr.msk.f32.vlgmr.msra.gmra.mrb[12].mxu1 %vm1178_vm1, %v5091_v25 }
 0x244   : > { %4569 = vmatpush3.bf16.msra.mxu1 %v4566_v58 }
 0x245   : > { %4575 = vmatprep.subr.bf16.mxu1 %v5124_v34 }
 0x306   : > { %v4300_v13 = vpop.f32.mrb[8].mxu1 }
 0x307   : > { %v1257_v16 = vpop.f32.mrb[9].mxu1  ;;  %v1263_v52 = vadd.f32 %v4300_v13, %v1171_v43 }
 0x308   : > { %v1258_v55 = vadd.f32 %v1257_v16, %v1170_v47 }
 0x309   : > { %v1530_v29 = vsel %vm646_vm0, %v1263_v52, -inf }
 0x30a   : > { %v1527_v5 = vsel %vm646_vm0, %v1258_v55, -inf }
 0x30e   : > { %v4307_v32 = vpop.f32.mrb[10].mxu1  ;;  %v4314_v33 = vpop.f32.mrb[16].mxu0 }
 0x30f   : > { %v1350_v35 = vadd.f32 %v4307_v32, %v1173_v18  ;;  %v1344_v27 = vpop.f32.mrb[11].mxu1  ;;  %v1431_v36 = vpop.f32.mrb[17].mxu0  ;;  %v1437_v58 = vadd.f32 %v4314_v33, %v1175_v28 }
 0x310   : > { %v1345_v37 = vadd.f32 %v1344_v27, %v1172_v22  ;;  %v1432_v38 = vadd.f32 %v1431_v36, %v1174_v57 }
 0x311   : > { %v1536_v25 = vsel %vm646_vm0, %v1350_v35, -inf  ;;  %v1542_v6 = vsel %vm646_vm0, %v1437_v58, -inf }
 0x312   : > { %1537 = vmax.xlane.f32.xlu1 %v1536_v25  ;;  %v1533_v40 = vsel %vm646_vm0, %v1345_v37, -inf  ;;  %v1539_v7 = vsel %vm646_vm0, %v1432_v38, -inf }
 0x313   : > { %1534 = vmax.xlane.f32.xlu0 %v1533_v40 }
 0x316   : > { %v4321_v45 = vpop.f32.mrb[12].mxu1 }
 0x317   : > { %v1524_v50 = vadd.f32 %v4321_v45, %v1177_v41  ;;  %v1518_v20 = vpop.f32.mrb[13].mxu1 }
 0x318   : > { %v1519_v51 = vadd.f32 %v1518_v20, %v1176_v42 }
 0x319   : > { %v1548_v53 = vsel %vm646_vm0, %v1524_v50, -inf }
 0x31a   : > { %1549 = vmax.xlane.f32.xlu1 %v1548_v53  ;;  %v1545_v21 = vsel %vm646_vm0, %v1519_v51, -inf }
 0x31b   : > { %1546 = vmax.xlane.f32.xlu0 %v1545_v21 }
 0x31e   : > { %1531 = vmax.xlane.f32.xlu1 %v1530_v29 }
 0x31f   : > { %1528 = vmax.xlane.f32.xlu0 %v1527_v5 }
 0x322   : > { %1543 = vmax.xlane.f32.xlu1 %v1542_v6 }
 0x323   : > { %1540 = vmax.xlane.f32.xlu0 %v1539_v7 }
 0x39f   : > { %v1538_v8 = vpop.xlane.xlu1 %1537 }
 0x3a0   : > { %v1554_v9 = vsub.f32 %v1350_v35, %v1538_v8  ;;  %v1535_v10 = vpop.xlane.xlu0 %1534 }
 0x3a1   : > { %v1553_v49 = vsub.f32 %v1345_v37, %v1535_v10 }
 0x3a2   : > { %v1565_v14 = vmul.f32 1.442695, %v1554_v9 }
 0x3a3   : > { %v1563_v15 = vmul.f32 1.442695, %v1553_v49 }
 0x3a4   : > { %4682 = vpow2.f32 %v1565_v14 }
 0x3a5   : > { %4684 = vpow2.f32 %v1563_v15 }
 0x3a7   : > { %v1550_v17 = vpop.xlane.xlu1 %1549 }
 0x3a8   : > { %v1558_v19 = vsub.f32 %v1524_v50, %v1550_v17  ;;  %v1547_v23 = vpop.xlane.xlu0 %1546 }
 0x3a9   : > { %v1557_v24 = vsub.f32 %v1519_v51, %v1547_v23  ;;  %v3983_v23 = vld [vmem:[%s5588_s7 + $0x18] sm:$0xff] }
 0x3aa   : > { %v1573_v26 = vmul.f32 1.442695, %v1558_v19  ;;  %v3982_v19 = vld [vmem:[%s5588_s7 + $0x10] sm:$0xff] }
 0x3ab   : > { %v1571_v30 = vmul.f32 1.442695, %v1557_v24  ;;  %v1532_v31 = vpop.xlane.xlu1 %1531 }
 0x3ac   : > { %4686 = vpow2.f32 %v1573_v26  ;;  %v1552_v13 = vsub.f32 %v1263_v52, %v1532_v31  ;;  %v1529_v16 = vpop.xlane.xlu0 %1528 }
 0x3ad   : > { %4688 = vpow2.f32 %v1571_v30  ;;  %v1551_v18 = vsub.f32 %v1258_v55, %v1529_v16  ;;  %v4582_v16 = vpack.c.bf16 %v3983_v23, %v3982_v19 }
 0x3ae   : > { %v4683_v22 = vpop.eup %4682  ;;  %v1561_v32 = vmul.f32 1.442695, %v1552_v13 }
 0x3af   : > { %v4685_v33 = vpop.eup %4684  ;;  %v1559_v35 = vmul.f32 1.442695, %v1551_v18  ;;  %v1544_v27 = vpop.xlane.xlu1 %1543  ;;  %v1584_v36 = vsel %vm646_vm0, %v4683_v22, 0.0 }
 0x3b0   : > { %4690 = vpow2.f32 %v1561_v32  ;;  %v1556_v37 = vsub.f32 %v1437_v58, %v1544_v27  ;;  %1585 = vadd.xlane.f32.xlu1 %v1584_v36  ;;  %v1541_v25 = vpop.xlane.xlu0 %1540  ;;  %v1581_v40 = vsel %vm646_vm0, %v4685_v33, 0.0 }
 0x3b1   : > { %4692 = vpow2.f32 %v1559_v35  ;;  %v1555_v41 = vsub.f32 %v1432_v38, %v1541_v25  ;;  %1582 = vadd.xlane.f32.xlu0 %v1581_v40  ;;  %v3971_v40 = vld [vmem:[%s5586_s5 + $0x18] sm:$0xff] }
 0x3b2   : > { %v1569_v42 = vmul.f32 1.442695, %v1556_v37 }
 0x3b3   : > { %v1567_v43 = vmul.f32 1.442695, %v1555_v41 }
 0x3b4   : > { %4694 = vpow2.f32 %v1569_v42 }
 0x3b5   : > { %4696 = vpow2.f32 %v1567_v43 }
 0x3b6   : > { %v4687_v45 = vpop.eup %4686 }
 0x3b7   : > { %v4689_v47 = vpop.eup %4688  ;;  %v1596_v50 = vsel %vm646_vm0, %v4687_v45, 0.0 }
 0x3b8   : > { %1597 = vadd.xlane.f32.xlu1 %v1596_v50  ;;  %v1593_v20 = vsel %vm646_vm0, %v4689_v47, 0.0  ;;  %v3995_v50 = vld [vmem:[%s5590_s9 + $0x18] sm:$0xff] }
 0x3b9   : > { %1594 = vadd.xlane.f32.xlu0 %v1593_v20 }
 0x3ba   : > { %v4691_v51 = vpop.eup %4690 }
 0x3bb   : > { %v4693_v52 = vpop.eup %4692  ;;  %v1578_v53 = vsel %vm646_vm0, %v4691_v51, 0.0 }
 0x3bc   : > { %1579 = vadd.xlane.f32.xlu1 %v1578_v53  ;;  %v1575_v55 = vsel %vm646_vm0, %v4693_v52, 0.0 }
 0x3bd   : > { %1576 = vadd.xlane.f32.xlu0 %v1575_v55 }
 0x3be   : > { %v5180_v28 = vpop.eup %4694 }
 0x3bf   : > { %v5182_v21 = vpop.eup %4696  ;;  %v1590_v57 = vsel %vm646_vm0, %v5180_v28, 0.0 }
 0x3c0   : > { %1591 = vadd.xlane.f32.xlu1 %v1590_v57  ;;  %v1587_v58 = vsel %vm646_vm0, %v5182_v21, 0.0 }
 0x3c1   : > { %1588 = vadd.xlane.f32.xlu0 %v1587_v58 }
 0x43d   : > { %v1586_v29 = vpop.xlane.xlu1 %1585 }
 0x43e   : > { %v1602_v38 = vadd.f32 1.0, %v1586_v29  ;;  %v1583_v5 = vpop.xlane.xlu0 %1582 }
 0x43f   : > { %v1601_v6 = vadd.f32 1.0, %v1583_v5 }
 0x440   : > { %4698 = vrcp.f32 %v1602_v38 }
 0x441   : > { %4700 = vrcp.f32 %v1601_v6 }
 0x445   : > { %v1598_v7 = vpop.xlane.xlu1 %1597 }
 0x446   : > { %v1606_v8 = vadd.f32 1.0, %v1598_v7  ;;  %v1595_v9 = vpop.xlane.xlu0 %1594 }
 0x447   : > { %v1605_v10 = vadd.f32 1.0, %v1595_v9 }
 0x448   : > { %4702 = vrcp.f32 %v1606_v8 }
 0x449   : > { %4704 = vrcp.f32 %v1605_v10  ;;  %v1580_v49 = vpop.xlane.xlu1 %1579 }
 0x44a   : > { %v4699_v14 = vpop.eup %4698  ;;  %v1600_v15 = vadd.f32 1.0, %v1580_v49  ;;  %v1577_v17 = vpop.xlane.xlu0 %1576 }
 0x44b   : > { %v4701_v24 = vpop.eup %4700  ;;  %v1599_v26 = vadd.f32 1.0, %v1577_v17  ;;  %v1618_v13 = vmul.f32 %v4699_v14, %v4683_v22  ;;  %v3970_v22 = vld [vmem:[%s5586_s5 + $0x10] sm:$0xff] }
 0x44c   : > { %4706 = vrcp.f32 %v1600_v15  ;;  %v1617_v30 = vmul.f32 %v4701_v24, %v4685_v33  ;;  %v4578_v43 = vpack.c.bf16 %v3971_v40, %v3970_v22 }
 0x44d   : > { %4708 = vrcp.f32 %v1599_v26  ;;  %v1592_v31 = vpop.xlane.xlu1 %1591 }
 0x44e   : > { %v1604_v18 = vadd.f32 1.0, %v1592_v31  ;;  %4333 = vmatprep.mubr.msk.f32.mxu1 %vm646_vm0, %v1617_v30  ;;  %v1589_v32 = vpop.xlane.xlu0 %1588 }
 0x44f   : > { %v1603_v35 = vadd.f32 1.0, %v1589_v32  ;;  %4334 = vmatmul.mubr.msk.f32.vlgmr.msra.gmra.mrb[14].mxu1 %vm646_vm0, %v1618_v13 }
 0x450   : > { %4710 = vrcp.f32 %v1604_v18  ;;  %4577 = vmatpush3.bf16.msra.mxu1 %v5124_v34 }
 0x451   : > { %4712 = vrcp.f32 %v1603_v35  ;;  %4583 = vmatprep.subr.bf16.mxu1 %v4582_v16 }
 0x452   : > { %v4703_v27 = vpop.eup %4702 }
 0x453   : > { %v4705_v36 = vpop.eup %4704  ;;  %v1622_v33 = vmul.f32 %v4703_v27, %v4687_v45  ;;  %v3997_v27 = vld [vmem:[%s5591_s10 + $0x1] ss:$0 sm:$0xff] }
 0x454   : > { %v1621_v37 = vmul.f32 %v4705_v36, %v4689_v47  ;;  %v3994_v47 = vld [vmem:[%s5590_s9 + $0x10] sm:$0xff] }
 0x455   : > { %v4586_v53 = vpack.c.bf16 %v3995_v50, %v3994_v47 }
 0x456   : > { %v4707_v25 = vpop.eup %4706  ;;  %4347 = vmatprep.mubr.msk.f32.mxu1 %vm646_vm0, %v1621_v37 }
 0x457   : > { %v4709_v41 = vpop.eup %4708  ;;  %4348 = vmatmul.mubr.msk.f32.vlgmr.msra.gmra.mrb[16].mxu1 %vm646_vm0, %v1622_v33  ;;  %v1616_v42 = vmul.f32 %v4707_v25, %v4691_v51 }
 0x458   : > { %4585 = vmatpush3.bf16.msra.mxu1 %v4582_v16  ;;  %4370 = vmatprep.mubr.msk.f32.mxu1 %vm646_vm0, %v5027_v46  ;;  %v1615_v34 = vmul.f32 %v4709_v41, %v4693_v52 }
 0x45a   : > { %v4711_v45 = vpop.eup %4710  ;;  %4326 = vmatprep.mubr.msk.f32.mxu0 %vm646_vm0, %v1615_v34 }
 0x45b   : > { %v4713_v20 = vpop.eup %4712  ;;  %4327 = vmatmul.mubr.msk.f32.vlgmr.msra.gmra.mrb[18].mxu0 %vm646_vm0, %v1616_v42  ;;  %4371 = vmatmul.mubr.msk.f32.vlgmr.msra.gmra.mrb[18].mxu1 %vm646_vm0, %v5035_v54  ;;  %v1620_v52 = vmul.f32 %v4711_v45, %v5180_v28  ;;  %v3973_v28 = vld [vmem:[%s5587_s6 + $0x1] ss:$0 sm:$0xff] }
 0x45c   : > { %4573 = vmatpush3.bf16.msra.mxu0 %v5115_v12  ;;  %4373 = vmatprep.mubr.msk.f32.mxu1 %vm646_vm0, %v5038_v56  ;;  %v1619_v51 = vmul.f32 %v4713_v20, %v5182_v21 }
 0x45d   : > { %4579 = vmatprep.subr.bf16.mxu0 %v4578_v43 }
 0x45e   : > { %4340 = vmatprep.mubr.msk.f32.mxu0 %vm646_vm0, %v1619_v51 }
 0x45f   : > { %4341 = vmatmul.mubr.msk.f32.vlgmr.msra.gmra.mrb[20].mxu0 %vm646_vm0, %v1620_v52  ;;  %4374 = vmatmul.mubr.msk.f32.gmra.mrb[20].mxu1 %vm646_vm0, %v5049_v2 }
 0x460   : > { %4581 = vmatpush3.bf16.msra.mxu0 %v4578_v43  ;;  %4376 = vmatprep.mubr.msk.f32.mxu1 %vm646_vm0, %v5052_v3 }
 0x461   : > { %4354 = vmatprep.mubr.msk.f32.mxu0 %vm646_vm0, %v4976_v59  ;;  %4587 = vmatprep.subr.bf16.mxu0 %v4586_v53 }
 0x463   : > { %4355 = vmatmul.mubr.msk.f32.vlgmr.msra.gmra.mrb[22].mxu0 %vm646_vm0, %v4980_v60  ;;  %4377 = vmatmul.mubr.msk.f32.gmra.mrb[22].mxu1 %vm646_vm0, %v5063_v39 }
 0x464   : > { %4379 = vmatprep.mubr.msk.f32.mxu1 %vm646_vm0, %v5066_v48  ;;  %4357 = vmatprep.mubr.msk.f32.mxu0 %vm646_vm0, %v4984_v61 }
 0x465   : > { %4589 = vmatpush3.bf16.msra.mxu0 %v4586_v53 }
 0x467   : > { %4358 = vmatmul.mubr.msk.f32.gmra.mrb[24].mxu0 %vm646_vm0, %v4988_v62  ;;  %4380 = vmatmul.mubr.msk.f32.gmra.mrb[24].mxu1 %vm646_vm0, %v5076_v11 }
 0x468   : > { %4360 = vmatprep.mubr.msk.f32.mxu0 %vm646_vm0, %v4992_v63  ;;  %v3985_v63 = vld [vmem:[%s5589_s8 + $0x1] ss:$0 sm:$0xff] }
 0x46b   : > { %4361 = vmatmul.mubr.msk.f32.gmra.mrb[26].mxu0 %vm646_vm0, %v4996_v0 }
 0x46c   : > { %4363 = vmatprep.mubr.msk.f32.mxu0 %vm646_vm0, %v5000_v1 }
 0x46f   : > { %4364 = vmatmul.mubr.msk.f32.gmra.mrb[28].mxu0 %vm646_vm0, %v5010_v4 }
 0x470   : > { %4386 = vmatprep.mubr.msk.f32.mxu0 %vm646_vm0, %v5027_v46 }
 0x473   : > { %4387 = vmatmul.mubr.msk.f32.vlgmr.msra.gmra.mrb[30].mxu0 %vm646_vm0, %v5035_v54 }
 0x474   : > { %4389 = vmatprep.mubr.msk.f32.mxu0 %vm646_vm0, %v5038_v56 }
 0x477   : > { %4390 = vmatmul.mubr.msk.f32.gmra.mrb[32].mxu0 %vm646_vm0, %v5049_v2 }
 0x478   : > { %4392 = vmatprep.mubr.msk.f32.mxu0 %vm646_vm0, %v5052_v3 }
 0x47b   : > { %4393 = vmatmul.mubr.msk.f32.gmra.mrb[34].mxu0 %vm646_vm0, %v5063_v39 }
 0x47c   : > { %4395 = vmatprep.mubr.msk.f32.mxu0 %vm646_vm0, %v5066_v48 }
 0x47f   : > { %4396 = vmatmul.mubr.msk.f32.gmra.mrb[36].mxu0 %vm646_vm0, %v5076_v11 }
 0x522   : > { %v5266_v59 = vpop.f32.mrb[14].mxu1 }
 0x523   : > { %v5268_v60 = vpop.f32.mrb[15].mxu1 }
 0x52a   : > { %v5270_v61 = vpop.f32.mrb[16].mxu1 }
 0x52b   : > { %v5272_v62 = vpop.f32.mrb[17].mxu1 }
 0x52e   : > { %v5277_v0 = vpop.f32.mrb[18].mxu0  ;;  %v4372_v1 = vpop.f32.mrb[18].mxu1 }
 0x52f   : > { %v2147_v4 = vadd.f32 %v4372_v1, %v3985_v63  ;;  %v5279_v46 = vpop.f32.mrb[19].mxu0  ;;  %v2141_v54 = vpop.f32.mrb[19].mxu1 }
 0x530   : > { %v2142_v56 = vadd.f32 %v3985_v63, %v2141_v54  ;;  %v4007_v54 = vld [vmem:[%s5611_s28 + $0x48] sm:$0xff] }
 0x532   : > { %v4590_v2 = vpack.c.bf16 %v2147_v4, %v2142_v56  ;;  %v5281_v3 = vpop.f32.mrb[20].mxu0  ;;  %v4375_v39 = vpop.f32.mrb[20].mxu1  ;;  %v4006_v56 = vld [vmem:[%s5611_s28 + $0x40] sm:$0xff] }
 0x533   : > { %v2157_v48 = vadd.f32 %v4375_v39, %v3985_v63  ;;  %v5283_v11 = vpop.f32.mrb[21].mxu0  ;;  %v2151_v12 = vpop.f32.mrb[21].mxu1 }
 0x534   : > { %v2152_v55 = vadd.f32 %v3985_v63, %v2151_v12  ;;  %4592 = vmatprep.subr.msk.bf16.mxu1 %vm5105_vm2, %v4590_v2 }
 0x535   : > { %4595 = vmatpush3.bf16.xpose.msk.msra.mxu1 %vm5105_vm2, %v4590_v2 }
 0x536   : > { %v4596_v21 = vpack.c.bf16 %v2157_v48, %v2152_v55  ;;  %v4378_v57 = vpop.f32.mrb[22].mxu1  ;;  %v4356_v58 = vpop.f32.mrb[22].mxu0 }
 0x537   : > { %v2167_v29 = vadd.f32 %v4378_v57, %v3985_v63  ;;  %v2161_v38 = vpop.f32.mrb[23].mxu1  ;;  %v2025_v5 = vpop.f32.mrb[23].mxu0  ;;  %v2031_v6 = vadd.f32 %v4356_v58, %v3973_v28  ;;  %v4008_v57 = vld [vmem:[%s5611_s28 + $0x50] sm:$0xff] }
 0x538   : > { %v2162_v7 = vadd.f32 %v3985_v63, %v2161_v38  ;;  %v2026_v8 = vadd.f32 %v3973_v28, %v2025_v5  ;;  %4598 = vmatprep.subr.msk.bf16.mxu1 %vm5105_vm2, %v4596_v21 }
 0x53a   : > { %v4602_v9 = vpack.c.bf16 %v2167_v29, %v2162_v7  ;;  %v4381_v10 = vpop.f32.mrb[24].mxu1  ;;  %4402 = vmatprep.mubr.msk.f32.mxu1 %vm1178_vm1, %v2026_v8  ;;  %v4359_v49 = vpop.f32.mrb[24].mxu0  ;;  %v4011_v29 = vld [vmem:[%s5611_s28 + $0x68] sm:$0xff]  ;;  %v4010_v8 = vld [vmem:[%s5611_s28 + $0x60] sm:$0xff] }
 0x53b   : > { %v2177_v14 = vadd.f32 %v4381_v10, %v3985_v63  ;;  %v2171_v15 = vpop.f32.mrb[25].mxu1  ;;  %v2035_v17 = vpop.f32.mrb[25].mxu0  ;;  %v2041_v16 = vadd.f32 %v4359_v49, %v3973_v28 }
 0x53c   : > { %v2172_v19 = vadd.f32 %v3985_v63, %v2171_v15  ;;  %4403 = vmatmul.mubr.msk.f32.vlgmr.msra.gmra.mrb[26].mxu1 %vm1178_vm1, %v2031_v6  ;;  %4604 = vmatprep.subr.msk.bf16.mxu0 %vm5105_vm2, %v4602_v9  ;;  %v2036_v23 = vadd.f32 %v3973_v28, %v2035_v17  ;;  %v4013_v17 = vld [vmem:[%s5611_s28 + $0x78] sm:$0xff] }
 0x53d   : > { %4601 = vmatpush3.bf16.xpose.msk.msra.mxu1 %vm5105_vm2, %v4596_v21  ;;  %4607 = vmatpush3.bf16.xpose.msk.msra.mxu0 %vm5105_vm2, %v4602_v9  ;;  %v4009_v21 = vld [vmem:[%s5611_s28 + $0x58] sm:$0xff] }
 0x53e   : > { %v4608_v24 = vpack.c.bf16 %v2177_v14, %v2172_v19  ;;  %v4362_v26 = vpop.f32.mrb[26].mxu0  ;;  %4409 = vmatprep.mubr.msk.f32.mxu1 %vm1178_vm1, %v2036_v23  ;;  %v4012_v23 = vld [vmem:[%s5611_s28 + $0x70] sm:$0xff] }
 0x53f   : > { %v2045_v30 = vpop.f32.mrb[27].mxu0  ;;  %v2051_v31 = vadd.f32 %v4362_v26, %v3973_v28 }
 0x540   : > { %4610 = vmatprep.subr.msk.bf16.mxu1 %vm5105_vm2, %v4608_v24  ;;  %v2046_v13 = vadd.f32 %v3973_v28, %v2045_v30 }
 0x542   : > { %v4365_v18 = vpop.f32.mrb[28].mxu0  ;;  %4416 = vmatprep.mubr.msk.f32.mxu0 %vm1178_vm1, %v2046_v13 }
 0x543   : > { %v2055_v32 = vpop.f32.mrb[29].mxu0  ;;  %v2061_v22 = vadd.f32 %v4365_v18, %v3973_v28 }
 0x544   : > { %4410 = vmatmul.mubr.msk.f32.vlgmr.msra.gmra.mrb[28].mxu1 %vm1178_vm1, %v2041_v16  ;;  %v2056_v35 = vadd.f32 %v3973_v28, %v2055_v32  ;;  %4417 = vmatmul.mubr.msk.f32.vlgmr.msra.gmra.mrb[38].mxu0 %vm1178_vm1, %v2051_v31 }
 0x545   : > { %4613 = vmatpush3.bf16.xpose.msk.msra.mxu1 %vm5105_vm2, %v4608_v24 }
 0x546   : > { %v4388_v36 = vpop.f32.mrb[30].mxu0  ;;  %4423 = vmatprep.mubr.msk.f32.mxu1 %vm1178_vm1, %v2056_v35 }
 0x547   : > { %v2263_v37 = vadd.f32 %v4388_v36, %v3997_v27  ;;  %v2257_v33 = vpop.f32.mrb[31].mxu0 }
 0x548   : > { %v2258_v25 = vadd.f32 %v3997_v27, %v2257_v33 }
 0x54a   : > { %v4614_v40 = vpack.c.bf16 %v2263_v37, %v2258_v25  ;;  %v4391_v41 = vpop.f32.mrb[32].mxu0 }
 0x54b   : > { %v2273_v34 = vadd.f32 %v4391_v41, %v3997_v27  ;;  %v2267_v42 = vpop.f32.mrb[33].mxu0 }
 0x54c   : > { %v2268_v43 = vadd.f32 %v3997_v27, %v2267_v42  ;;  %4424 = vmatmul.mubr.msk.f32.vlgmr.msra.gmra.mrb[30].mxu1 %vm1178_vm1, %v2061_v22  ;;  %4615 = vmatprep.subr.bf16.mxu0 %v4614_v40 }
 0x54d   : > { %4617 = vmatpush3.bf16.msra.mxu0 %v4614_v40 }
 0x54e   : > { %v4618_v45 = vpack.c.bf16 %v2273_v34, %v2268_v43  ;;  %v4394_v47 = vpop.f32.mrb[34].mxu0 }
 0x54f   : > { %v2283_v44 = vadd.f32 %v4394_v47, %v3997_v27  ;;  %v2277_v50 = vpop.f32.mrb[35].mxu0 }
 0x550   : > { %v2278_v20 = vadd.f32 %v3997_v27, %v2277_v50  ;;  %4619 = vmatprep.subr.bf16.mxu1 %v4618_v45 }
 0x551   : > { %4621 = vmatpush3.bf16.msra.mxu1 %v4618_v45 }
 0x552   : > { %v5315_v51 = vpack.c.bf16 %v2283_v44, %v2278_v20  ;;  %v4397_v52 = vpop.f32.mrb[36].mxu0 }
 0x553   : > { %v2293_v53 = vadd.f32 %v4397_v52, %v3997_v27  ;;  %v2287_v63 = vpop.f32.mrb[37].mxu0 }
 0x554   : > { %v2288_v1 = vadd.f32 %v3997_v27, %v2287_v63  ;;  %4623 = vmatprep.subr.bf16.mxu0 %v5315_v51 }
 0x556   : > { %v5318_v4 = vpack.c.bf16 %v2293_v53, %v2288_v1 }
 0x558   : > { %4627 = vmatprep.subr.bf16.mxu1 %v5318_v4 }
 0x60f   : > { %v4404_v2 = vpop.f32.mrb[26].mxu1 }
 0x610   : > { %v2389_v39 = vadd.f32 %v4404_v2, %v4007_v54  ;;  %v2383_v48 = vpop.f32.mrb[27].mxu1 }
 0x611   : > { %v2384_v12 = vadd.f32 %v4006_v56, %v2383_v48 }
 0x612   : > { %v2656_v55 = vsel %vm646_vm0, %v2389_v39, -inf }
 0x613   : > { %2657 = vmax.xlane.f32.xlu1 %v2656_v55  ;;  %v2653_v28 = vsel %vm646_vm0, %v2384_v12, -inf }
 0x614   : > { %2654 = vmax.xlane.f32.xlu0 %v2653_v28 }
 0x617   : > { %v4411_v58 = vpop.f32.mrb[28].mxu1  ;;  %v4418_v38 = vpop.f32.mrb[38].mxu0 }
 0x618   : > { %v2476_v5 = vadd.f32 %v4411_v58, %v4009_v21  ;;  %v2470_v6 = vpop.f32.mrb[29].mxu1  ;;  %v2557_v7 = vpop.f32.mrb[39].mxu0  ;;  %v2563_v10 = vadd.f32 %v4418_v38, %v4011_v29 }
 0x619   : > { %v2471_v9 = vadd.f32 %v4008_v57, %v2470_v6  ;;  %v2558_v14 = vadd.f32 %v4010_v8, %v2557_v7 }
 0x61a   : > { %v2662_v49 = vsel %vm646_vm0, %v2476_v5, -inf  ;;  %v2668_v19 = vsel %vm646_vm0, %v2563_v10, -inf }
 0x61b   : > { %2663 = vmax.xlane.f32.xlu1 %v2662_v49  ;;  %v2659_v15 = vsel %vm646_vm0, %v2471_v9, -inf  ;;  %v2665_v26 = vsel %vm646_vm0, %v2558_v14, -inf }
 0x61c   : > { %2660 = vmax.xlane.f32.xlu0 %v2659_v15 }
 0x61f   : > { %2669 = vmax.xlane.f32.xlu1 %v2668_v19  ;;  %v4425_v24 = vpop.f32.mrb[30].mxu1 }
 0x620   : > { %v2650_v30 = vadd.f32 %v4425_v24, %v4013_v17  ;;  %v2644_v31 = vpop.f32.mrb[31].mxu1  ;;  %2666 = vmax.xlane.f32.xlu0 %v2665_v26 }
 0x621   : > { %v2645_v13 = vadd.f32 %v4012_v23, %v2644_v31 }
 0x622   : > { %v2674_v16 = vsel %vm646_vm0, %v2650_v30, -inf }
 0x623   : > { %2675 = vmax.xlane.f32.xlu1 %v2674_v16  ;;  %v2671_v18 = vsel %vm646_vm0, %v2645_v13, -inf }
 0x624   : > { %2672 = vmax.xlane.f32.xlu0 %v2671_v18 }
 0x6a0   : > { %v2658_v32 = vpop.xlane.xlu1 %2657 }
 0x6a1   : > { %v2678_v35 = vsub.f32 %v2389_v39, %v2658_v32  ;;  %v2655_v27 = vpop.xlane.xlu0 %2654 }
 0x6a2   : > { %v2677_v36 = vsub.f32 %v2384_v12, %v2655_v27 }
 0x6a3   : > { %v2687_v37 = vmul.f32 1.442695, %v2678_v35 }
 0x6a4   : > { %v2685_v33 = vmul.f32 1.442695, %v2677_v36 }
 0x6a5   : > { %4714 = vpow2.f32 %v2687_v37 }
 0x6a6   : > { %4716 = vpow2.f32 %v2685_v33 }
 0x6a8   : > { %v2664_v25 = vpop.xlane.xlu1 %2663 }
 0x6a9   : > { %v2680_v22 = vsub.f32 %v2476_v5, %v2664_v25  ;;  %v2661_v40 = vpop.xlane.xlu0 %2660 }
 0x6aa   : > { %v2679_v41 = vsub.f32 %v2471_v9, %v2661_v40 }
 0x6ab   : > { %v2691_v34 = vmul.f32 1.442695, %v2680_v22 }
 0x6ac   : > { %v2689_v42 = vmul.f32 1.442695, %v2679_v41  ;;  %v2670_v43 = vpop.xlane.xlu1 %2669 }
 0x6ad   : > { %4718 = vpow2.f32 %v2691_v34  ;;  %v2682_v45 = vsub.f32 %v2563_v10, %v2670_v43  ;;  %v2667_v47 = vpop.xlane.xlu0 %2666 }
 0x6ae   : > { %4720 = vpow2.f32 %v2689_v42  ;;  %v2681_v44 = vsub.f32 %v2558_v14, %v2667_v47 }
 0x6af   : > { %v4715_v50 = vpop.eup %4714  ;;  %v2695_v20 = vmul.f32 1.442695, %v2682_v45 }
 0x6b0   : > { %v4717_v52 = vpop.eup %4716  ;;  %v2693_v53 = vmul.f32 1.442695, %v2681_v44  ;;  %v2676_v63 = vpop.xlane.xlu1 %2675  ;;  %v2704_v1 = vsel %vm646_vm0, %v4715_v50, 0.0 }
 0x6b1   : > { %4722 = vpow2.f32 %v2695_v20  ;;  %v2684_v54 = vsub.f32 %v2650_v30, %v2676_v63  ;;  %2705 = vadd.xlane.f32.xlu1 %v2704_v1  ;;  %v2673_v56 = vpop.xlane.xlu0 %2672  ;;  %v2701_v2 = vsel %vm646_vm0, %v4717_v52, 0.0  ;;  %v4038_v20 = vld [vmem:[%s5592_s11 + $0x8] sm:$0xff] }
 0x6b2   : > { %4724 = vpow2.f32 %v2693_v53  ;;  %v2683_v39 = vsub.f32 %v2645_v13, %v2673_v56  ;;  %2702 = vadd.xlane.f32.xlu0 %v2701_v2 }
 0x6b3   : > { %v2699_v48 = vmul.f32 1.442695, %v2684_v54 }
 0x6b4   : > { %v2697_v12 = vmul.f32 1.442695, %v2683_v39 }
 0x6b5   : > { %4726 = vpow2.f32 %v2699_v48 }
 0x6b6   : > { %4728 = vpow2.f32 %v2697_v12 }
 0x6b7   : > { %v4719_v55 = vpop.eup %4718 }
 0x6b8   : > { %v4721_v28 = vpop.eup %4720  ;;  %v2710_v21 = vsel %vm646_vm0, %v4719_v55, 0.0 }
 0x6b9   : > { %2711 = vadd.xlane.f32.xlu1 %v2710_v21  ;;  %v2707_v57 = vsel %vm646_vm0, %v4721_v28, 0.0 }
 0x6ba   : > { %2708 = vadd.xlane.f32.xlu0 %v2707_v57 }
 0x6bb   : > { %v4723_v58 = vpop.eup %4722 }
 0x6bc   : > { %v4725_v29 = vpop.eup %4724  ;;  %v2716_v38 = vsel %vm646_vm0, %v4723_v58, 0.0 }
 0x6bd   : > { %2717 = vadd.xlane.f32.xlu1 %v2716_v38  ;;  %v2713_v5 = vsel %vm646_vm0, %v4725_v29, 0.0 }
 0x6be   : > { %2714 = vadd.xlane.f32.xlu0 %v2713_v5  ;;  %v4781_v5 = vld [vmem:[%s4908_s23 + $0x10] sm:$0xff] }
 0x6bf   : > { %v4727_v6 = vpop.eup %4726 }
 0x6c0   : > { %v4729_v7 = vpop.eup %4728  ;;  %v2722_v8 = vsel %vm646_vm0, %v4727_v6, 0.0 }
 0x6c1   : > { %2723 = vadd.xlane.f32.xlu1 %v2722_v8  ;;  %v2719_v9 = vsel %vm646_vm0, %v4729_v7, 0.0 }
 0x6c2   : > { %2720 = vadd.xlane.f32.xlu0 %v2719_v9 }
 0x73e   : > { %v2706_v10 = vpop.xlane.xlu1 %2705 }
 0x73f   : > { %v2726_v49 = vadd.f32 1.0, %v2706_v10  ;;  %v2703_v14 = vpop.xlane.xlu0 %2702 }
 0x740   : > { %v2725_v15 = vadd.f32 1.0, %v2703_v14 }
 0x741   : > { %4730 = vrcp.f32 %v2726_v49 }
 0x742   : > { %4732 = vrcp.f32 %v2725_v15  ;;  %v4782_v15 = vld [vmem:[%s4908_s23 + $0x28] sm:$0xff] }
 0x746   : > { %v2712_v17 = vpop.xlane.xlu1 %2711 }
 0x747   : > { %v2728_v19 = vadd.f32 1.0, %v2712_v17  ;;  %v2709_v23 = vpop.xlane.xlu0 %2708 }
 0x748   : > { %v2727_v24 = vadd.f32 1.0, %v2709_v23 }
 0x749   : > { %4734 = vrcp.f32 %v2728_v19  ;;  %v4783_v19 = vld [vmem:[%s4908_s23 + $0x20] sm:$0xff] }
 0x74a   : > { %4736 = vrcp.f32 %v2727_v24  ;;  %v2718_v26 = vpop.xlane.xlu1 %2717 }
 0x74b   : > { %v4731_v30 = vpop.eup %4730  ;;  %v2730_v31 = vadd.f32 1.0, %v2718_v26  ;;  %v2715_v13 = vpop.xlane.xlu0 %2714 }
 0x74c   : > { %v4733_v16 = vpop.eup %4732  ;;  %v2729_v18 = vadd.f32 1.0, %v2715_v13  ;;  %v2742_v27 = vmul.f32 %v4731_v30, %v4715_v50 }
 0x74d   : > { %4738 = vrcp.f32 %v2730_v31  ;;  %v2741_v32 = vmul.f32 %v4733_v16, %v4717_v52 }
 0x74e   : > { %4740 = vrcp.f32 %v2729_v18  ;;  %v2724_v35 = vpop.xlane.xlu1 %2723  ;;  %v4784_v18 = vld [vmem:[%s4908_s23 + $0x38] sm:$0xff] }
 0x74f   : > { %v2732_v36 = vadd.f32 1.0, %v2724_v35  ;;  %4430 = vmatprep.mubr.msk.f32.mxu0 %vm646_vm0, %v2741_v32  ;;  %v2721_v37 = vpop.xlane.xlu0 %2720  ;;  %v4785_v35 = vld [vmem:[%s4908_s23 + $0x30] sm:$0xff] }
 0x750   : > { %v2731_v33 = vadd.f32 1.0, %v2721_v37  ;;  %4431 = vmatmul.mubr.msk.f32.vlgmr.msra.gmra.mrb[40].mxu0 %vm646_vm0, %v2742_v27 }
 0x751   : > { %4742 = vrcp.f32 %v2732_v36  ;;  %4625 = vmatpush3.bf16.msra.mxu0 %v5315_v51 }
 0x752   : > { %4744 = vrcp.f32 %v2731_v33  ;;  %4454 = vmatprep.subr.mxu0 %v4038_v20 }
 0x753   : > { %v4735_v25 = vpop.eup %4734 }
 0x754   : > { %v4737_v22 = vpop.eup %4736  ;;  %v2744_v41 = vmul.f32 %v4735_v25, %v4719_v55 }
 0x755   : > { %v2743_v40 = vmul.f32 %v4737_v22, %v4721_v28 }
 0x757   : > { %v4739_v34 = vpop.eup %4738  ;;  %4437 = vmatprep.mubr.msk.f32.mxu1 %vm646_vm0, %v2743_v40 }
 0x758   : > { %v4741_v42 = vpop.eup %4740  ;;  %4438 = vmatmul.mubr.msk.f32.vlgmr.msra.gmra.mrb[32].mxu1 %vm646_vm0, %v2744_v41  ;;  %v2746_v45 = vmul.f32 %v4739_v34, %v4723_v58 }
 0x759   : > { %4629 = vmatpush3.bf16.msra.mxu1 %v5318_v4  ;;  %v2745_v43 = vmul.f32 %v4741_v42, %v4725_v29  ;;  %v1947_v4 = vld [vmem:[%s5592_s11] sm:$0xff]  ;;  %v4780_v29 = vld [vmem:[%s4908_s23 + $0x18] sm:$0xff] }
 0x75b   : > { %v4743_v47 = vpop.eup %4742  ;;  %4444 = vmatprep.mubr.msk.f32.mxu0 %vm646_vm0, %v2745_v43 }
 0x75c   : > { %v4745_v44 = vpop.eup %4744  ;;  %4445 = vmatmul.mubr.msk.f32.vlgmr.msra.gmra.mrb[42].mxu0 %vm646_vm0, %v2746_v45  ;;  %v2748_v50 = vmul.f32 %v4743_v47, %v4727_v6 }
 0x75d   : > { %v2747_v51 = vmul.f32 %v4745_v44, %v4729_v7  ;;  %4455 = vmatpush3.msra.mxu0 %v4038_v20 }
 0x75e   : > { %4468 = vmatprep.subr.mxu0 %v1947_v4 }
 0x75f   : > { %4451 = vmatprep.mubr.msk.f32.mxu1 %vm646_vm0, %v2747_v51 }
 0x760   : > { %4452 = vmatmul.mubr.msk.f32.vlgmr.msra.gmra.mrb[34].mxu1 %vm646_vm0, %v2748_v50 }
 0x823   : > { %v4432_v52 = vpop.f32.mrb[40].mxu0 }
 0x824   : > { %v2821_v53 = vpop.f32.mrb[41].mxu0 }
 0x825   : > { %4456 = vmatprep.mubr.msk.f32.mxu0 %vm1178_vm1, %v2821_v53 }
 0x826   : > { %4457 = vmatmul.mubr.msk.f32.vlgmr.msra.gmra.mrb[44].mxu0 %vm1178_vm1, %v4432_v52 }
 0x827   : > { %4469 = vmatpush3.msra.mxu0 %v1947_v4 }
 0x82b   : > { %v4439_v63 = vpop.f32.mrb[32].mxu1 }
 0x82c   : > { %v2902_v1 = vpop.f32.mrb[33].mxu1 }
 0x82d   : > { %4459 = vmatprep.mubr.msk.f32.mxu0 %vm1178_vm1, %v2902_v1 }
 0x82e   : > { %4460 = vmatmul.mubr.msk.f32.gmra.mrb[46].mxu0 %vm1178_vm1, %v4439_v63 }
 0x82f   : > { %v4446_v54 = vpop.f32.mrb[42].mxu0 }
 0x830   : > { %v2983_v56 = vpop.f32.mrb[43].mxu0 }
 0x831   : > { %4462 = vmatprep.mubr.msk.f32.mxu0 %vm1178_vm1, %v2983_v56 }
 0x832   : > { %4463 = vmatmul.mubr.msk.f32.gmra.mrb[48].mxu0 %vm1178_vm1, %v4446_v54 }
 0x833   : > { %v4453_v2 = vpop.f32.mrb[34].mxu1 }
 0x834   : > { %v3064_v39 = vpop.f32.mrb[35].mxu1 }
 0x835   : > { %4465 = vmatprep.mubr.msk.f32.mxu0 %vm1178_vm1, %v3064_v39 }
 0x836   : > { %4466 = vmatmul.mubr.msk.f32.gmra.mrb[50].mxu0 %vm1178_vm1, %v4453_v2 }
 0x837   : > { %4470 = vmatprep.mubr.msk.f32.mxu0 %vm1178_vm1, %v5279_v46 }
 0x83a   : > { %4471 = vmatmul.mubr.msk.f32.vlgmr.msra.gmra.mrb[44].mxu0 %vm1178_vm1, %v5277_v0  ;;  %v4055_v0 = vld [vmem:[%s5593_s12] ss:$0 sm:$0xff] }
 0x83b   : > { %4473 = vmatprep.mubr.msk.f32.mxu0 %vm1178_vm1, %v5268_v60 }
 0x83e   : > { %4474 = vmatmul.mubr.msk.f32.gmra.mrb[46].mxu0 %vm1178_vm1, %v5266_v59 }
 0x83f   : > { %4476 = vmatprep.mubr.msk.f32.mxu0 %vm1178_vm1, %v5283_v11  ;;  %v4778_v11 = vld [vmem:[%s4908_s23 + $0x8] sm:$0xff] }
 0x842   : > { %4477 = vmatmul.mubr.msk.f32.gmra.mrb[48].mxu0 %vm1178_vm1, %v5281_v3  ;;  %v4779_v3 = vld [vmem:[%s4908_s23] sm:$0xff] }
 0x843   : > { %4479 = vmatprep.mubr.msk.f32.mxu0 %vm1178_vm1, %v5272_v62 }
 0x846   : > { %4480 = vmatmul.mubr.msk.f32.gmra.mrb[50].mxu0 %vm1178_vm1, %v5270_v61 }
 0x90d   : > { %v4472_v60 = vpop.f32.mrb[44].mxu0 }
 0x90e   : > { %v3341_v46 = vadd.f32 %v4472_v60, %v4055_v0  ;;  %v3294_v59 = vpop.f32.mrb[45].mxu0 }
 0x90f   : > { %v3340_v48 = vadd.f32 %v4055_v0, %v3294_v59 }
 0x910   : > { %v5405_v12 = vadd.f32 %v4778_v11, %v3341_v46 }
 0x911   : > { %v5408_v55 = vadd.f32 %v4779_v3, %v3340_v48  ;;  %v4475_v62 = vpop.f32.mrb[46].mxu0 }
 0x912   : > { %v3343_v28 = vadd.f32 %v4475_v62, %v4055_v0  ;;  %v3304_v21 = vpop.f32.mrb[47].mxu0  ;;  %v3361_v61 = vsel %vm646_vm0, %v5405_v12, 0.0 }
 0x913   : > { %v3342_v57 = vadd.f32 %v4055_v0, %v3304_v21  ;;  %3362 = vadd.xlane.f32.xlu1 %v3361_v61  ;;  %v3358_v58 = vsel %vm646_vm0, %v5408_v55, 0.0 }
 0x914   : > { %v5415_v38 = vadd.f32 %v4780_v29, %v3343_v28  ;;  %3359 = vadd.xlane.f32.xlu0 %v3358_v58 }
 0x915   : > { %v5418_v6 = vadd.f32 %v4781_v5, %v3342_v57  ;;  %v4478_v7 = vpop.f32.mrb[48].mxu0 }
 0x916   : > { %v3345_v8 = vadd.f32 %v4478_v7, %v4055_v0  ;;  %v3314_v9 = vpop.f32.mrb[49].mxu0  ;;  %v3367_v10 = vsel %vm646_vm0, %v5415_v38, 0.0 }
 0x917   : > { %v3344_v49 = vadd.f32 %v4055_v0, %v3314_v9  ;;  %3368 = vadd.xlane.f32.xlu1 %v3367_v10  ;;  %v3364_v14 = vsel %vm646_vm0, %v5418_v6, 0.0  ;;  %v3490_v9 = vld [vmem:[%s5596_s15] sm:$0xff]  ;;  %v3491_v10 = vld [vmem:[%s5596_s15 + $0x8] sm:$0xff] }
 0x918   : > { %v5425_v17 = vadd.f32 %v4782_v15, %v3345_v8  ;;  %3365 = vadd.xlane.f32.xlu0 %v3364_v14 }
 0x919   : > { %v5428_v23 = vadd.f32 %v4783_v19, %v3344_v49  ;;  %v4481_v24 = vpop.f32.mrb[50].mxu0  ;;  %v4630_v49 = vpack.c.bf16 %v3491_v10, %v3490_v9 }
 0x91a   : > { %v3347_v26 = vadd.f32 %v4481_v24, %v4055_v0  ;;  %v3324_v30 = vpop.f32.mrb[51].mxu0  ;;  %v3373_v31 = vsel %vm646_vm0, %v5425_v17, 0.0 }
 0x91b   : > { %v3346_v13 = vadd.f32 %v4055_v0, %v3324_v30  ;;  %3374 = vadd.xlane.f32.xlu1 %v3373_v31  ;;  %v3370_v16 = vsel %vm646_vm0, %v5428_v23, 0.0  ;;  %4631 = vmatprep.subr.bf16.mxu1 %v4630_v49 }
 0x91c   : > { %v5435_v32 = vadd.f32 %v4784_v18, %v3347_v26  ;;  %3371 = vadd.xlane.f32.xlu0 %v3370_v16  ;;  %4633 = vmatpush3.bf16.msra.mxu1 %v4630_v49 }
 0x91d   : > { %v5438_v27 = vadd.f32 %v4785_v35, %v3346_v13 }
 0x91e   : > { %v3379_v36 = vsel %vm646_vm0, %v5435_v32, 0.0 }
 0x91f   : > { %3380 = vadd.xlane.f32.xlu1 %v3379_v36  ;;  %v3376_v37 = vsel %vm646_vm0, %v5438_v27, 0.0 }
 0x920   : > { %3377 = vadd.xlane.f32.xlu0 %v3376_v37 }
 0x9a0   : > { %v3363_v33 = vpop.xlane.xlu1 %3362 }
 0x9a1   : > { %v3383_v25 = vmul.f32 0.0625, %v3363_v33  ;;  %v3360_v22 = vpop.xlane.xlu0 %3359 }
 0x9a2   : > { %v3382_v40 = vmul.f32 0.0625, %v3360_v22 }
 0x9a3   : > { %v5445_v41 = vsub.f32 %v5405_v12, %v3383_v25 }
 0x9a4   : > { %v5448_v34 = vsub.f32 %v5408_v55, %v3382_v40  ;;  %v3369_v42 = vpop.xlane.xlu1 %3368 }
 0x9a5   : > { %v3385_v43 = vmul.f32 0.0625, %v3369_v42  ;;  %v3366_v45 = vpop.xlane.xlu0 %3365  ;;  %v3399_v47 = vmul.f32 %v5445_v41, %v5445_v41 }
 0x9a6   : > { %v3384_v44 = vmul.f32 0.0625, %v3366_v45  ;;  %v3398_v51 = vmul.f32 %v5448_v34, %v5448_v34 }
 0x9a7   : > { %v5455_v50 = vsub.f32 %v5415_v38, %v3385_v43  ;;  %v3409_v20 = vsel %vm646_vm0, %v3399_v47, 0.0 }
 0x9a8   : > { %v5459_v4 = vsub.f32 %v5418_v6, %v3384_v44  ;;  %v3375_v52 = vpop.xlane.xlu1 %3374  ;;  %3410 = vadd.xlane.f32.xlu1 %v3409_v20  ;;  %v3406_v53 = vsel %vm646_vm0, %v3398_v51, 0.0 }
 0x9a9   : > { %v3387_v63 = vmul.f32 0.0625, %v3375_v52  ;;  %v3372_v1 = vpop.xlane.xlu0 %3371  ;;  %3407 = vadd.xlane.f32.xlu0 %v3406_v53  ;;  %v3401_v54 = vmul.f32 %v5455_v50, %v5455_v50  ;;  %v4056_v52 = vld [vmem:[%s5594_s13] ss:$0 sm:$0xff] }
 0x9aa   : > { %v3386_v56 = vmul.f32 0.0625, %v3372_v1  ;;  %v3400_v2 = vmul.f32 %v5459_v4, %v5459_v4 }
 0x9ab   : > { %v5467_v39 = vsub.f32 %v5425_v17, %v3387_v63  ;;  %v3415_v0 = vsel %vm646_vm0, %v3401_v54, 0.0 }
 0x9ac   : > { %v5471_v60 = vsub.f32 %v5428_v23, %v3386_v56  ;;  %3416 = vadd.xlane.f32.xlu1 %v3415_v0  ;;  %v3381_v46 = vpop.xlane.xlu1 %3380  ;;  %v3412_v59 = vsel %vm646_vm0, %v3400_v2, 0.0  ;;  %v4057_v56 = vld [vmem:[%s5595_s14] ss:$0 sm:$0xff] }
 0x9ad   : > { %v3389_v48 = vmul.f32 0.0625, %v3381_v46  ;;  %3413 = vadd.xlane.f32.xlu0 %v3412_v59  ;;  %v3378_v11 = vpop.xlane.xlu0 %3377  ;;  %v3403_v3 = vmul.f32 %v5467_v39, %v5467_v39 }
 0x9ae   : > { %v3388_v62 = vmul.f32 0.0625, %v3378_v11  ;;  %v3402_v28 = vmul.f32 %v5471_v60, %v5471_v60 }
 0x9af   : > { %v5479_v21 = vsub.f32 %v5435_v32, %v3389_v48  ;;  %v3421_v61 = vsel %vm646_vm0, %v3403_v3, 0.0 }
 0x9b0   : > { %v5483_v57 = vsub.f32 %v5438_v27, %v3388_v62  ;;  %3422 = vadd.xlane.f32.xlu1 %v3421_v61  ;;  %v3418_v58 = vsel %vm646_vm0, %v3402_v28, 0.0 }
 0x9b1   : > { %3419 = vadd.xlane.f32.xlu0 %v3418_v58  ;;  %v3405_v29 = vmul.f32 %v5479_v21, %v5479_v21 }
 0x9b2   : > { %v3404_v5 = vmul.f32 %v5483_v57, %v5483_v57 }
 0x9b3   : > { %v3427_v7 = vsel %vm646_vm0, %v3405_v29, 0.0 }
 0x9b4   : > { %3428 = vadd.xlane.f32.xlu1 %v3427_v7  ;;  %v3424_v8 = vsel %vm646_vm0, %v3404_v5, 0.0 }
 0x9b5   : > { %3425 = vadd.xlane.f32.xlu0 %v3424_v8 }
 0xa35   : > { %v3411_v14 = vpop.xlane.xlu1 %3410 }
 0xa36   : > { %v3431_v15 = vmul.f32 0.0625, %v3411_v14  ;;  %v3408_v19 = vpop.xlane.xlu0 %3407 }
 0xa37   : > { %v3430_v24 = vmul.f32 0.0625, %v3408_v19 }
 0xa38   : > { %v3439_v26 = vadd.f32 1e-05, %v3431_v15 }
 0xa39   : > { %v3438_v30 = vadd.f32 1e-05, %v3430_v24  ;;  %v3417_v31 = vpop.xlane.xlu1 %3416 }
 0xa3a   : > { %4746 = vrsqrt.f32 %v3439_v26  ;;  %v3433_v13 = vmul.f32 0.0625, %v3417_v31  ;;  %v3414_v16 = vpop.xlane.xlu0 %3413  ;;  %v3672_v31 = vld [vmem:[%s5598_s17 + $0x18] sm:$0xff] }
 0xa3b   : > { %4748 = vrsqrt.f32 %v3438_v30  ;;  %v3432_v18 = vmul.f32 0.0625, %v3414_v16  ;;  %v3671_v30 = vld [vmem:[%s5598_s17 + $0x10] sm:$0xff]  ;;  %v3673_v16 = vld [vmem:[%s5598_s17 + $0x20] sm:$0xff] }
 0xa3c   : > { %v3441_v35 = vadd.f32 1e-05, %v3433_v13  ;;  %v4638_v13 = vpack.c.bf16 %v3672_v31, %v3671_v30 }
 0xa3d   : > { %v3440_v36 = vadd.f32 1e-05, %v3432_v18  ;;  %v3423_v37 = vpop.xlane.xlu1 %3422  ;;  %v3674_v18 = vld [vmem:[%s5598_s17 + $0x28] sm:$0xff] }
 0xa3e   : > { %4750 = vrsqrt.f32 %v3441_v35  ;;  %v3435_v33 = vmul.f32 0.0625, %v3423_v37  ;;  %v3420_v25 = vpop.xlane.xlu0 %3419  ;;  %v4642_v35 = vpack.c.bf16 %v3674_v18, %v3673_v16  ;;  %v3676_v37 = vld [vmem:[%s5598_s17 + $0x38] sm:$0xff] }
 0xa3f   : > { %4752 = vrsqrt.f32 %v3440_v36  ;;  %v3434_v22 = vmul.f32 0.0625, %v3420_v25  ;;  %v3675_v36 = vld [vmem:[%s5598_s17 + $0x30] sm:$0xff]  ;;  %v4058_v25 = vld [vmem:[%s5597_s16] ss:$0 sm:$0xff] }
 0xa40   : > { %v3443_v40 = vadd.f32 1e-05, %v3435_v33  ;;  %v4646_v33 = vpack.c.bf16 %v3676_v37, %v3675_v36 }
 0xa41   : > { %v3442_v42 = vadd.f32 1e-05, %v3434_v22  ;;  %v3429_v43 = vpop.xlane.xlu1 %3428 }
 0xa42   : > { %4754 = vrsqrt.f32 %v3443_v40  ;;  %v3437_v45 = vmul.f32 0.0625, %v3429_v43  ;;  %v3426_v47 = vpop.xlane.xlu0 %3425 }
 0xa43   : > { %4756 = vrsqrt.f32 %v3442_v42  ;;  %v3436_v44 = vmul.f32 0.0625, %v3426_v47 }
 0xa44   : > { %v4747_v51 = vpop.eup %4746  ;;  %v3445_v20 = vadd.f32 1e-05, %v3437_v45 }
 0xa45   : > { %v4749_v53 = vpop.eup %4748  ;;  %v3455_v63 = vmul.f32 %v4747_v51, %v5445_v41  ;;  %v3444_v1 = vadd.f32 1e-05, %v3436_v44 }
 0xa46   : > { %4758 = vrsqrt.f32 %v3445_v20  ;;  %v3454_v54 = vmul.f32 %v4749_v53, %v5448_v34 }
 0xa47   : > { %4760 = vrsqrt.f32 %v3444_v1  ;;  %v3469_v2 = vmul.f32 %v4056_v52, %v3455_v63 }
 0xa48   : > { %v4751_v0 = vpop.eup %4750  ;;  %v3468_v46 = vmul.f32 %v4056_v52, %v3454_v54 }
 0xa49   : > { %v4753_v59 = vpop.eup %4752  ;;  %v3457_v48 = vmul.f32 %v4751_v0, %v5455_v50  ;;  %v3483_v62 = vadd.f32 %v4057_v56, %v3469_v2 }
 0xa4a   : > { %v3482_v11 = vadd.f32 %v4057_v56, %v3468_v46  ;;  %v3456_v3 = vmul.f32 %v4753_v59, %v5459_v4 }
 0xa4b   : > { %v3471_v41 = vmul.f32 %v4056_v52, %v3457_v48 }
 0xa4c   : > { %v4755_v28 = vpop.eup %4754  ;;  %4486 = vmatprep.mubr.msk.f32.mxu1 %vm646_vm0, %v3482_v11  ;;  %v3470_v34 = vmul.f32 %v4056_v52, %v3456_v3 }
 0xa4d   : > { %v4757_v61 = vpop.eup %4756  ;;  %4487 = vmatmul.mubr.msk.f32.vlgmr.msra.gmra.mrb[36].mxu1 %vm646_vm0, %v3483_v62  ;;  %v3459_v58 = vmul.f32 %v4755_v28, %v5467_v39  ;;  %v3485_v7 = vadd.f32 %v4057_v56, %v3471_v41 }
 0xa4e   : > { %v3484_v29 = vadd.f32 %v4057_v56, %v3470_v34  ;;  %v3458_v5 = vmul.f32 %v4757_v61, %v5471_v60 }
 0xa4f   : > { %v3473_v8 = vmul.f32 %v4056_v52, %v3459_v58 }
 0xa50   : > { %v4759_v50 = vpop.eup %4758  ;;  %4489 = vmatprep.mubr.msk.f32.mxu1 %vm646_vm0, %v3484_v29  ;;  %v3472_v4 = vmul.f32 %v4056_v52, %v3458_v5 }
 0xa51   : > { %v4761_v9 = vpop.eup %4760  ;;  %4490 = vmatmul.mubr.msk.f32.gmra.mrb[38].mxu1 %vm646_vm0, %v3485_v7  ;;  %v3461_v10 = vmul.f32 %v4759_v50, %v5479_v21  ;;  %v3487_v15 = vadd.f32 %v4057_v56, %v3473_v8  ;;  %v3669_v21 = vld [vmem:[%s5598_s17] sm:$0xff] }
 0xa52   : > { %v3486_v49 = vadd.f32 %v4057_v56, %v3472_v4  ;;  %v3460_v14 = vmul.f32 %v4761_v9, %v5483_v57  ;;  %v3670_v57 = vld [vmem:[%s5598_s17 + $0x8] sm:$0xff] }
 0xa53   : > { %v3475_v19 = vmul.f32 %v4056_v52, %v3461_v10  ;;  %v4634_v26 = vpack.c.bf16 %v3670_v57, %v3669_v21 }
 0xa54   : > { %4492 = vmatprep.mubr.msk.f32.mxu1 %vm646_vm0, %v3486_v49  ;;  %v3474_v39 = vmul.f32 %v4056_v52, %v3460_v14 }
 0xa55   : > { %4493 = vmatmul.mubr.msk.f32.gmra.mrb[40].mxu1 %vm646_vm0, %v3487_v15  ;;  %v3489_v24 = vadd.f32 %v4057_v56, %v3475_v19  ;;  %4635 = vmatprep.subr.bf16.mxu1 %v4634_v26 }
 0xa56   : > { %v3488_v60 = vadd.f32 %v4057_v56, %v3474_v39  ;;  %4637 = vmatpush3.bf16.msra.mxu1 %v4634_v26 }
 0xa57   : > { %4639 = vmatprep.subr.bf16.mxu1 %v4638_v13 }
 0xa58   : > { %4495 = vmatprep.mubr.msk.f32.mxu1 %vm646_vm0, %v3488_v60 }
 0xa59   : > { %4496 = vmatmul.mubr.msk.f32.gmra.mrb[42].mxu1 %vm646_vm0, %v3489_v24 }
 0xa5a   : > { %4641 = vmatpush3.bf16.msra.mxu1 %v4638_v13 }
 0xa5b   : > { %4643 = vmatprep.subr.bf16.mxu1 %v4642_v35 }
 0xa5e   : > { %4645 = vmatpush3.bf16.msra.mxu1 %v4642_v35 }
 0xa5f   : > { %4647 = vmatprep.subr.bf16.mxu1 %v4646_v33 }
 0xa62   : > { %4649 = vmatpush3.bf16.msra.mxu1 %v4646_v33 }
 0xb20   : > { %v4488_v22 = vpop.f32.mrb[36].mxu1 }
 0xb21   : > { %v3595_v40 = vadd.f32 %v4488_v22, %v4058_v25  ;;  %v3589_v42 = vpop.f32.mrb[37].mxu1 }
 0xb22   : > { %v3590_v43 = vadd.f32 %v4058_v25, %v3589_v42 }
 0xb23   : > { %v3638_v45 = vmul.f32 0.70710677, %v3595_v40  ;;  %v3629_v5 = vmul.f32 0.5, %v3595_v40  ;;  %v4075_v40 = vld [vmem:[%s5599_s18] ss:$0 sm:$0xff] }
 0xb24   : > { %v3637_v47 = vmul.f32 0.70710677, %v3590_v43  ;;  %v4491_v44 = vpop.f32.mrb[38].mxu1  ;;  %v3628_v58 = vmul.f32 0.5, %v3590_v43 }
 0xb25   : > { %4762 = verf.f32 %v3638_v45  ;;  %v3605_v51 = vadd.f32 %v4491_v44, %v4058_v25  ;;  %v3599_v20 = vpop.f32.mrb[39].mxu1 }
 0xb26   : > { %4764 = verf.f32 %v3637_v47  ;;  %v3600_v52 = vadd.f32 %v4058_v25, %v3599_v20 }
 0xb27   : > { %v3640_v53 = vmul.f32 0.70710677, %v3605_v51  ;;  %v3631_v14 = vmul.f32 0.5, %v3605_v51 }
 0xb28   : > { %v3639_v63 = vmul.f32 0.70710677, %v3600_v52  ;;  %v4494_v1 = vpop.f32.mrb[40].mxu1  ;;  %v3630_v10 = vmul.f32 0.5, %v3600_v52 }
 0xb29   : > { %4766 = verf.f32 %v3640_v53  ;;  %v3615_v54 = vadd.f32 %v4494_v1, %v4058_v25  ;;  %v3609_v56 = vpop.f32.mrb[41].mxu1 }
 0xb2a   : > { %4768 = verf.f32 %v3639_v63  ;;  %v3610_v2 = vadd.f32 %v4058_v25, %v3609_v56 }
 0xb2b   : > { %v3642_v0 = vmul.f32 0.70710677, %v3615_v54  ;;  %v3633_v26 = vmul.f32 0.5, %v3615_v54 }
 0xb2c   : > { %v3641_v46 = vmul.f32 0.70710677, %v3610_v2  ;;  %v4497_v59 = vpop.f32.mrb[42].mxu1  ;;  %v3632_v21 = vmul.f32 0.5, %v3610_v2 }
 0xb2d   : > { %4770 = verf.f32 %v3642_v0  ;;  %v3625_v48 = vadd.f32 %v4497_v59, %v4058_v25  ;;  %v3619_v11 = vpop.f32.mrb[43].mxu1 }
 0xb2e   : > { %4772 = verf.f32 %v3641_v46  ;;  %v3620_v3 = vadd.f32 %v4058_v25, %v3619_v11 }
 0xb2f   : > { %v4763_v62 = vpop.eup %4762  ;;  %v3644_v41 = vmul.f32 0.70710677, %v3625_v48  ;;  %v3635_v37 = vmul.f32 0.5, %v3625_v48 }
 0xb30   : > { %v4765_v28 = vpop.eup %4764  ;;  %v3654_v34 = vadd.f32 1.0, %v4763_v62  ;;  %v3643_v61 = vmul.f32 0.70710677, %v3620_v3  ;;  %v3634_v35 = vmul.f32 0.5, %v3620_v3 }
 0xb31   : > { %v3653_v29 = vadd.f32 1.0, %v4765_v28  ;;  %4774 = verf.f32 %v3644_v41 }
 0xb32   : > { %4776 = verf.f32 %v3643_v61  ;;  %v3662_v4 = vmul.f32 %v3654_v34, %v3629_v5 }
 0xb33   : > { %v4767_v7 = vpop.eup %4766  ;;  %v3661_v8 = vmul.f32 %v3653_v29, %v3628_v58 }
 0xb34   : > { %v4769_v50 = vpop.eup %4768  ;;  %v3656_v9 = vadd.f32 1.0, %v4767_v7 }
 0xb35   : > { %v3655_v49 = vadd.f32 1.0, %v4769_v50  ;;  %4514 = vmatprep.mubr.msk.f32.mxu1 %vm3677_vm3, %v3661_v8 }
 0xb36   : > { %4515 = vmatmul.mubr.msk.f32.vlgmr.msra.gmra.mrb[44].mxu1 %vm3677_vm3, %v3662_v4  ;;  %v3664_v60 = vmul.f32 %v3656_v9, %v3631_v14 }
 0xb37   : > { %v4771_v15 = vpop.eup %4770  ;;  %v3663_v19 = vmul.f32 %v3655_v49, %v3630_v10 }
 0xb38   : > { %v4773_v39 = vpop.eup %4772  ;;  %v3658_v24 = vadd.f32 1.0, %v4771_v15 }
 0xb39   : > { %v3657_v57 = vadd.f32 1.0, %v4773_v39  ;;  %4517 = vmatprep.mubr.msk.f32.mxu1 %vm3677_vm3, %v3663_v19 }
 0xb3a   : > { %4518 = vmatmul.mubr.msk.f32.gmra.mrb[46].mxu1 %vm3677_vm3, %v3664_v60  ;;  %v3666_v16 = vmul.f32 %v3658_v24, %v3633_v26 }
 0xb3b   : > { %v4775_v30 = vpop.eup %4774  ;;  %v3665_v31 = vmul.f32 %v3657_v57, %v3632_v21 }
 0xb3c   : > { %v4777_v13 = vpop.eup %4776  ;;  %v3660_v18 = vadd.f32 1.0, %v4775_v30 }
 0xb3d   : > { %v3659_v36 = vadd.f32 1.0, %v4777_v13  ;;  %4520 = vmatprep.mubr.msk.f32.mxu1 %vm3677_vm3, %v3665_v31 }
 0xb3e   : > { %4521 = vmatmul.mubr.msk.f32.gmra.mrb[48].mxu1 %vm3677_vm3, %v3666_v16  ;;  %v3668_v25 = vmul.f32 %v3660_v18, %v3635_v37 }
 0xb3f   : > { %v3667_v33 = vmul.f32 %v3659_v36, %v3634_v35 }
 0xb41   : > { %4523 = vmatprep.mubr.msk.f32.mxu1 %vm3677_vm3, %v3667_v33 }
 0xb42   : > { %4524 = vmatmul.mubr.msk.f32.gmra.mrb[50].mxu1 %vm3677_vm3, %v3668_v25 }
 0xc09   : > { %v4516_v22 = vpop.f32.mrb[44].mxu1 }
 0xc0a   : > { %v3808_v42 = vadd.f32 %v4516_v22, %v5405_v12  ;;  %v3768_v43 = vpop.f32.mrb[45].mxu1 }
 0xc0b   : > { %v3807_v45 = vadd.f32 %v3768_v43, %v5408_v55 }
 0xc0c   : > { %v3823_v47 = vadd.f32 %v4075_v40, %v3808_v42 }
 0xc0d   : > { %v3822_v44 = vadd.f32 %v4075_v40, %v3807_v45  ;;  %v4519_v51 = vpop.f32.mrb[46].mxu1 }
 0xc0e   : > { %3831 = vst.msk [vmem:[%s626_s22 + $0x8] sm:$0xff] %vm646_vm0, %v3823_v47  ;;  %v3810_v20 = vadd.f32 %v4519_v51, %v5415_v38  ;;  %v3778_v52 = vpop.f32.mrb[47].mxu1 }
 0xc0f   : > { %3830 = vst.msk [vmem:[%s626_s22] sm:$0xff] %vm646_vm0, %v3822_v44  ;;  %v3809_v53 = vadd.f32 %v3778_v52, %v5418_v6 }
 0xc10   : > { %v3825_v12 = vadd.f32 %v4075_v40, %v3810_v20 }
 0xc11   : > { %v3824_v63 = vadd.f32 %v4075_v40, %v3809_v53  ;;  %v4522_v1 = vpop.f32.mrb[48].mxu1 }
 0xc12   : > { %3833 = vst.msk [vmem:[%s626_s22 + $0x18] sm:$0xff] %vm646_vm0, %v3825_v12  ;;  %v3812_v54 = vadd.f32 %v4522_v1, %v5425_v17  ;;  %v3788_v55 = vpop.f32.mrb[49].mxu1 }
 0xc13   : > { %3832 = vst.msk [vmem:[%s626_s22 + $0x10] sm:$0xff] %vm646_vm0, %v3824_v63  ;;  %v3811_v56 = vadd.f32 %v3788_v55, %v5428_v23 }
 0xc14   : > { %v3827_v2 = vadd.f32 %v4075_v40, %v3812_v54 }
 0xc15   : > { %v3826_v0 = vadd.f32 %v4075_v40, %v3811_v56  ;;  %v4525_v38 = vpop.f32.mrb[50].mxu1 }
 0xc16   : > { %3835 = vst.msk [vmem:[%s626_s22 + $0x28] sm:$0xff] %vm646_vm0, %v3827_v2  ;;  %v3814_v46 = vadd.f32 %v4525_v38, %v5435_v32  ;;  %v3798_v6 = vpop.f32.mrb[51].mxu1 }
 0xc17   : > { %3834 = vst.msk [vmem:[%s626_s22 + $0x20] sm:$0xff] %vm646_vm0, %v3826_v0  ;;  %v3813_v59 = vadd.f32 %v3798_v6, %v5438_v27 }
 0xc18   : > { %v3829_v48 = vadd.f32 %v4075_v40, %v3814_v46 }
 0xc19   : > { %v3828_v11 = vadd.f32 %v4075_v40, %v3813_v59 }
 0xc1a   : > { %3837 = vst.msk [vmem:[%s626_s22 + $0x38] sm:$0xff] %vm646_vm0, %v3829_v48 }
 0xc1b   : > { %3836 = vst.msk [vmem:[%s626_s22 + $0x30] sm:$0xff] %vm646_vm0, %v3828_v11 }
 0xc1c PF: > { %s29_s0 = sadd.s32 1, %s4792_s0  }
 0xc1d   : > { %p26_p4 = scmp.ge.s32.totalorder %s29_s0, 4  }
 0xc1f   :  { %28 = sbr.rel (!%p26_p4) target bundleno = 5 (0x5), region = 137 }

</bundles_post_ra>
